<compile_context>
chip_gen: v7x
topology: tpu7x:2x2x1
jax: 0.10.0
libtpu: 0.0.40
codegen_flags: <defaults>
</compile_context>

<pallas_src>
import math
import functools

import jax
import jax.numpy as jnp
import numpy as np
from jax.experimental import pallas as pl
from jax.experimental.pallas import tpu as pltpu

# --------------- tinyBloom model args (scaled down, dropout disabled) --------
# Original tinyBloom: hidden=128, ffn=512, heads=1, kv=128, seq=512, batch=16.
# Hidden/ffn/head dims kept exactly; seq/batch shrunk for a small example.
HIDDEN_SIZE = 128
FFN_HIDDEN_SIZE = 512
NUM_HEADS = 1
KV_CHANNELS = 128
SEQ_LENGTH = 128
MICRO_BATCH = 2
NUM_LAYERS = 2
INIT_STD = 0.0048
LN_EPS = 1e-5
LAYER_NUMBER = 1  # layer numbers count from 1


# ----------------------------- alibi construction ----------------------------
def get_slopes(n):
    def pow2_slopes(n):
        start = 2 ** (-2 ** (-(math.log2(n) - 3)))
        return [start * start ** i for i in range(n)]

    if math.log2(n).is_integer():
        return pow2_slopes(n)
    closest = 2 ** math.floor(math.log2(n))
    return pow2_slopes(closest) + get_slopes(2 * closest)[0::2][: n - closest]


def build_alibi(seq_len, num_heads, batch):
    # Only used by the pure-JAX reference; the kernel regenerates alibi from
    # one iota and the (compile-time) slope.
    assert num_heads == 1, "written for num_attention_heads == 1"
    slopes = jnp.asarray(get_slopes(num_heads), dtype=jnp.float32)      # [1]
    row = slopes[:, None] * jnp.arange(seq_len, dtype=jnp.float32)[None, :]
    return jnp.tile(row[None, :, :], (batch, 1, 1))                     # [B,1,S]


# --------------------------------- kernel ------------------------------------
def _layernorm(x, w, b, eps):
    # Single-pass variance: E[x^2] - mu^2.  Fine for activations with modest
    # mean/std ratio (this test); switch to two-pass for grown residual streams.
    mu = jnp.mean(x, axis=-1, keepdims=True)
    var = jnp.mean(x * x, axis=-1, keepdims=True) - mu * mu
    return (x - mu) * jax.lax.rsqrt(var + eps) * w + b


def _gelu_tanh(h):
    # tanh-approx GELU; tanh goes to the EUP slot instead of a long VALU chain.
    # Runs in whatever dtype `h` carries (bf16 on v6e/v7x, f32 on v5e).
    c = 0.7978845608028654  # sqrt(2/pi)
    return 0.5 * h * (1.0 + jnp.tanh(c * (h + 0.044715 * (h * h * h))))


def transformer_layer_kernel(
    x_ref,
    ln1_w_ref, ln1_b_ref,
    wqkv_ref, bqkv_ref,
    wdense_ref, bdense_ref,
    ln2_w_ref, ln2_b_ref,
    wfc1_ref, bfc1_ref,
    wfc2_ref, bfc2_ref,
    out_ref,
    *, alibi_coeff, eps, bf16_elementwise,
):
    xb = x_ref[...]                       # [Bp, S, H] f32
    Bp, S, H = xb.shape
    x = xb.reshape(Bp * S, H)             # fold batch into matmul M dim

    # ---- input layernorm ----
    ln1 = _layernorm(x, ln1_w_ref[...], ln1_b_ref[...], eps)

    # ---- fused QKV projection (bf16 operands, f32 accumulation) ----
    # The Q columns of wqkv/bqkv already carry the 1/sqrt(kv) qk scale
    # (folded on the host), so no per-score multiply is needed below.
    qkv = jnp.dot(ln1.astype(jnp.bfloat16), wqkv_ref[...],
                  preferred_element_type=jnp.float32) + bqkv_ref[...]
    q = qkv[:, :H].reshape(Bp, S, H).astype(jnp.bfloat16)
    k = qkv[:, H:2 * H].reshape(Bp, S, H).astype(jnp.bfloat16)
    v = qkv[:, 2 * H:].reshape(Bp, S, H).astype(jnp.bfloat16)

    # ---- one precomputed [S,S] bias: alibi + causal mask, built once ----
    col = jax.lax.broadcasted_iota(jnp.int32, (S, S), 1)
    row = jax.lax.broadcasted_iota(jnp.int32, (S, S), 0)
    masked_bias = jnp.where(col <= row,
                            alibi_coeff * col.astype(jnp.float32),
                            jnp.float32(-10000.0))                    # [S, S]

    # ---- attention scores (qk scale pre-folded into q) ----
    scores = masked_bias[None, :, :] + jnp.einsum(
        "bqd,bkd->bqk", q, k, preferred_element_type=jnp.float32)

    # ---- softmax with deferred normalization ----
    m = jnp.max(scores, axis=-1, keepdims=True)          # f32 reduction
    shifted = scores - m
    if bf16_elementwise:
        p = jnp.exp(shifted.astype(jnp.bfloat16))         # bf16 EUP exp
    else:
        p = jnp.exp(shifted).astype(jnp.bfloat16)         # f32 exp, bf16 at producer
    denom = jnp.sum(p, axis=-1, keepdims=True, dtype=jnp.float32)   # f32 reduction

    # ---- context (unnormalized) then scale by 1/rowsum on [Bp,S,H] ----
    ctx = jnp.einsum("bqk,bkd->bqd", p, v,
                     preferred_element_type=jnp.float32)
    ctx = ctx * pl.reciprocal(denom, approx=True)
    ctx = ctx.reshape(Bp * S, H)

    attn = jnp.dot(ctx.astype(jnp.bfloat16), wdense_ref[...],
                   preferred_element_type=jnp.float32) + bdense_ref[...]

    # ---- residual + post-attention layernorm ----
    ln_in = x + attn
    ln2 = _layernorm(ln_in, ln2_w_ref[...], ln2_b_ref[...], eps)

    # ---- MLP: h->4h, gelu, 4h->h ----
    h = jnp.dot(ln2.astype(jnp.bfloat16), wfc1_ref[...],
                preferred_element_type=jnp.float32) + bfc1_ref[...]
    if bf16_elementwise:
        g = _gelu_tanh(h.astype(jnp.bfloat16))            # bf16 VPU/EUP, fc2-ready
    else:
        g = _gelu_tanh(h).astype(jnp.bfloat16)            # f32 math, bf16 at producer
    mlp = jnp.dot(g, wfc2_ref[...],
                  preferred_element_type=jnp.float32) + bfc2_ref[...]

    out_ref[...] = (ln_in + mlp).reshape(Bp, S, H).astype(out_ref.dtype)


def _has_bf16_vector_units():
    # v6e/v7x VPU+EUP run bf16 natively; v5-and-older do not (bf16 elementwise
    # would decompose and regress there).  Detection only picks a fast path —
    # both paths are numerically correct on any chip.
    try:
        kind = jax.devices()[0].device_kind.lower()
    except Exception:
        return True
    for tag in ("v2", "v3", "v4", "v5"):
        if tag in kind:
            return False
    return True


def transformer_layer_pallas(x, params, *, layer_number, eps,
                             batch_per_block=None, bf16_elementwise=None):
    B, S, H = x.shape
    # Default: whole batch in one block (grid=(1,)) so every projection matmul
    # sees M = B*S rows and per-call launch / DMA overhead is paid once.  Pass
    # batch_per_block explicitly (e.g. B//2) to experiment with a dual-TC split
    # on v7x — no silent device-kind-based grid changes.
    if batch_per_block is None:
        batch_per_block = B
    assert B % batch_per_block == 0
    grid_b = B // batch_per_block

    if bf16_elementwise is None:
        bf16_elementwise = _has_bf16_vector_units()

    # Fold the ScaleMaskSoftmax scale into the score coefficients
    # (beta*scale == 1.0 and alpha*scale == 1/sqrt(kv) for every layer), and
    # fold the qk coefficient straight into the Q slice of the QKV weights.
    slope = get_slopes(NUM_HEADS)[0]
    beta = 1.0 / layer_number
    alpha = 1.0 / (math.sqrt(KV_CHANNELS) * layer_number)
    scale = float(layer_number)
    alibi_coeff = float(slope * beta * scale)
    qk_coeff = float(alpha * scale)          # == 1/sqrt(kv_channels)

    kernel = functools.partial(
        transformer_layer_kernel,
        alibi_coeff=alibi_coeff,
        eps=eps,
        bf16_elementwise=bool(bf16_elementwise),
    )

    # bf16 weights for the MXU; biases / LN params stay f32 (added post-accum).
    f32, bf16 = jnp.float32, jnp.bfloat16
    proj = KV_CHANNELS * NUM_HEADS
    q_scale = jnp.concatenate(
        [jnp.full((proj,), qk_coeff, f32), jnp.ones((2 * proj,), f32)])
    w_qkv = (params["w_qkv"] * q_scale[None, :]).astype(bf16)   # fold in f32, then cast
    b_qkv = params["b_qkv"] * q_scale[None, :]                  # stays f32
    w_dense = params["w_dense"].astype(bf16)
    w_fc1 = params["w_fc1"].astype(bf16)
    w_fc2 = params["w_fc2"].astype(bf16)

    full2d = lambda a: pl.BlockSpec(a.shape, lambda g: (0, 0))
    in_specs = [
        pl.BlockSpec((batch_per_block, S, H), lambda g: (g, 0, 0)),   # hidden states
        full2d(params["ln1_w"]), full2d(params["ln1_b"]),
        full2d(w_qkv), full2d(b_qkv),
        full2d(w_dense), full2d(params["b_dense"]),
        full2d(params["ln2_w"]), full2d(params["ln2_b"]),
        full2d(w_fc1), full2d(params["b_fc1"]),
        full2d(w_fc2), full2d(params["b_fc2"]),
    ]
    return pl.pallas_call(
        kernel,
        out_shape=jax.ShapeDtypeStruct((B, S, H), x.dtype),
        grid_spec=pltpu.PrefetchScalarGridSpec(
            num_scalar_prefetch=0,
            grid=(grid_b,),
            in_specs=in_specs,
            out_specs=pl.BlockSpec((batch_per_block, S, H), lambda g: (g, 0, 0)),
        ),
        compiler_params=pltpu.CompilerParams(
            dimension_semantics=("parallel",),
        ),
    )(
        x,
        params["ln1_w"], params["ln1_b"],
        w_qkv, b_qkv,
        w_dense, params["b_dense"],
        params["ln2_w"], params["ln2_b"],
        w_fc1, params["b_fc1"],
        w_fc2, params["b_fc2"],
    )


# ------------------------------ pure-JAX reference ---------------------------
def reference_forward(x, alibi, params, *, layer_number, eps):
    def ln(v, w, b):
        mu = jnp.mean(v, -1, keepdims=True)
        var = jnp.mean((v - mu) ** 2, -1, keepdims=True)
        return (v - mu) / jnp.sqrt(var + eps) * w + b

    H = x.shape[-1]
    S = x.shape[1]
    residual = x
    h1 = ln(x, params["ln1_w"][0], params["ln1_b"][0])
    qkv = h1 @ params["w_qkv"] + params["b_qkv"][0]
    q, k, v = qkv[..., :H], qkv[..., H:2 * H], qkv[..., 2 * H:]
    beta = 1.0 / layer_number
    alpha = 1.0 / (math.sqrt(KV_CHANNELS) * layer_number)
    scores = beta * alibi + alpha * jnp.einsum("bqd,bkd->bqk", q, k)
    scores = scores * layer_number
    mask = jnp.tril(jnp.ones((S, S), bool))
    scores = jnp.where(mask, scores, jnp.float32(-10000.0))
    probs = jax.nn.softmax(scores, axis=-1)
    ctx = jnp.einsum("bqk,bkd->bqd", probs, v)
    attn = ctx @ params["w_dense"] + params["b_dense"][0]
    ln_in = residual + attn
    h2 = ln(ln_in, params["ln2_w"][0], params["ln2_b"][0])
    hh = h2 @ params["w_fc1"] + params["b_fc1"][0]
    hh = 0.5 * hh * (1.0 + jax.scipy.special.erf(hh / math.sqrt(2.0)))
    mlp = hh @ params["w_fc2"] + params["b_fc2"][0]
    return ln_in + mlp


# ---------------------------------- main --------------------------------------
def init_params(key):
    out_std = INIT_STD / math.sqrt(2.0 * NUM_LAYERS)
    ks = jax.random.split(key, 4)
    f32 = jnp.float32
    proj = KV_CHANNELS * NUM_HEADS
    return {
        "ln1_w": jnp.ones((1, HIDDEN_SIZE), f32),
        "ln1_b": jnp.zeros((1, HIDDEN_SIZE), f32),
        "w_qkv": INIT_STD * jax.random.normal(ks[0], (HIDDEN_SIZE, 3 * proj), f32),
        "b_qkv": jnp.zeros((1, 3 * proj), f32),
        "w_dense": out_std * jax.random.normal(ks[1], (proj, HIDDEN_SIZE), f32),
        "b_dense": jnp.zeros((1, HIDDEN_SIZE), f32),
        "ln2_w": jnp.ones((1, HIDDEN_SIZE), f32),
        "ln2_b": jnp.zeros((1, HIDDEN_SIZE), f32),
        "w_fc1": INIT_STD * jax.random.normal(ks[2], (HIDDEN_SIZE, FFN_HIDDEN_SIZE), f32),
        "b_fc1": jnp.zeros((1, FFN_HIDDEN_SIZE), f32),
        "w_fc2": out_std * jax.random.normal(ks[3], (FFN_HIDDEN_SIZE, HIDDEN_SIZE), f32),
        "b_fc2": jnp.zeros((1, HIDDEN_SIZE), f32),
    }


if __name__ == "__main__":
    key = jax.random.PRNGKey(0)
    k_x, k_p = jax.random.split(key)
    x = jax.random.normal(k_x, (MICRO_BATCH, SEQ_LENGTH, HIDDEN_SIZE), jnp.float32)
    params = init_params(k_p)

    out = transformer_layer_pallas(x, params, layer_number=LAYER_NUMBER, eps=LN_EPS)
    out = jax.block_until_ready(out)

    alibi = build_alibi(SEQ_LENGTH, NUM_HEADS, MICRO_BATCH)  # [B, 1, S]
    ref = jax.block_until_ready(
        reference_forward(x, alibi, params, layer_number=LAYER_NUMBER, eps=LN_EPS))
    # bf16 MXU operands / bf16 transcendentals / tanh-GELU / approx reciprocal
    # introduce small (<1e-3) deviations on the (tiny) attn/mlp contributions.
    np.testing.assert_allclose(np.asarray(out), np.asarray(ref), rtol=1e-2, atol=2e-3)

    print("KERNEL_OK")
</pallas_src>

<mosaic_0001>
module attributes {stable_mosaic.version = 11 : i64} {
  func.func @transformer_layer_kernel(%arg0: i32, %arg1: memref<2x128x128xf32, #tpu.memory_space<vmem>>, %arg2: memref<1x128xf32, #tpu.memory_space<vmem>>, %arg3: memref<1x128xf32, #tpu.memory_space<vmem>>, %arg4: memref<128x384xbf16, #tpu.memory_space<vmem>>, %arg5: memref<1x384xf32, #tpu.memory_space<vmem>>, %arg6: memref<128x128xbf16, #tpu.memory_space<vmem>>, %arg7: memref<1x128xf32, #tpu.memory_space<vmem>>, %arg8: memref<1x128xf32, #tpu.memory_space<vmem>>, %arg9: memref<1x128xf32, #tpu.memory_space<vmem>>, %arg10: memref<128x512xbf16, #tpu.memory_space<vmem>>, %arg11: memref<1x512xf32, #tpu.memory_space<vmem>>, %arg12: memref<512x128xbf16, #tpu.memory_space<vmem>>, %arg13: memref<1x128xf32, #tpu.memory_space<vmem>>, %arg14: memref<2x128x128xf32, #tpu.memory_space<vmem>>) attributes {dimension_semantics = [#tpu.dimension_semantics<parallel>], iteration_bounds = array<i64: 1>, scalar_prefetch = 0 : i64, scratch_operands = 0 : i64, tpu.core_type = #tpu.core_type<tc>, window_params = [{transform_indices = @transform_0, window_bounds = array<i64: 2, 128, 128>}, {pipeline_mode = #tpu.pipeline_mode<synchronous>, transform_indices = @transform_1, window_bounds = array<i64: 1, 128>}, {pipeline_mode = #tpu.pipeline_mode<synchronous>, transform_indices = @transform_2, window_bounds = array<i64: 1, 128>}, {pipeline_mode = #tpu.pipeline_mode<synchronous>, transform_indices = @transform_3, window_bounds = array<i64: 128, 384>}, {pipeline_mode = #tpu.pipeline_mode<synchronous>, transform_indices = @transform_4, window_bounds = array<i64: 1, 384>}, {pipeline_mode = #tpu.pipeline_mode<synchronous>, transform_indices = @transform_5, window_bounds = array<i64: 128, 128>}, {pipeline_mode = #tpu.pipeline_mode<synchronous>, transform_indices = @transform_6, window_bounds = array<i64: 1, 128>}, {pipeline_mode = #tpu.pipeline_mode<synchronous>, transform_indices = @transform_7, window_bounds = array<i64: 1, 128>}, {pipeline_mode = #tpu.pipeline_mode<synchronous>, transform_indices = @transform_8, window_bounds = array<i64: 1, 128>}, {pipeline_mode = #tpu.pipeline_mode<synchronous>, transform_indices = @transform_9, window_bounds = array<i64: 128, 512>}, {pipeline_mode = #tpu.pipeline_mode<synchronous>, transform_indices = @transform_10, window_bounds = array<i64: 1, 512>}, {pipeline_mode = #tpu.pipeline_mode<synchronous>, transform_indices = @transform_11, window_bounds = array<i64: 512, 128>}, {pipeline_mode = #tpu.pipeline_mode<synchronous>, transform_indices = @transform_12, window_bounds = array<i64: 1, 128>}, {transform_indices = @transform_13, window_bounds = array<i64: 2, 128, 128>}]} {
    %c0 = arith.constant 0 : index
    %c0_0 = arith.constant 0 : index
    %c0_1 = arith.constant 0 : index
    %0 = vector.load %arg1[%c0, %c0_0, %c0_1] : memref<2x128x128xf32, #tpu.memory_space<vmem>>, vector<2x128x128xf32>
    %1 = vector.shape_cast %0 : vector<2x128x128xf32> to vector<256x128xf32>
    %c0_2 = arith.constant 0 : index
    %c0_3 = arith.constant 0 : index
    %2 = vector.load %arg2[%c0_2, %c0_3] : memref<1x128xf32, #tpu.memory_space<vmem>>, vector<1x128xf32>
    %c0_4 = arith.constant 0 : index
    %c0_5 = arith.constant 0 : index
    %3 = vector.load %arg3[%c0_4, %c0_5] : memref<1x128xf32, #tpu.memory_space<vmem>>, vector<1x128xf32>
    %cst = arith.constant dense<0.000000e+00> : vector<256xf32>
    %4 = vector.multi_reduction <add>, %1, %cst [1] : vector<256x128xf32> to vector<256xf32>
    %5 = vector.shape_cast %4 : vector<256xf32> to vector<256x1xf32>
    %cst_6 = arith.constant 1.280000e+02 : f32
    %6 = vector.broadcast %cst_6 : f32 to vector<256x1xf32>
    %7 = arith.divf %5, %6 : vector<256x1xf32>
    %8 = arith.mulf %1, %1 : vector<256x128xf32>
    %cst_7 = arith.constant dense<0.000000e+00> : vector<256xf32>
    %9 = vector.multi_reduction <add>, %8, %cst_7 [1] : vector<256x128xf32> to vector<256xf32>
    %10 = vector.shape_cast %9 : vector<256xf32> to vector<256x1xf32>
    %cst_8 = arith.constant 1.280000e+02 : f32
    %11 = vector.broadcast %cst_8 : f32 to vector<256x1xf32>
    %12 = arith.divf %10, %11 : vector<256x1xf32>
    %13 = arith.mulf %7, %7 : vector<256x1xf32>
    %14 = arith.subf %12, %13 : vector<256x1xf32>
    %15 = vector.broadcast %7 : vector<256x1xf32> to vector<256x128xf32>
    %16 = arith.subf %1, %15 : vector<256x128xf32>
    %cst_9 = arith.constant 9.99999974E-6 : f32
    %17 = vector.broadcast %cst_9 : f32 to vector<256x1xf32>
    %18 = arith.addf %14, %17 : vector<256x1xf32>
    %19 = math.rsqrt %18 : vector<256x1xf32>
    %20 = vector.broadcast %19 : vector<256x1xf32> to vector<256x128xf32>
    %21 = arith.mulf %16, %20 : vector<256x128xf32>
    %22 = vector.broadcast %2 : vector<1x128xf32> to vector<256x128xf32>
    %23 = arith.mulf %21, %22 : vector<256x128xf32>
    %24 = vector.broadcast %3 : vector<1x128xf32> to vector<256x128xf32>
    %25 = arith.addf %23, %24 : vector<256x128xf32>
    %26 = arith.truncf %25 : vector<256x128xf32> to vector<256x128xbf16>
    %c0_10 = arith.constant 0 : index
    %c0_11 = arith.constant 0 : index
    %27 = vector.load %arg4[%c0_10, %c0_11] : memref<128x384xbf16, #tpu.memory_space<vmem>>, vector<128x384xbf16>
    %cst_12 = arith.constant dense<0.000000e+00> : vector<256x384xf32>
    %28 = tpu.matmul %26, %27, %cst_12 {dimension_numbers = #tpu.dot_dimension_numbers<[1], [0], [0], [1], [0, 0, 1, 1], [], []>} : vector<256x128xbf16>, vector<128x384xbf16>, vector<256x384xf32> -> vector<256x384xf32>
    %c0_13 = arith.constant 0 : index
    %c0_14 = arith.constant 0 : index
    %29 = vector.load %arg5[%c0_13, %c0_14] : memref<1x384xf32, #tpu.memory_space<vmem>>, vector<1x384xf32>
    %30 = vector.broadcast %29 : vector<1x384xf32> to vector<256x384xf32>
    %31 = arith.addf %28, %30 : vector<256x384xf32>
    %32 = vector.extract_strided_slice %31 {offsets = [0, 0], sizes = [256, 128], strides = [1, 1]} : vector<256x384xf32> to vector<256x128xf32>
    %33 = vector.shape_cast %32 : vector<256x128xf32> to vector<2x128x128xf32>
    %34 = arith.truncf %33 : vector<2x128x128xf32> to vector<2x128x128xbf16>
    %35 = vector.extract_strided_slice %31 {offsets = [0, 128], sizes = [256, 128], strides = [1, 1]} : vector<256x384xf32> to vector<256x128xf32>
    %36 = vector.shape_cast %35 : vector<256x128xf32> to vector<2x128x128xf32>
    %37 = arith.truncf %36 : vector<2x128x128xf32> to vector<2x128x128xbf16>
    %38 = vector.extract_strided_slice %31 {offsets = [0, 256], sizes = [256, 128], strides = [1, 1]} : vector<256x384xf32> to vector<256x128xf32>
    %39 = vector.shape_cast %38 : vector<256x128xf32> to vector<2x128x128xf32>
    %40 = arith.truncf %39 : vector<2x128x128xf32> to vector<2x128x128xbf16>
    %41 = tpu.iota {dimensions = array<i32: 1>} : vector<128x128xi32>
    %42 = tpu.iota {dimensions = array<i32: 0>} : vector<128x128xi32>
    %43 = arith.cmpi sle, %41, %42 : vector<128x128xi32>
    %44 = arith.sitofp %41 : vector<128x128xi32> to vector<128x128xf32>
    %cst_15 = arith.constant 3.906250e-03 : f32
    %45 = vector.broadcast %cst_15 : f32 to vector<128x128xf32>
    %46 = arith.mulf %45, %44 : vector<128x128xf32>
    %cst_16 = arith.constant -1.000000e+04 : f32
    %47 = vector.broadcast %cst_16 : f32 to vector<128x128xf32>
    %48 = arith.select %43, %46, %47 : vector<128x128xi1>, vector<128x128xf32>
    %49 = vector.shape_cast %48 : vector<128x128xf32> to vector<1x128x128xf32>
    "tpu.trace_start"() <{level = 10 : i32, message = "bqd,bkd->bqk"}> : () -> ()
    %cst_17 = arith.constant dense<0.000000e+00> : vector<2x128x128xf32>
    %50 = tpu.matmul %34, %37, %cst_17 {dimension_numbers = #tpu.dot_dimension_numbers<[2], [2], [1], [1], [0, 0, 0, 1, 1, 1], [0], [0]>} : vector<2x128x128xbf16>, vector<2x128x128xbf16>, vector<2x128x128xf32> -> vector<2x128x128xf32>
    "tpu.trace_stop"() : () -> ()
    %51 = vector.broadcast %49 : vector<1x128x128xf32> to vector<2x128x128xf32>
    %52 = arith.addf %51, %50 : vector<2x128x128xf32>
    %cst_18 = arith.constant dense<0xFF800000> : vector<2x128xf32>
    %53 = vector.multi_reduction <maximumf>, %52, %cst_18 [2] : vector<2x128x128xf32> to vector<2x128xf32>
    %54 = vector.shape_cast %53 : vector<2x128xf32> to vector<2x128x1xf32>
    %55 = vector.broadcast %54 : vector<2x128x1xf32> to vector<2x128x128xf32>
    %56 = arith.subf %52, %55 : vector<2x128x128xf32>
    %57 = arith.truncf %56 : vector<2x128x128xf32> to vector<2x128x128xbf16>
    %58 = math.exp %57 : vector<2x128x128xbf16>
    %59 = arith.extf %58 : vector<2x128x128xbf16> to vector<2x128x128xf32>
    %cst_19 = arith.constant dense<0.000000e+00> : vector<2x128xf32>
    %60 = vector.multi_reduction <add>, %59, %cst_19 [2] : vector<2x128x128xf32> to vector<2x128xf32>
    %61 = vector.shape_cast %60 : vector<2x128xf32> to vector<2x128x1xf32>
    "tpu.trace_start"() <{level = 10 : i32, message = "bqk,bkd->bqd"}> : () -> ()
    %cst_20 = arith.constant dense<0.000000e+00> : vector<2x128x128xf32>
    %62 = tpu.matmul %58, %40, %cst_20 {dimension_numbers = #tpu.dot_dimension_numbers<[2], [1], [1], [2], [0, 0, 0, 1, 1, 2], [0], [0]>} : vector<2x128x128xbf16>, vector<2x128x128xbf16>, vector<2x128x128xf32> -> vector<2x128x128xf32>
    "tpu.trace_stop"() : () -> ()
    %63 = tpu.reciprocal %61 {approx = true} : vector<2x128x1xf32> -> vector<2x128x1xf32>
    %64 = vector.broadcast %63 : vector<2x128x1xf32> to vector<2x128x128xf32>
    %65 = arith.mulf %62, %64 : vector<2x128x128xf32>
    %66 = vector.shape_cast %65 : vector<2x128x128xf32> to vector<256x128xf32>
    %67 = arith.truncf %66 : vector<256x128xf32> to vector<256x128xbf16>
    %c0_21 = arith.constant 0 : index
    %c0_22 = arith.constant 0 : index
    %68 = vector.load %arg6[%c0_21, %c0_22] : memref<128x128xbf16, #tpu.memory_space<vmem>>, vector<128x128xbf16>
    %cst_23 = arith.constant dense<0.000000e+00> : vector<256x128xf32>
    %69 = tpu.matmul %67, %68, %cst_23 {dimension_numbers = #tpu.dot_dimension_numbers<[1], [0], [0], [1], [0, 0, 1, 1], [], []>} : vector<256x128xbf16>, vector<128x128xbf16>, vector<256x128xf32> -> vector<256x128xf32>
    %c0_24 = arith.constant 0 : index
    %c0_25 = arith.constant 0 : index
    %70 = vector.load %arg7[%c0_24, %c0_25] : memref<1x128xf32, #tpu.memory_space<vmem>>, vector<1x128xf32>
    %71 = vector.broadcast %70 : vector<1x128xf32> to vector<256x128xf32>
    %72 = arith.addf %69, %71 : vector<256x128xf32>
    %73 = arith.addf %1, %72 : vector<256x128xf32>
    %c0_26 = arith.constant 0 : index
    %c0_27 = arith.constant 0 : index
    %74 = vector.load %arg8[%c0_26, %c0_27] : memref<1x128xf32, #tpu.memory_space<vmem>>, vector<1x128xf32>
    %c0_28 = arith.constant 0 : index
    %c0_29 = arith.constant 0 : index
    %75 = vector.load %arg9[%c0_28, %c0_29] : memref<1x128xf32, #tpu.memory_space<vmem>>, vector<1x128xf32>
    %cst_30 = arith.constant dense<0.000000e+00> : vector<256xf32>
    %76 = vector.multi_reduction <add>, %73, %cst_30 [1] : vector<256x128xf32> to vector<256xf32>
    %77 = vector.shape_cast %76 : vector<256xf32> to vector<256x1xf32>
    %cst_31 = arith.constant 1.280000e+02 : f32
    %78 = vector.broadcast %cst_31 : f32 to vector<256x1xf32>
    %79 = arith.divf %77, %78 : vector<256x1xf32>
    %80 = arith.mulf %73, %73 : vector<256x128xf32>
    %cst_32 = arith.constant dense<0.000000e+00> : vector<256xf32>
    %81 = vector.multi_reduction <add>, %80, %cst_32 [1] : vector<256x128xf32> to vector<256xf32>
    %82 = vector.shape_cast %81 : vector<256xf32> to vector<256x1xf32>
    %cst_33 = arith.constant 1.280000e+02 : f32
    %83 = vector.broadcast %cst_33 : f32 to vector<256x1xf32>
    %84 = arith.divf %82, %83 : vector<256x1xf32>
    %85 = arith.mulf %79, %79 : vector<256x1xf32>
    %86 = arith.subf %84, %85 : vector<256x1xf32>
    %87 = vector.broadcast %79 : vector<256x1xf32> to vector<256x128xf32>
    %88 = arith.subf %73, %87 : vector<256x128xf32>
    %cst_34 = arith.constant 9.99999974E-6 : f32
    %89 = vector.broadcast %cst_34 : f32 to vector<256x1xf32>
    %90 = arith.addf %86, %89 : vector<256x1xf32>
    %91 = math.rsqrt %90 : vector<256x1xf32>
    %92 = vector.broadcast %91 : vector<256x1xf32> to vector<256x128xf32>
    %93 = arith.mulf %88, %92 : vector<256x128xf32>
    %94 = vector.broadcast %74 : vector<1x128xf32> to vector<256x128xf32>
    %95 = arith.mulf %93, %94 : vector<256x128xf32>
    %96 = vector.broadcast %75 : vector<1x128xf32> to vector<256x128xf32>
    %97 = arith.addf %95, %96 : vector<256x128xf32>
    %98 = arith.truncf %97 : vector<256x128xf32> to vector<256x128xbf16>
    %c0_35 = arith.constant 0 : index
    %c0_36 = arith.constant 0 : index
    %99 = vector.load %arg10[%c0_35, %c0_36] : memref<128x512xbf16, #tpu.memory_space<vmem>>, vector<128x512xbf16>
    %cst_37 = arith.constant dense<0.000000e+00> : vector<256x512xf32>
    %100 = tpu.matmul %98, %99, %cst_37 {dimension_numbers = #tpu.dot_dimension_numbers<[1], [0], [0], [1], [0, 0, 1, 1], [], []>} : vector<256x128xbf16>, vector<128x512xbf16>, vector<256x512xf32> -> vector<256x512xf32>
    %c0_38 = arith.constant 0 : index
    %c0_39 = arith.constant 0 : index
    %101 = vector.load %arg11[%c0_38, %c0_39] : memref<1x512xf32, #tpu.memory_space<vmem>>, vector<1x512xf32>
    %102 = vector.broadcast %101 : vector<1x512xf32> to vector<256x512xf32>
    %103 = arith.addf %100, %102 : vector<256x512xf32>
    %104 = arith.truncf %103 : vector<256x512xf32> to vector<256x512xbf16>
    %cst_40 = arith.constant 5.000000e-01 : bf16
    %105 = vector.broadcast %cst_40 : bf16 to vector<256x512xbf16>
    %106 = arith.mulf %105, %104 : vector<256x512xbf16>
    %107 = arith.mulf %104, %104 : vector<256x512xbf16>
    %108 = arith.mulf %107, %104 : vector<256x512xbf16>
    %cst_41 = arith.constant 4.467770e-02 : bf16
    %109 = vector.broadcast %cst_41 : bf16 to vector<256x512xbf16>
    %110 = arith.mulf %109, %108 : vector<256x512xbf16>
    %111 = arith.addf %104, %110 : vector<256x512xbf16>
    %cst_42 = arith.constant 7.968750e-01 : bf16
    %112 = vector.broadcast %cst_42 : bf16 to vector<256x512xbf16>
    %113 = arith.mulf %112, %111 : vector<256x512xbf16>
    %114 = math.tanh %113 : vector<256x512xbf16>
    %cst_43 = arith.constant 1.000000e+00 : bf16
    %115 = vector.broadcast %cst_43 : bf16 to vector<256x512xbf16>
    %116 = arith.addf %115, %114 : vector<256x512xbf16>
    %117 = arith.mulf %106, %116 : vector<256x512xbf16>
    %c0_44 = arith.constant 0 : index
    %c0_45 = arith.constant 0 : index
    %118 = vector.load %arg12[%c0_44, %c0_45] : memref<512x128xbf16, #tpu.memory_space<vmem>>, vector<512x128xbf16>
    %cst_46 = arith.constant dense<0.000000e+00> : vector<256x128xf32>
    %119 = tpu.matmul %117, %118, %cst_46 {dimension_numbers = #tpu.dot_dimension_numbers<[1], [0], [0], [1], [0, 0, 1, 1], [], []>} : vector<256x512xbf16>, vector<512x128xbf16>, vector<256x128xf32> -> vector<256x128xf32>
    %c0_47 = arith.constant 0 : index
    %c0_48 = arith.constant 0 : index
    %120 = vector.load %arg13[%c0_47, %c0_48] : memref<1x128xf32, #tpu.memory_space<vmem>>, vector<1x128xf32>
    %121 = vector.broadcast %120 : vector<1x128xf32> to vector<256x128xf32>
    %122 = arith.addf %119, %121 : vector<256x128xf32>
    %123 = arith.addf %73, %122 : vector<256x128xf32>
    %124 = vector.shape_cast %123 : vector<256x128xf32> to vector<2x128x128xf32>
    %c0_49 = arith.constant 0 : index
    %c0_50 = arith.constant 0 : index
    %c0_51 = arith.constant 0 : index
    %125 = vector.load %arg14[%c0_49, %c0_50, %c0_51] : memref<2x128x128xf32, #tpu.memory_space<vmem>>, vector<2x128x128xf32>
    tpu.vector_store %arg14[%c0_49, %c0_50, %c0_51], %124 {strides = array<i32>} : memref<2x128x128xf32, #tpu.memory_space<vmem>>, vector<2x128x128xf32>,
    return
  }
  func.func @transform_0(%arg0: i32) -> (i32, i32, i32) {
    %c0_i32 = arith.constant 0 : i32
    %c0_i32_0 = arith.constant 0 : i32
    %c0_i32_1 = arith.constant 0 : i32
    return %arg0, %c0_i32, %c0_i32_0 : i32, i32, i32
  }
  func.func @transform_1(%arg0: i32) -> (i32, i32) {
    %c0_i32 = arith.constant 0 : i32
    %c0_i32_0 = arith.constant 0 : i32
    %c0_i32_1 = arith.constant 0 : i32
    return %c0_i32, %c0_i32_0 : i32, i32
  }
  func.func @transform_2(%arg0: i32) -> (i32, i32) {
    %c0_i32 = arith.constant 0 : i32
    %c0_i32_0 = arith.constant 0 : i32
    %c0_i32_1 = arith.constant 0 : i32
    return %c0_i32, %c0_i32_0 : i32, i32
  }
  func.func @transform_3(%arg0: i32) -> (i32, i32) {
    %c0_i32 = arith.constant 0 : i32
    %c0_i32_0 = arith.constant 0 : i32
    %c0_i32_1 = arith.constant 0 : i32
    return %c0_i32, %c0_i32_0 : i32, i32
  }
  func.func @transform_4(%arg0: i32) -> (i32, i32) {
    %c0_i32 = arith.constant 0 : i32
    %c0_i32_0 = arith.constant 0 : i32
    %c0_i32_1 = arith.constant 0 : i32
    return %c0_i32, %c0_i32_0 : i32, i32
  }
  func.func @transform_5(%arg0: i32) -> (i32, i32) {
    %c0_i32 = arith.constant 0 : i32
    %c0_i32_0 = arith.constant 0 : i32
    %c0_i32_1 = arith.constant 0 : i32
    return %c0_i32, %c0_i32_0 : i32, i32
  }
  func.func @transform_6(%arg0: i32) -> (i32, i32) {
    %c0_i32 = arith.constant 0 : i32
    %c0_i32_0 = arith.constant 0 : i32
    %c0_i32_1 = arith.constant 0 : i32
    return %c0_i32, %c0_i32_0 : i32, i32
  }
  func.func @transform_7(%arg0: i32) -> (i32, i32) {
    %c0_i32 = arith.constant 0 : i32
    %c0_i32_0 = arith.constant 0 : i32
    %c0_i32_1 = arith.constant 0 : i32
    return %c0_i32, %c0_i32_0 : i32, i32
  }
  func.func @transform_8(%arg0: i32) -> (i32, i32) {
    %c0_i32 = arith.constant 0 : i32
    %c0_i32_0 = arith.constant 0 : i32
    %c0_i32_1 = arith.constant 0 : i32
    return %c0_i32, %c0_i32_0 : i32, i32
  }
  func.func @transform_9(%arg0: i32) -> (i32, i32) {
    %c0_i32 = arith.constant 0 : i32
    %c0_i32_0 = arith.constant 0 : i32
    %c0_i32_1 = arith.constant 0 : i32
    return %c0_i32, %c0_i32_0 : i32, i32
  }
  func.func @transform_10(%arg0: i32) -> (i32, i32) {
    %c0_i32 = arith.constant 0 : i32
    %c0_i32_0 = arith.constant 0 : i32
    %c0_i32_1 = arith.constant 0 : i32
    return %c0_i32, %c0_i32_0 : i32, i32
  }
  func.func @transform_11(%arg0: i32) -> (i32, i32) {
    %c0_i32 = arith.constant 0 : i32
    %c0_i32_0 = arith.constant 0 : i32
    %c0_i32_1 = arith.constant 0 : i32
    return %c0_i32, %c0_i32_0 : i32, i32
  }
  func.func @transform_12(%arg0: i32) -> (i32, i32) {
    %c0_i32 = arith.constant 0 : i32
    %c0_i32_0 = arith.constant 0 : i32
    %c0_i32_1 = arith.constant 0 : i32
    return %c0_i32, %c0_i32_0 : i32, i32
  }
  func.func @transform_13(%arg0: i32) -> (i32, i32, i32) {
    %c0_i32 = arith.constant 0 : i32
    %c0_i32_0 = arith.constant 0 : i32
    %c0_i32_1 = arith.constant 0 : i32
    return %arg0, %c0_i32, %c0_i32_0 : i32, i32, i32
  }
}

</mosaic_0001>

<bundles_post_ra>
// kernel: tpu_custom_call.1
= control target key start
LH: loop header
LB: loop body
LE: loop exit
PB: predicated region body
PF: predicated region fallthrough
CT: control target
= control target key end

     0   :  { %18 = vsyncpa [#allocation3], 0  ;;  %s8911_s0 = inlined_call_operand.hbm [shape: f32[2,128,128], index: 0, kind: input, shape index: {}]   ;;  %s8912_s1 = inlined_call_operand.hbm [shape: f32[1,128], index: 1, kind: input, shape index: {}]   ;;  %s8913_s2 = inlined_call_operand.hbm [shape: f32[1,128], index: 2, kind: input, shape index: {}]   ;;  %s8914_s3 = inlined_call_operand.hbm [shape: bf16[128,384], index: 3, kind: input, shape index: {}]   ;;  %s8915_s4 = inlined_call_operand.vmem [shape: f32[1,384], index: 4, kind: input, shape index: {}]   ;;  %s8916_s5 = inlined_call_operand.hbm [shape: bf16[128,128], index: 5, kind: input, shape index: {}]   ;;  %s8917_s6 = inlined_call_operand.vmem [shape: f32[1,128], index: 6, kind: input, shape index: {}]   ;;  %s8918_s7 = inlined_call_operand.vmem [shape: f32[1,128], index: 7, kind: input, shape index: {}]   ;;  %s8919_s8 = inlined_call_operand.vmem [shape: f32[1,128], index: 8, kind: input, shape index: {}]   ;;  %s8920_s9 = inlined_call_operand.hbm [shape: bf16[128,512], index: 9, kind: input, shape index: {}]   ;;  %s8921_s10 = inlined_call_operand.vmem [shape: f32[1,512], index: 10, kind: input, shape index: {}]   ;;  %s8922_s11 = inlined_call_operand.hbm [shape: bf16[512,128], index: 11, kind: input, shape index: {}]   ;;  %s8923_s12 = inlined_call_operand.vmem [shape: f32[1,128], index: 12, kind: input, shape index: {}]   ;;  %s8924_s13 = inlined_call_operand.hbm [shape: f32[2,128,128], index: 13, kind: output, shape index: {}]  }
   0x1   :  { %19 = vsyncpa [#allocation6], 0 }
   0x2   :  { %20 = vsyncpa [#allocation9], 0 }
   0x3   :  { %21 = vsyncpa [#allocation12], 0 }
   0x4   :  { %22 = vsyncpa [#allocation4], 0  ;;  %s6140_s25 = smov [#allocation5]   ;;  %s6141_s27 = smov [#allocation8]  }
   0x5   :  { %s41_s26 = sshll.u32 %s6140_s25, 4  ;;  %s60_s28 = sshll.u32 %s6141_s27, 4  ;;  %s42_s26 = int_to_ptr.vmem [resolvable:$true] %s41_s26  ;;  %s6227_s28 = int_to_ptr.vmem [resolvable:$true] %s60_s28 }
   0x6   :  { %s5954_s14 = scalar_lea.hbm %s8912_s1, 16 }
   0x7   :  { %p5955_p0 = scmp.ne.s32.totalorder %s8912_s1, %s5954_s14  ;;  %p5958_p1 = scmp.lt.u32.totalorder %s5954_s14, %s8912_s1 }
   0x9   :  { %p5960_p2 = pnand %p5958_p1, %p5955_p0 }
   0xb   :  { %5963 = shalt.err (!%p5960_p2)
}
   0xc   :  { %s5964_s19 = scalar_lea.vmem %s42_s26, 16  ;;  %s5968_s20 = scalar_lea.vmem %s42_s26, 32 }
   0xd   :  { %p5965_p3 = scmp.ne.s32.totalorder %s42_s26, %s5964_s19  ;;  %p5969_p4 = scmp.lt.s32.totalorder %s42_s26, %s42_s26 }
   0xe   :  { %p5970_p5 = scmp.lt.s32.totalorder %s5968_s20, %s5964_s19 }
  0x10   :  { %p5971_p6 = por %p5970_p5, %p5969_p4 }
  0x12   :  { %p5972_p7 = pnand %p5971_p6, %p5965_p3 }
  0x14   :  { %5975 = shalt.err (!%p5972_p7)
}
  0x15   :  { %44 = dma.hbm_to_vmem [thread:$0]  %s8912_s1, 16, %s42_s26, [#allocation6]  }
  0x16   :  { %s5976_s25 = scalar_lea.hbm %s8914_s3, 3072 }
  0x17   :  { %p5977_p8 = scmp.ne.s32.totalorder %s8914_s3, %s5976_s25  ;;  %p5980_p9 = scmp.lt.u32.totalorder %s5976_s25, %s8914_s3 }
  0x19   :  { %p5982_p10 = pnand %p5980_p9, %p5977_p8 }
  0x1b   :  { %5985 = shalt.err (!%p5982_p10)
}
  0x1c   :  { %s5986_s15 = scalar_lea.vmem %s6227_s28, 3072  ;;  %p5991_p12 = scmp.lt.s32.totalorder %s6227_s28, %s6227_s28 }
  0x1d   :  { %p5987_p11 = scmp.ne.s32.totalorder %s6227_s28, %s5986_s15  ;;  %p5992_p13 = scmp.lt.s32.totalorder %s5986_s15, %s5986_s15 }
  0x1f   :  { %p5993_p0 = por %p5992_p13, %p5991_p12 }
  0x21   :  { %p5994_p1 = pnand %p5993_p0, %p5987_p11 }
  0x23   :  { %5997 = shalt.err (!%p5994_p1)
}
  0x24   :  { %s6142_s1 = smov 192   ;;  %s6143_s26 = smov 12  }
  0x25   :  { %66 = dma.hbm_to_vmem [thread:$0]  %s8914_s3, 3072, %s6227_s28, [#allocation9], %s6142_s1, %s6142_s1, %s6143_s26  }
  0x26   :  { %s6144_s18 = smov [#allocation11]   ;;  %s5998_s22 = scalar_lea.hbm %s8920_s9, 4096 }
  0x27   :  { %s92_s19 = sshll.u32 %s6144_s18, 4  ;;  %p5999_p2 = scmp.ne.s32.totalorder %s8920_s9, %s5998_s22  ;;  %s93_s19 = int_to_ptr.vmem [resolvable:$true] %s92_s19 }
  0x28   :  { %p6002_p3 = scmp.lt.u32.totalorder %s5998_s22, %s8920_s9 }
  0x2a   :  { %p6004_p4 = pnand %p6002_p3, %p5999_p2 }
  0x2c   :  { %6007 = shalt.err (!%p6004_p4)
}
  0x2d   :  { %s6008_s29 = scalar_lea.vmem %s93_s19, 4096  ;;  %p6013_p6 = scmp.lt.s32.totalorder %s93_s19, %s93_s19 }
  0x2e   :  { %p6009_p5 = scmp.ne.s32.totalorder %s93_s19, %s6008_s29  ;;  %p6014_p7 = scmp.lt.s32.totalorder %s6008_s29, %s6008_s29 }
  0x30   :  { %p6015_p8 = por %p6014_p7, %p6013_p6 }
  0x32   :  { %p6016_p9 = pnand %p6015_p8, %p6009_p5 }
  0x34   :  { %6019 = shalt.err (!%p6016_p9)
}
  0x35   :  { %s6145_s3 = smov 256   ;;  %s6146_s28 = smov 16  }
  0x36   :  { %98 = dma.hbm_to_vmem [thread:$0]  %s8920_s9, 4096, %s93_s19, [#allocation12], %s6145_s3, %s6145_s3, %s6146_s28  }
  0x37   :  { %s6147_s15 = smov [#allocation2]   ;;  %s6020_s17 = scalar_lea.hbm %s8911_s0, 4096 }
  0x38   :  { %s28_s1 = sshll.u32 %s6147_s15, 4  ;;  %p6021_p10 = scmp.ne.s32.totalorder %s8911_s0, %s6020_s17  ;;  %s29_s1 = int_to_ptr.vmem [resolvable:$true] %s28_s1 }
  0x39   :  { %p6024_p11 = scmp.lt.u32.totalorder %s6020_s17, %s8911_s0 }
  0x3b   :  { %p6026_p12 = pnand %p6024_p11, %p6021_p10 }
  0x3d   :  { %6029 = shalt.err (!%p6026_p12)
}
  0x3e   :  { %s6030_s23 = scalar_lea.vmem %s29_s1, 4096  ;;  %p6035_p0 = scmp.lt.s32.totalorder %s29_s1, %s29_s1 }
  0x3f   :  { %p6031_p13 = scmp.ne.s32.totalorder %s29_s1, %s6030_s23  ;;  %p6036_p1 = scmp.lt.s32.totalorder %s6030_s23, %s6030_s23 }
  0x41   :  { %p6037_p2 = por %p6036_p1, %p6035_p0 }
  0x43   :  { %p6038_p3 = pnand %p6037_p2, %p6031_p13 }
  0x45   :  { %6041 = shalt.err (!%p6038_p3)
}
  0x46   :  { %s6148_s9 = smov 128   ;;  %s6149_s19 = smov 8  }
  0x47   :  { %34 = dma.hbm_to_vmem [thread:$0]  %s8911_s0, 4096, %s29_s1, [#allocation3], %s6148_s9, %s6148_s9, %s6149_s19  }
  0x48   :  { %s6150_s27 = smov [#allocation7]   ;;  %s6151_s3 = smov [#allocation10]  }
  0x49   :  { %s51_s29 = sshll.u32 %s6150_s27, 4  ;;  %s74_s28 = sshll.u32 %s6151_s3, 4  ;;  %s52_s29 = int_to_ptr.vmem [resolvable:$true] %s51_s29  ;;  %s6285_s28 = int_to_ptr.vmem [resolvable:$true] %s74_s28 }
  0x4a   :  { %s6042_s15 = scalar_lea.hbm %s8913_s2, 16 }
  0x4b   :  { %p6043_p4 = scmp.ne.s32.totalorder %s8913_s2, %s6042_s15  ;;  %p6046_p5 = scmp.lt.u32.totalorder %s6042_s15, %s8913_s2 }
  0x4d   :  { %p6048_p6 = pnand %p6046_p5, %p6043_p4 }
  0x4f   :  { %6051 = shalt.err (!%p6048_p6)
}
  0x50   :  { %s6052_s0 = scalar_lea.vmem %s52_s29, 16  ;;  %s6056_s1 = scalar_lea.vmem %s52_s29, 32 }
  0x51   :  { %p6053_p7 = scmp.ne.s32.totalorder %s52_s29, %s6052_s0  ;;  %p6057_p8 = scmp.lt.s32.totalorder %s52_s29, %s52_s29 }
  0x52   :  { %p6058_p9 = scmp.lt.s32.totalorder %s6056_s1, %s6052_s0 }
  0x54   :  { %p6059_p10 = por %p6058_p9, %p6057_p8 }
  0x56   :  { %p6060_p11 = pnand %p6059_p10, %p6053_p7 }
  0x58   :  { %6063 = shalt.err (!%p6060_p11)
}
  0x59   :  { %54 = dma.hbm_to_vmem [thread:$0]  %s8913_s2, 16, %s52_s29, [#allocation6]  }
  0x5a   :  { %s6064_s24 = scalar_lea.hbm %s8916_s5, 1024 }
  0x5b   :  { %p6065_p12 = scmp.ne.s32.totalorder %s8916_s5, %s6064_s24  ;;  %p6068_p13 = scmp.lt.u32.totalorder %s6064_s24, %s8916_s5 }
  0x5d   :  { %p6070_p0 = pnand %p6068_p13, %p6065_p12 }
  0x5f   :  { %6073 = shalt.err (!%p6070_p0)
}
  0x60   :  { %s6074_s14 = scalar_lea.vmem %s6285_s28, 1024  ;;  %p6079_p2 = scmp.lt.s32.totalorder %s6285_s28, %s6285_s28 }
  0x61   :  { %p6075_p1 = scmp.ne.s32.totalorder %s6285_s28, %s6074_s14  ;;  %p6080_p3 = scmp.lt.s32.totalorder %s6074_s14, %s6074_s14 }
  0x63   :  { %p6081_p4 = por %p6080_p3, %p6079_p2 }
  0x65   :  { %p6082_p5 = pnand %p6081_p4, %p6075_p1 }
  0x67   :  { %6085 = shalt.err (!%p6082_p5)
}
  0x68   :  { %s6152_s2 = smov 64   ;;  %s6153_s29 = smov 4  }
  0x69   :  { %80 = dma.hbm_to_vmem [thread:$0]  %s8916_s5, 1024, %s6285_s28, [#allocation9], %s6152_s2, %s6152_s2, %s6153_s29  }
  0x6a   :  { %s6154_s16 = smov [#allocation13]   ;;  %s6086_s1 = scalar_lea.hbm %s8922_s11, 4096 }
  0x6b   :  { %s106_s17 = sshll.u32 %s6154_s16, 4  ;;  %p6087_p6 = scmp.ne.s32.totalorder %s8922_s11, %s6086_s1  ;;  %s107_s17 = int_to_ptr.vmem [resolvable:$true] %s106_s17 }
  0x6c   :  { %p6090_p7 = scmp.lt.u32.totalorder %s6086_s1, %s8922_s11 }
  0x6e   :  { %p6092_p8 = pnand %p6090_p7, %p6087_p6 }
  0x70   :  { %6095 = shalt.err (!%p6092_p8)
}
  0x71   :  { %s6096_s24 = scalar_lea.vmem %s107_s17, 4096  ;;  %p6101_p10 = scmp.lt.s32.totalorder %s107_s17, %s107_s17 }
  0x72   :  { %p6097_p9 = scmp.ne.s32.totalorder %s107_s17, %s6096_s24  ;;  %p6102_p11 = scmp.lt.s32.totalorder %s6096_s24, %s6096_s24 }
  0x74   :  { %p6103_p12 = por %p6102_p11, %p6101_p10 }
  0x76   :  { %p6104_p13 = pnand %p6103_p12, %p6097_p9 }
  0x78   :  { %6107 = shalt.err (!%p6104_p13)
}
  0x79   :  { %112 = dma.hbm_to_vmem [thread:$0]  %s8922_s11, 4096, %s107_s17, [#allocation12], %s6152_s2, %s6152_s2, %s6153_s29  }
  0x7a   :  { %6130 = dma.done.wait [#allocation3], 4096  }
  0x7b   :  { %6131 = vsyncadd [#allocation3], 4294963200 }
  0x7c   :  { %6132 = dma.done.wait [#allocation6], 32  }
  0x7d   :  { %6133 = vsyncadd [#allocation6], 4294967264 }
  0x7e   :  { %6134 = dma.done.wait [#allocation9], 4096  }
  0x7f   :  { %6135 = vsyncadd [#allocation9], 4294963200 }
  0x80   :  { %6136 = dma.done.wait [#allocation12], 8192  }
  0x81   :  { %6137 = vsyncadd [#allocation12], 4294959104  ;;  %v6328_v0 = vld [vmem:[#allocation2] sm:$0xff]  ;;  %v6330_v1 = vld [vmem:[#allocation2 + $0x8] sm:$0xff]  ;;  %v6155_v42 = vmov 0  }
  0x82   :  { %175 = vadd.xlane.f32.xlu0 %v6328_v0  ;;  %v272_v2 = vmul.f32 %v6328_v0, %v6328_v0  ;;  %v273_v3 = vmul.f32 %v6330_v1, %v6330_v1  ;;  %v6338_v4 = vld [vmem:[#allocation2 + $0x10] sm:$0xff]  ;;  %v6340_v5 = vld [vmem:[#allocation2 + $0x18] sm:$0xff]  ;;  %v6348_v9 = vld [vmem:[#allocation2 + $0x20] sm:$0xff]  ;;  %893 = vmatprep.mubr.bf16.mxu0 %v6155_v42 }
  0x83   :  { %v274_v6 = vmul.f32 %v6338_v4, %v6338_v4  ;;  %v275_v7 = vmul.f32 %v6340_v5, %v6340_v5  ;;  %v5450_v8 = vld [vmem:[#allocation8 + $0x4] ss:$12 sps:$4 sm:$0xff]   ;;  %v5452_v10 = vld [vmem:[#allocation8] ss:$12 sps:$4 sm:$0xff]   ;;  %v5453_v12 = vld [vmem:[#allocation8 + $0x1c] ss:$12 sps:$4 sm:$0xff]   ;;  %v276_v13 = vmul.f32 %v6348_v9, %v6348_v9  ;;  %1013 = vmatprep.mubr.bf16.mxu1 %v6155_v42 }
  0x84   :  { %304 = vadd.xlane.f32.xlu1 %v272_v2  ;;  %861 = vmatprep.subr.bf16.mxu0 %v5450_v8  ;;  %v6350_v11 = vld [vmem:[#allocation2 + $0x28] sm:$0xff]  ;;  %v6358_v16 = vld [vmem:[#allocation2 + $0x30] sm:$0xff]  ;;  %v5456_v17 = vld [vmem:[#allocation8 + $0x34] ss:$12 sps:$4 sm:$0xff]  }
  0x85   :  { %5417 = vmatprep.subr.bf16.mxu1 %v5450_v8  ;;  %862 = vmatpush1.bf16.msra.mxu0 %v5452_v10  ;;  %v5455_v14 = vld [vmem:[#allocation8 + $0x18] ss:$12 sps:$4 sm:$0xff]   ;;  %v277_v15 = vmul.f32 %v6350_v11, %v6350_v11  ;;  %v5458_v18 = vld [vmem:[#allocation8 + $0x30] ss:$12 sps:$4 sm:$0xff]   ;;  %v278_v21 = vmul.f32 %v6358_v16, %v6358_v16  ;;  %v5461_v22 = vld [vmem:[#allocation8 + $0x48] ss:$12 sps:$4 sm:$0xff]  }
  0x86   :  { %177 = vadd.xlane.f32.xlu0 %v6330_v1  ;;  %5425 = vmatpush1.bf16.msra.mxu1 %v5452_v10  ;;  %v6360_v19 = vld [vmem:[#allocation2 + $0x38] sm:$0xff]  ;;  %v6368_v24 = vld [vmem:[#allocation2 + $0x40] sm:$0xff]  ;;  %v5462_v25 = vld [vmem:[#allocation8 + $0x64] ss:$12 sps:$4 sm:$0xff]  }
  0x87   :  { %863 = vmatprep.subr.bf16.mxu0 %v5453_v12  ;;  %5418 = vmatprep.subr.bf16.mxu1 %v5453_v12  ;;  %v5459_v20 = vld [vmem:[#allocation8 + $0x4c] ss:$12 sps:$4 sm:$0xff]   ;;  %v279_v23 = vmul.f32 %v6360_v19, %v6360_v19  ;;  %v6370_v27 = vld [vmem:[#allocation2 + $0x48] sm:$0xff]  ;;  %v280_v28 = vmul.f32 %v6368_v24, %v6368_v24  ;;  %v5468_v33 = vld [vmem:[#allocation8 + $0x94] ss:$12 sps:$4 sm:$0xff]  }
  0x88   :  { %306 = vadd.xlane.f32.xlu1 %v273_v3  ;;  %v5464_v26 = vld [vmem:[#allocation8 + $0x60] ss:$12 sps:$4 sm:$0xff]   ;;  %v5465_v29 = vld [vmem:[#allocation8 + $0x7c] ss:$12 sps:$4 sm:$0xff]   ;;  %v5467_v30 = vld [vmem:[#allocation8 + $0x78] ss:$12 sps:$4 sm:$0xff]   ;;  %v281_v31 = vmul.f32 %v6370_v27, %v6370_v27 }
  0x89   :  { %864 = vmatpush1.bf16.msra.mxu0 %v5455_v14  ;;  %v6378_v32 = vld [vmem:[#allocation2 + $0x50] sm:$0xff]  ;;  %v6380_v34 = vld [vmem:[#allocation2 + $0x58] sm:$0xff]  ;;  %v6388_v40 = vld [vmem:[#allocation2 + $0x60] sm:$0xff] }
  0x8a   :  { %179 = vadd.xlane.f32.xlu0 %v6338_v4  ;;  %5426 = vmatpush1.bf16.msra.mxu1 %v5455_v14  ;;  %v5470_v35 = vld [vmem:[#allocation8 + $0x90] ss:$12 sps:$4 sm:$0xff]   ;;  %v282_v36 = vmul.f32 %v6378_v32, %v6378_v32  ;;  %v5471_v37 = vld [vmem:[#allocation8 + $0xac] ss:$12 sps:$4 sm:$0xff]   ;;  %v5473_v38 = vld [vmem:[#allocation8 + $0xa8] ss:$12 sps:$4 sm:$0xff]   ;;  %v283_v39 = vmul.f32 %v6380_v34, %v6380_v34  ;;  %v284_v43 = vmul.f32 %v6388_v40, %v6388_v40 }
  0x8b   :  { %865 = vmatprep.subr.bf16.mxu0 %v5456_v17  ;;  %5419 = vmatprep.subr.bf16.mxu1 %v5456_v17  ;;  %v6390_v41 = vld [vmem:[#allocation2 + $0x68] sm:$0xff]  ;;  %v6400_v45 = vld [vmem:[#allocation2 + $0x70] sm:$0xff]  ;;  %v6402_v46 = vld [vmem:[#allocation2 + $0x78] sm:$0xff] }
  0x8c   :  { %181 = vadd.xlane.f32.xlu1 %v6340_v5  ;;  %v285_v44 = vmul.f32 %v6390_v41, %v6390_v41  ;;  %v286_v47 = vmul.f32 %v6400_v45, %v6400_v45  ;;  %v287_v48 = vmul.f32 %v6402_v46, %v6402_v46  ;;  %v6410_v49 = vld [vmem:[#allocation2 + $0x80] sm:$0xff]  ;;  %v6412_v50 = vld [vmem:[#allocation2 + $0x88] sm:$0xff]  ;;  %v6420_v53 = vld [vmem:[#allocation2 + $0x90] sm:$0xff] }
  0x8d   :  { %866 = vmatpush1.bf16.msra.mxu0 %v5458_v18  ;;  %v288_v51 = vmul.f32 %v6410_v49, %v6410_v49  ;;  %v289_v52 = vmul.f32 %v6412_v50, %v6412_v50  ;;  %v6422_v54 = vld [vmem:[#allocation2 + $0x98] sm:$0xff]  ;;  %v290_v55 = vmul.f32 %v6420_v53, %v6420_v53  ;;  %v6430_v57 = vld [vmem:[#allocation2 + $0xa0] sm:$0xff]  ;;  %v6432_v58 = vld [vmem:[#allocation2 + $0xa8] sm:$0xff] }
  0x8e   :  { %308 = vadd.xlane.f32.xlu0 %v274_v6  ;;  %5427 = vmatpush1.bf16.msra.mxu1 %v5458_v18  ;;  %v291_v56 = vmul.f32 %v6422_v54, %v6422_v54  ;;  %v292_v59 = vmul.f32 %v6430_v57, %v6430_v57  ;;  %v293_v60 = vmul.f32 %v6432_v58, %v6432_v58  ;;  %v6440_v61 = vld [vmem:[#allocation2 + $0xb0] sm:$0xff]  ;;  %v6442_v62 = vld [vmem:[#allocation2 + $0xb8] sm:$0xff]  ;;  %v6450_v3 = vld [vmem:[#allocation2 + $0xc0] sm:$0xff] }
  0x8f   :  { %867 = vmatprep.subr.bf16.mxu0 %v5459_v20  ;;  %5420 = vmatprep.subr.bf16.mxu1 %v5459_v20  ;;  %v294_v63 = vmul.f32 %v6440_v61, %v6440_v61  ;;  %v295_v2 = vmul.f32 %v6442_v62, %v6442_v62  ;;  %v6452_v6 = vld [vmem:[#allocation2 + $0xc8] sm:$0xff]  ;;  %v6460_v10 = vld [vmem:[#allocation2 + $0xd0] sm:$0xff]  ;;  %v6462_v12 = vld [vmem:[#allocation2 + $0xd8] sm:$0xff] }
  0x90   :  { %310 = vadd.xlane.f32.xlu1 %v275_v7  ;;  %v296_v7 = vmul.f32 %v6450_v3, %v6450_v3  ;;  %v297_v8 = vmul.f32 %v6452_v6, %v6452_v6  ;;  %v299_v14 = vmul.f32 %v6462_v12, %v6462_v12  ;;  %v6472_v17 = vld [vmem:[#allocation2 + $0xe8] sm:$0xff] }
  0x91   :  { %868 = vmatpush1.bf16.msra.mxu0 %v5461_v22  ;;  %v301_v20 = vmul.f32 %v6472_v17, %v6472_v17 }
  0x92   :  { %183 = vadd.xlane.f32.xlu0 %v6348_v9  ;;  %5428 = vmatpush1.bf16.msra.mxu1 %v5461_v22  ;;  %v6482_v22 = vld [vmem:[#allocation2 + $0xf8] sm:$0xff] }
  0x93   :  { %869 = vmatprep.subr.bf16.mxu0 %v5462_v25  ;;  %5421 = vmatprep.subr.bf16.mxu1 %v5462_v25  ;;  %v303_v25 = vmul.f32 %v6482_v22, %v6482_v22 }
  0x94   :  { %185 = vadd.xlane.f32.xlu1 %v6350_v11 }
  0x95   :  { %870 = vmatpush1.bf16.msra.mxu0 %v5464_v26 }
  0x96   :  { %312 = vadd.xlane.f32.xlu0 %v276_v13  ;;  %5429 = vmatpush1.bf16.msra.mxu1 %v5464_v26  ;;  %v298_v13 = vmul.f32 %v6460_v10, %v6460_v10  ;;  %v6490_v26 = vld [vmem:[#allocation8 + $0x8] ss:$12 sps:$4 sm:$0xff]  }
  0x97   :  { %871 = vmatprep.subr.bf16.mxu0 %v5465_v29  ;;  %5422 = vmatprep.subr.bf16.mxu1 %v5465_v29 }
  0x98   :  { %314 = vadd.xlane.f32.xlu1 %v277_v15  ;;  %v6470_v15 = vld [vmem:[#allocation2 + $0xe0] sm:$0xff] }
  0x99   :  { %872 = vmatpush1.bf16.msra.mxu0 %v5467_v30  ;;  %v300_v18 = vmul.f32 %v6470_v15, %v6470_v15 }
  0x9a   :  { %187 = vadd.xlane.f32.xlu0 %v6358_v16  ;;  %5430 = vmatpush1.bf16.msra.mxu1 %v5467_v30 }
  0x9b   :  { %873 = vmatprep.subr.bf16.mxu0 %v5468_v33  ;;  %5423 = vmatprep.subr.bf16.mxu1 %v5468_v33 }
  0x9c   :  { %189 = vadd.xlane.f32.xlu1 %v6360_v19 }
  0x9d   :  { %874 = vmatpush1.bf16.msra.mxu0 %v5470_v35 }
  0x9e   :  { %316 = vadd.xlane.f32.xlu0 %v278_v21  ;;  %5431 = vmatpush1.bf16.msra.mxu1 %v5470_v35  ;;  %v6480_v21 = vld [vmem:[#allocation2 + $0xf0] sm:$0xff] }
  0x9f   :  { %875 = vmatprep.subr.bf16.mxu0 %v5471_v37  ;;  %5424 = vmatprep.subr.bf16.mxu1 %v5471_v37 }
  0xa0   :  { %318 = vadd.xlane.f32.xlu1 %v279_v23  ;;  %v302_v23 = vmul.f32 %v6480_v21, %v6480_v21 }
  0xa1   :  { %876 = vmatpush1.bf16.msra.mxu0 %v5473_v38 }
  0xa2   :  { %191 = vadd.xlane.f32.xlu0 %v6368_v24  ;;  %5432 = vmatpush1.bf16.msra.mxu1 %v5473_v38 }
  0xa3   :  { %5193 = vmatprep.subr.bf16.mxu1 %v6490_v26 }
  0xa4   :  { %193 = vadd.xlane.f32.xlu1 %v6370_v27 }
  0xa6   :  { %320 = vadd.xlane.f32.xlu0 %v280_v28 }
  0xa8   :  { %322 = vadd.xlane.f32.xlu1 %v281_v31 }
  0xaa   :  { %195 = vadd.xlane.f32.xlu0 %v6378_v32 }
  0xac   :  { %197 = vadd.xlane.f32.xlu1 %v6380_v34 }
  0xae   :  { %324 = vadd.xlane.f32.xlu0 %v282_v36 }
  0xb0   :  { %326 = vadd.xlane.f32.xlu1 %v283_v39 }
  0xb2   :  { %199 = vadd.xlane.f32.xlu0 %v6388_v40 }
  0xb4   :  { %201 = vadd.xlane.f32.xlu1 %v6390_v41 }
  0xb6   :  { %328 = vadd.xlane.f32.xlu0 %v284_v43 }
  0xb8   :  { %330 = vadd.xlane.f32.xlu1 %v285_v44 }
  0xba   :  { %203 = vadd.xlane.f32.xlu0 %v6400_v45 }
  0xbc   :  { %205 = vadd.xlane.f32.xlu1 %v6402_v46 }
  0xbe   :  { %332 = vadd.xlane.f32.xlu0 %v286_v47 }
  0xc0   :  { %334 = vadd.xlane.f32.xlu1 %v287_v48 }
  0xc2   :  { %207 = vadd.xlane.f32.xlu0 %v6410_v49 }
  0xc4   :  { %209 = vadd.xlane.f32.xlu1 %v6412_v50 }
  0xc6   :  { %336 = vadd.xlane.f32.xlu0 %v288_v51 }
  0xc8   :  { %338 = vadd.xlane.f32.xlu1 %v289_v52 }
  0xca   :  { %211 = vadd.xlane.f32.xlu0 %v6420_v53 }
  0xcc   :  { %213 = vadd.xlane.f32.xlu1 %v6422_v54 }
  0xce   :  { %340 = vadd.xlane.f32.xlu0 %v290_v55 }
  0xd0   :  { %342 = vadd.xlane.f32.xlu1 %v291_v56 }
  0xd2   :  { %215 = vadd.xlane.f32.xlu0 %v6430_v57 }
  0xd4   :  { %217 = vadd.xlane.f32.xlu1 %v6432_v58 }
  0xd6   :  { %344 = vadd.xlane.f32.xlu0 %v292_v59 }
  0xd8   :  { %346 = vadd.xlane.f32.xlu1 %v293_v60 }
  0xda   :  { %219 = vadd.xlane.f32.xlu0 %v6440_v61 }
  0xdc   :  { %221 = vadd.xlane.f32.xlu1 %v6442_v62 }
  0xde   :  { %348 = vadd.xlane.f32.xlu0 %v294_v63 }
  0xe0   :  { %350 = vadd.xlane.f32.xlu1 %v295_v2 }
  0xe2   :  { %223 = vadd.xlane.f32.xlu0 %v6450_v3 }
  0xe4   :  { %225 = vadd.xlane.f32.xlu1 %v6452_v6 }
  0xe6   :  { %352 = vadd.xlane.f32.xlu0 %v296_v7 }
  0xe8   :  { %354 = vadd.xlane.f32.xlu1 %v297_v8 }
  0xea   :  { %227 = vadd.xlane.f32.xlu0 %v6460_v10 }
  0xec   :  { %229 = vadd.xlane.f32.xlu1 %v6462_v12 }
  0xee   :  { %356 = vadd.xlane.f32.xlu0 %v298_v13 }
  0xf0   :  { %358 = vadd.xlane.f32.xlu1 %v299_v14 }
  0xf2   :  { %231 = vadd.xlane.f32.xlu0 %v6470_v15 }
  0xf4   :  { %233 = vadd.xlane.f32.xlu1 %v6472_v17 }
  0xf6   :  { %360 = vadd.xlane.f32.xlu0 %v300_v18 }
  0xf8   :  { %362 = vadd.xlane.f32.xlu1 %v301_v20 }
  0xfa   :  { %235 = vadd.xlane.f32.xlu0 %v6480_v21 }
  0xfc   :  { %237 = vadd.xlane.f32.xlu1 %v6482_v22 }
  0xfe   :  { %364 = vadd.xlane.f32.xlu0 %v302_v23 }
 0x100   :  { %366 = vadd.xlane.f32.xlu1 %v303_v25 }
 0x10f   :  { %v176_v28 = vpop.xlane.xlu0 %175 }
 0x110   :  { %v240_v29 = vmul.f32 0.0078125, %v176_v28 }
 0x111   :  { %v305_v30 = vpop.xlane.xlu1 %304 }
 0x112   :  { %v400_v31 = vmul.f32 %v240_v29, %v240_v29  ;;  %v368_v33 = vmul.f32 0.0078125, %v305_v30  ;;  %v464_v25 = vsub.f32 %v6328_v0, %v240_v29 }
 0x113   :  { %v178_v35 = vpop.xlane.xlu0 %177 }
 0x114   :  { %v432_v36 = vsub.f32 %v368_v33, %v400_v31  ;;  %v241_v37 = vmul.f32 0.0078125, %v178_v35 }
 0x115   :  { %v307_v38 = vpop.xlane.xlu1 %306 }
 0x116   :  { %v496_v39 = vadd.f32 1e-05, %v432_v36  ;;  %v401_v43 = vmul.f32 %v241_v37, %v241_v37  ;;  %v369_v44 = vmul.f32 0.0078125, %v307_v38 }
 0x117   :  { %v180_v47 = vpop.xlane.xlu0 %179 }
 0x118   :  { %5570 = vrsqrt.f32 %v496_v39  ;;  %v433_v48 = vsub.f32 %v369_v44, %v401_v43  ;;  %v242_v51 = vmul.f32 0.0078125, %v180_v47  ;;  %v6500_v43 = vld [vmem:[#allocation5] ss:$0 sm:$0xff]  ;;  %v465_v44 = vsub.f32 %v6330_v1, %v241_v37 }
 0x119   :  { %v182_v52 = vpop.xlane.xlu1 %181 }
 0x11a   :  { %v497_v55 = vadd.f32 1e-05, %v433_v48  ;;  %v402_v56 = vmul.f32 %v242_v51, %v242_v51  ;;  %v243_v59 = vmul.f32 0.0078125, %v182_v52 }
 0x11b   :  { %v309_v60 = vpop.xlane.xlu0 %308 }
 0x11c   :  { %5572 = vrsqrt.f32 %v497_v55  ;;  %v370_v63 = vmul.f32 0.0078125, %v309_v60  ;;  %v403_v7 = vmul.f32 %v243_v59, %v243_v59 }
 0x11d   :  { %v311_v2 = vpop.xlane.xlu1 %310 }
 0x11e   :  { %v434_v8 = vsub.f32 %v370_v63, %v402_v56  ;;  %v371_v13 = vmul.f32 0.0078125, %v311_v2 }
 0x11f   :  { %v184_v14 = vpop.xlane.xlu0 %183 }
 0x120   :  { %v498_v18 = vadd.f32 1e-05, %v434_v8  ;;  %v435_v20 = vsub.f32 %v371_v13, %v403_v7  ;;  %v6493_v23 = vmul.f32 0.0078125, %v184_v14  ;;  %v6508_v8 = vld [vmem:[#allocation7] ss:$0 sm:$0xff] }
 0x121   :  { %v186_v28 = vpop.xlane.xlu1 %185 }
 0x122   :  { %v5571_v30 = vpop.eup %5570  ;;  %5574 = vrsqrt.f32 %v498_v18  ;;  %v499_v31 = vadd.f32 1e-05, %v435_v20  ;;  %v404_v33 = vmul.f32 %v6493_v23, %v6493_v23  ;;  %v6498_v35 = vmul.f32 0.0078125, %v186_v28 }
 0x123   :  { %v313_v36 = vpop.xlane.xlu0 %312  ;;  %v560_v38 = vmul.f32 %v5571_v30, %v464_v25  ;;  %v466_v18 = vsub.f32 %v6338_v4, %v242_v51 }
 0x124   :  { %5576 = vrsqrt.f32 %v499_v31  ;;  %v372_v39 = vmul.f32 0.0078125, %v313_v36  ;;  %v405_v0 = vmul.f32 %v6498_v35, %v6498_v35  ;;  %v467_v36 = vsub.f32 %v6340_v5, %v243_v59 }
 0x125   :  { %v315_v47 = vpop.xlane.xlu1 %314  ;;  %v598_v60 = vmul.f32 %v6500_v43, %v560_v38 }
 0x126   :  { %v5573_v48 = vpop.eup %5572  ;;  %v436_v29 = vsub.f32 %v372_v39, %v404_v33  ;;  %v373_v52 = vmul.f32 0.0078125, %v315_v47 }
 0x127   :  { %v188_v55 = vpop.xlane.xlu0 %187  ;;  %v561_v56 = vmul.f32 %v5573_v48, %v465_v44  ;;  %v636_v28 = vadd.f32 %v6508_v8, %v598_v60 }
 0x128   :  { %v500_v63 = vadd.f32 1e-05, %v436_v29  ;;  %v437_v2 = vsub.f32 %v373_v52, %v405_v0  ;;  %v6506_v7 = vmul.f32 0.0078125, %v188_v55 }
 0x129   :  { %v190_v13 = vpop.xlane.xlu1 %189  ;;  %v599_v1 = vmul.f32 %v6500_v43, %v561_v56 }
 0x12a   :  { %5578 = vrsqrt.f32 %v500_v63  ;;  %v501_v37 = vadd.f32 1e-05, %v437_v2  ;;  %v406_v14 = vmul.f32 %v6506_v7, %v6506_v7  ;;  %v6514_v20 = vmul.f32 0.0078125, %v190_v13 }
 0x12b   :  { %v317_v25 = vpop.xlane.xlu0 %316  ;;  %v637_v30 = vadd.f32 %v6508_v8, %v599_v1  ;;  %v468_v13 = vsub.f32 %v6348_v9, %v6493_v23 }
 0x12c   :  { %v5575_v31 = vpop.eup %5574  ;;  %5580 = vrsqrt.f32 %v501_v37  ;;  %v374_v33 = vmul.f32 0.0078125, %v317_v25  ;;  %v407_v4 = vmul.f32 %v6514_v20, %v6514_v20 }
 0x12d   :  { %v319_v38 = vpop.xlane.xlu1 %318  ;;  %v6519_v39 = vpack.c.bf16 %v637_v30, %v636_v28  ;;  %v562_v44 = vmul.f32 %v5575_v31, %v466_v18  ;;  %v469_v30 = vsub.f32 %v6350_v11, %v6498_v35 }
 0x12e   :  { %v5577_v47 = vpop.eup %5576  ;;  %v438_v51 = vsub.f32 %v374_v33, %v406_v14  ;;  %v375_v48 = vmul.f32 0.0078125, %v319_v38 }
 0x12f   :  { %v192_v0 = vpop.xlane.xlu0 %191  ;;  %894 = vmatmul.mubr.bf16.vlgmr.msra.gmra.mrb[0].mxu0 %v6519_v39  ;;  %v563_v29 = vmul.f32 %v5577_v47, %v467_v36  ;;  %v600_v52 = vmul.f32 %v6500_v43, %v562_v44 }
 0x130   :  { %v502_v55 = vadd.f32 1e-05, %v438_v51  ;;  %v439_v56 = vsub.f32 %v375_v48, %v407_v4  ;;  %v6525_v60 = vmul.f32 0.0078125, %v192_v0  ;;  %903 = vmatprep.mubr.bf16.mxu0 %v6155_v42 }
 0x131   :  { %v194_v5 = vpop.xlane.xlu1 %193  ;;  %v601_v59 = vmul.f32 %v6500_v43, %v563_v29  ;;  %v638_v14 = vadd.f32 %v6508_v8, %v600_v52 }
 0x132   :  { %5582 = vrsqrt.f32 %v502_v55  ;;  %v503_v63 = vadd.f32 1e-05, %v439_v56  ;;  %v408_v2 = vmul.f32 %v6525_v60, %v6525_v60  ;;  %v6533_v1 = vmul.f32 0.0078125, %v194_v5 }
 0x133   :  { %v321_v37 = vpop.xlane.xlu0 %320  ;;  %v639_v18 = vadd.f32 %v6508_v8, %v601_v59  ;;  %v470_v56 = vsub.f32 %v6358_v16, %v6506_v7 }
 0x134   :  { %v5579_v25 = vpop.eup %5578  ;;  %5584 = vrsqrt.f32 %v503_v63  ;;  %v376_v28 = vmul.f32 0.0078125, %v321_v37  ;;  %v409_v9 = vmul.f32 %v6533_v1, %v6533_v1 }
 0x135   :  { %v323_v31 = vpop.xlane.xlu1 %322  ;;  %v6539_v33 = vpack.c.bf16 %v639_v18, %v638_v14  ;;  %v564_v36 = vmul.f32 %v5579_v25, %v468_v13  ;;  %v471_v14 = vsub.f32 %v6360_v19, %v6514_v20 }
 0x136   :  { %v5581_v38 = vpop.eup %5580  ;;  %v440_v23 = vsub.f32 %v376_v28, %v408_v2  ;;  %v377_v44 = vmul.f32 0.0078125, %v323_v31 }
 0x137   :  { %v196_v47 = vpop.xlane.xlu0 %195  ;;  %904 = vmatmul.mubr.bf16.gmra.mrb[4].mxu0 %v6539_v33  ;;  %v565_v4 = vmul.f32 %v5581_v38, %v469_v30  ;;  %v602_v51 = vmul.f32 %v6500_v43, %v564_v36 }
 0x138   :  { %v504_v48 = vadd.f32 1e-05, %v440_v23  ;;  %v441_v0 = vsub.f32 %v377_v44, %v409_v9  ;;  %v6545_v29 = vmul.f32 0.0078125, %v196_v47  ;;  %913 = vmatprep.mubr.bf16.mxu0 %v6155_v42 }
 0x139   :  { %v198_v11 = vpop.xlane.xlu1 %197  ;;  %v603_v35 = vmul.f32 %v6500_v43, %v565_v4  ;;  %v640_v63 = vadd.f32 %v6508_v8, %v602_v51 }
 0x13a   :  { %5586 = vrsqrt.f32 %v504_v48  ;;  %v505_v52 = vadd.f32 1e-05, %v441_v0  ;;  %v410_v55 = vmul.f32 %v6545_v29, %v6545_v29  ;;  %v6553_v5 = vmul.f32 0.0078125, %v198_v11 }
 0x13b   :  { %v325_v59 = vpop.xlane.xlu0 %324  ;;  %v641_v2 = vadd.f32 %v6508_v8, %v603_v35  ;;  %v472_v48 = vsub.f32 %v6368_v24, %v6525_v60 }
 0x13c   :  { %v5583_v13 = vpop.eup %5582  ;;  %5588 = vrsqrt.f32 %v505_v52  ;;  %v378_v37 = vmul.f32 0.0078125, %v325_v59  ;;  %v411_v16 = vmul.f32 %v6553_v5, %v6553_v5  ;;  %v473_v59 = vsub.f32 %v6370_v27, %v6533_v1 }
 0x13d   :  { %v327_v18 = vpop.xlane.xlu1 %326  ;;  %v6559_v25 = vpack.c.bf16 %v641_v2, %v640_v63  ;;  %v566_v28 = vmul.f32 %v5583_v13, %v470_v56 }
 0x13e   :  { %v5585_v30 = vpop.eup %5584  ;;  %v442_v7 = vsub.f32 %v378_v37, %v410_v55  ;;  %v379_v31 = vmul.f32 0.0078125, %v327_v18 }
 0x13f   :  { %v200_v36 = vpop.xlane.xlu0 %199  ;;  %914 = vmatmul.mubr.bf16.gmra.mrb[8].mxu0 %v6559_v25  ;;  %v567_v38 = vmul.f32 %v5585_v30, %v471_v14  ;;  %v604_v9 = vmul.f32 %v6500_v43, %v566_v28 }
 0x140   :  { %v506_v23 = vadd.f32 1e-05, %v442_v7  ;;  %v443_v44 = vsub.f32 %v379_v31, %v411_v16  ;;  %v6565_v47 = vmul.f32 0.0078125, %v200_v36  ;;  %923 = vmatprep.mubr.bf16.mxu0 %v6155_v42 }
 0x141   :  { %v202_v19 = vpop.xlane.xlu1 %201  ;;  %v605_v20 = vmul.f32 %v6500_v43, %v567_v38  ;;  %v642_v35 = vadd.f32 %v6508_v8, %v604_v9  ;;  %v474_v9 = vsub.f32 %v6378_v32, %v6545_v29 }
 0x142   :  { %5590 = vrsqrt.f32 %v506_v23  ;;  %v507_v4 = vadd.f32 1e-05, %v443_v44  ;;  %v412_v51 = vmul.f32 %v6565_v47, %v6565_v47  ;;  %v6573_v0 = vmul.f32 0.0078125, %v202_v19 }
 0x143   :  { %v329_v11 = vpop.xlane.xlu0 %328  ;;  %v643_v52 = vadd.f32 %v6508_v8, %v605_v20 }
 0x144   :  { %v5587_v55 = vpop.eup %5586  ;;  %5592 = vrsqrt.f32 %v507_v4  ;;  %v380_v56 = vmul.f32 0.0078125, %v329_v11  ;;  %v413_v24 = vmul.f32 %v6573_v0, %v6573_v0 }
 0x145   :  { %v331_v63 = vpop.xlane.xlu1 %330  ;;  %v6579_v2 = vpack.c.bf16 %v643_v52, %v642_v35  ;;  %v568_v13 = vmul.f32 %v5587_v55, %v472_v48  ;;  %v475_v48 = vsub.f32 %v6380_v34, %v6553_v5 }
 0x146   :  { %v5589_v37 = vpop.eup %5588  ;;  %v444_v60 = vsub.f32 %v380_v56, %v412_v51  ;;  %v381_v14 = vmul.f32 0.0078125, %v331_v63 }
 0x147   :  { %v204_v18 = vpop.xlane.xlu0 %203  ;;  %924 = vmatmul.mubr.bf16.gmra.mrb[12].mxu0 %v6579_v2  ;;  %v569_v28 = vmul.f32 %v5589_v37, %v473_v59  ;;  %v606_v30 = vmul.f32 %v6500_v43, %v568_v13 }
 0x148   :  { %v508_v16 = vadd.f32 1e-05, %v444_v60  ;;  %v445_v7 = vsub.f32 %v381_v14, %v413_v24  ;;  %v6585_v31 = vmul.f32 0.0078125, %v204_v18  ;;  %933 = vmatprep.mubr.bf16.mxu0 %v6155_v42 }
 0x149   :  { %v206_v27 = vpop.xlane.xlu1 %205  ;;  %v607_v1 = vmul.f32 %v6500_v43, %v569_v28  ;;  %v644_v19 = vadd.f32 %v6508_v8, %v606_v30  ;;  %v476_v28 = vsub.f32 %v6388_v40, %v6565_v47 }
 0x14a   :  { %5594 = vrsqrt.f32 %v508_v16  ;;  %v509_v36 = vadd.f32 1e-05, %v445_v7  ;;  %v414_v38 = vmul.f32 %v6585_v31, %v6585_v31  ;;  %v6593_v23 = vmul.f32 0.0078125, %v206_v27 }
 0x14b   :  { %v333_v44 = vpop.xlane.xlu0 %332  ;;  %v645_v20 = vadd.f32 %v6508_v8, %v607_v1 }
 0x14c   :  { %v5591_v4 = vpop.eup %5590  ;;  %5596 = vrsqrt.f32 %v509_v36  ;;  %v382_v51 = vmul.f32 0.0078125, %v333_v44  ;;  %v415_v32 = vmul.f32 %v6593_v23, %v6593_v23 }
 0x14d   :  { %v335_v11 = vpop.xlane.xlu1 %334  ;;  %v6599_v35 = vpack.c.bf16 %v645_v20, %v644_v19  ;;  %v570_v52 = vmul.f32 %v5591_v4, %v474_v9 }
 0x14e   :  { %v5593_v55 = vpop.eup %5592  ;;  %v446_v29 = vsub.f32 %v382_v51, %v414_v38  ;;  %v383_v56 = vmul.f32 0.0078125, %v335_v11  ;;  %v477_v38 = vsub.f32 %v6390_v41, %v6573_v0 }
 0x14f   :  { %v208_v59 = vpop.xlane.xlu0 %207  ;;  %934 = vmatmul.mubr.bf16.gmra.mrb[16].mxu0 %v6599_v35  ;;  %v571_v63 = vmul.f32 %v5593_v55, %v475_v48  ;;  %v608_v13 = vmul.f32 %v6500_v43, %v570_v52 }
 0x150   :  { %v510_v37 = vadd.f32 1e-05, %v446_v29  ;;  %v447_v24 = vsub.f32 %v383_v56, %v415_v32  ;;  %v6605_v60 = vmul.f32 0.0078125, %v208_v59  ;;  %943 = vmatprep.mubr.bf16.mxu0 %v6155_v42  ;;  %v478_v59 = vsub.f32 %v6400_v45, %v6585_v31 }
 0x151   :  { %v210_v34 = vpop.xlane.xlu1 %209  ;;  %v609_v5 = vmul.f32 %v6500_v43, %v571_v63  ;;  %v646_v7 = vadd.f32 %v6508_v8, %v608_v13 }
 0x152   :  { %5598 = vrsqrt.f32 %v510_v37  ;;  %v511_v14 = vadd.f32 1e-05, %v447_v24  ;;  %v416_v18 = vmul.f32 %v6605_v60, %v6605_v60  ;;  %v6613_v30 = vmul.f32 0.0078125, %v210_v34 }
 0x153   :  { %v337_v16 = vpop.xlane.xlu0 %336  ;;  %v647_v27 = vadd.f32 %v6508_v8, %v609_v5 }
 0x154   :  { %v5595_v1 = vpop.eup %5594  ;;  %5600 = vrsqrt.f32 %v511_v14  ;;  %v384_v36 = vmul.f32 0.0078125, %v337_v16  ;;  %v417_v40 = vmul.f32 %v6613_v30, %v6613_v30  ;;  %v479_v14 = vsub.f32 %v6402_v46, %v6593_v23 }
 0x155   :  { %v339_v9 = vpop.xlane.xlu1 %338  ;;  %v6619_v44 = vpack.c.bf16 %v647_v27, %v646_v7  ;;  %v572_v19 = vmul.f32 %v5595_v1, %v476_v28 }
 0x156   :  { %v5597_v20 = vpop.eup %5596  ;;  %v448_v47 = vsub.f32 %v384_v36, %v416_v18  ;;  %v385_v4 = vmul.f32 0.0078125, %v339_v9 }
 0x157   :  { %v212_v51 = vpop.xlane.xlu0 %211  ;;  %944 = vmatmul.mubr.bf16.gmra.mrb[20].mxu0 %v6619_v44  ;;  %v573_v48 = vmul.f32 %v5597_v20, %v477_v38  ;;  %v610_v11 = vmul.f32 %v6500_v43, %v572_v19 }
 0x158   :  { %v512_v52 = vadd.f32 1e-05, %v448_v47  ;;  %v449_v55 = vsub.f32 %v385_v4, %v417_v40  ;;  %v6625_v32 = vmul.f32 0.0078125, %v212_v51  ;;  %953 = vmatprep.mubr.bf16.mxu0 %v6155_v42  ;;  %v480_v4 = vsub.f32 %v6410_v49, %v6605_v60 }
 0x159   :  { %v214_v41 = vpop.xlane.xlu1 %213  ;;  %v611_v0 = vmul.f32 %v6500_v43, %v573_v48  ;;  %v648_v37 = vadd.f32 %v6508_v8, %v610_v11 }
 0x15a   :  { %5602 = vrsqrt.f32 %v512_v52  ;;  %v513_v29 = vadd.f32 1e-05, %v449_v55  ;;  %v418_v56 = vmul.f32 %v6625_v32, %v6625_v32  ;;  %v6633_v63 = vmul.f32 0.0078125, %v214_v41 }
 0x15b   :  { %v341_v13 = vpop.xlane.xlu0 %340  ;;  %v649_v24 = vadd.f32 %v6508_v8, %v611_v0  ;;  %v481_v0 = vsub.f32 %v6412_v50, %v6613_v30 }
 0x15c   :  { %v5599_v34 = vpop.eup %5598  ;;  %5604 = vrsqrt.f32 %v513_v29  ;;  %v386_v5 = vmul.f32 0.0078125, %v341_v13  ;;  %v419_v45 = vmul.f32 %v6633_v63, %v6633_v63 }
 0x15d   :  { %v343_v18 = vpop.xlane.xlu1 %342  ;;  %v6639_v28 = vpack.c.bf16 %v649_v24, %v648_v37  ;;  %v574_v16 = vmul.f32 %v5599_v34, %v478_v59 }
 0x15e   :  { %v5601_v7 = vpop.eup %5600  ;;  %v450_v31 = vsub.f32 %v386_v5, %v418_v56  ;;  %v387_v27 = vmul.f32 0.0078125, %v343_v18 }
 0x15f   :  { %v216_v1 = vpop.xlane.xlu0 %215  ;;  %954 = vmatmul.mubr.bf16.gmra.mrb[24].mxu0 %v6639_v28  ;;  %v575_v36 = vmul.f32 %v5601_v7, %v479_v14  ;;  %v612_v38 = vmul.f32 %v6500_v43, %v574_v16 }
 0x160   :  { %v514_v9 = vadd.f32 1e-05, %v450_v31  ;;  %v451_v19 = vsub.f32 %v387_v27, %v419_v45  ;;  %v6645_v20 = vmul.f32 0.0078125, %v216_v1  ;;  %963 = vmatprep.mubr.bf16.mxu0 %v6155_v42  ;;  %v482_v31 = vsub.f32 %v6420_v53, %v6625_v32 }
 0x161   :  { %v218_v46 = vpop.xlane.xlu1 %217  ;;  %v613_v23 = vmul.f32 %v6500_v43, %v575_v36  ;;  %v650_v11 = vadd.f32 %v6508_v8, %v612_v38 }
 0x162   :  { %5606 = vrsqrt.f32 %v514_v9  ;;  %v515_v40 = vadd.f32 1e-05, %v451_v19  ;;  %v420_v47 = vmul.f32 %v6645_v20, %v6645_v20  ;;  %v6653_v51 = vmul.f32 0.0078125, %v218_v46 }
 0x163   :  { %v345_v48 = vpop.xlane.xlu0 %344  ;;  %v651_v52 = vadd.f32 %v6508_v8, %v613_v23  ;;  %v483_v46 = vsub.f32 %v6422_v54, %v6633_v63 }
 0x164   :  { %v5603_v55 = vpop.eup %5602  ;;  %5608 = vrsqrt.f32 %v515_v40  ;;  %v388_v41 = vmul.f32 0.0078125, %v345_v48  ;;  %v421_v49 = vmul.f32 %v6653_v51, %v6653_v51 }
 0x165   :  { %v347_v29 = vpop.xlane.xlu1 %346  ;;  %v6659_v56 = vpack.c.bf16 %v651_v52, %v650_v11  ;;  %v576_v59 = vmul.f32 %v5603_v55, %v480_v4 }
 0x166   :  { %v5605_v13 = vpop.eup %5604  ;;  %v452_v60 = vsub.f32 %v388_v41, %v420_v47  ;;  %v389_v37 = vmul.f32 0.0078125, %v347_v29 }
 0x167   :  { %v220_v24 = vpop.xlane.xlu0 %219  ;;  %964 = vmatmul.mubr.bf16.gmra.mrb[28].mxu0 %v6659_v56  ;;  %v577_v34 = vmul.f32 %v5605_v13, %v481_v0  ;;  %v614_v5 = vmul.f32 %v6500_v43, %v576_v59 }
 0x168   :  { %v516_v14 = vadd.f32 1e-05, %v452_v60  ;;  %v453_v18 = vsub.f32 %v389_v37, %v421_v49  ;;  %v6665_v16 = vmul.f32 0.0078125, %v220_v24  ;;  %973 = vmatprep.mubr.bf16.mxu0 %v6155_v42  ;;  %v484_v49 = vsub.f32 %v6430_v57, %v6645_v20 }
 0x169   :  { %v222_v50 = vpop.xlane.xlu1 %221  ;;  %v615_v30 = vmul.f32 %v6500_v43, %v577_v34  ;;  %v652_v36 = vadd.f32 %v6508_v8, %v614_v5 }
 0x16a   :  { %5610 = vrsqrt.f32 %v516_v14  ;;  %v517_v7 = vadd.f32 1e-05, %v453_v18  ;;  %v422_v45 = vmul.f32 %v6665_v16, %v6665_v16  ;;  %v6673_v27 = vmul.f32 0.0078125, %v222_v50 }
 0x16b   :  { %v349_v1 = vpop.xlane.xlu0 %348  ;;  %v653_v38 = vadd.f32 %v6508_v8, %v615_v30  ;;  %v485_v18 = vsub.f32 %v6432_v58, %v6653_v51 }
 0x16c   :  { %v5607_v9 = vpop.eup %5606  ;;  %5612 = vrsqrt.f32 %v517_v7  ;;  %v390_v19 = vmul.f32 0.0078125, %v349_v1  ;;  %v423_v53 = vmul.f32 %v6673_v27, %v6673_v27 }
 0x16d   :  { %v351_v23 = vpop.xlane.xlu1 %350  ;;  %v6679_v40 = vpack.c.bf16 %v653_v38, %v652_v36  ;;  %v578_v47 = vmul.f32 %v5607_v9, %v482_v31 }
 0x16e   :  { %v5609_v4 = vpop.eup %5608  ;;  %v454_v32 = vsub.f32 %v390_v19, %v422_v45  ;;  %v391_v48 = vmul.f32 0.0078125, %v351_v23 }
 0x16f   :  { %974 = vmatmul.mubr.bf16.gmra.mrb[32].mxu0 %v6679_v40  ;;  %v224_v11 = vpop.xlane.xlu0 %223  ;;  %v579_v52 = vmul.f32 %v5609_v4, %v483_v46  ;;  %v616_v55 = vmul.f32 %v6500_v43, %v578_v47  ;;  %v486_v4 = vsub.f32 %v6440_v61, %v6665_v16 }
 0x170   :  { %v518_v41 = vadd.f32 1e-05, %v454_v32  ;;  %v455_v0 = vsub.f32 %v391_v48, %v423_v53  ;;  %v6685_v29 = vmul.f32 0.0078125, %v224_v11  ;;  %983 = vmatprep.mubr.bf16.mxu0 %v6155_v42 }
 0x171   :  { %v226_v54 = vpop.xlane.xlu1 %225  ;;  %v617_v63 = vmul.f32 %v6500_v43, %v579_v52  ;;  %v654_v24 = vadd.f32 %v6508_v8, %v616_v55 }
 0x172   :  { %5614 = vrsqrt.f32 %v518_v41  ;;  %v519_v59 = vadd.f32 1e-05, %v455_v0  ;;  %v424_v13 = vmul.f32 %v6685_v29, %v6685_v29  ;;  %v6693_v60 = vmul.f32 0.0078125, %v226_v54 }
 0x173   :  { %v353_v37 = vpop.xlane.xlu0 %352  ;;  %v655_v34 = vadd.f32 %v6508_v8, %v617_v63  ;;  %v487_v41 = vsub.f32 %v6442_v62, %v6673_v27 }
 0x174   :  { %v5611_v5 = vpop.eup %5610  ;;  %5616 = vrsqrt.f32 %v519_v59  ;;  %v392_v14 = vmul.f32 0.0078125, %v353_v37  ;;  %v425_v57 = vmul.f32 %v6693_v60, %v6693_v60 }
 0x175   :  { %v355_v50 = vpop.xlane.xlu1 %354  ;;  %v6699_v30 = vpack.c.bf16 %v655_v34, %v654_v24  ;;  %v580_v7 = vmul.f32 %v5611_v5, %v484_v49 }
 0x176   :  { %v5613_v45 = vpop.eup %5612  ;;  %v456_v20 = vsub.f32 %v392_v14, %v424_v13  ;;  %v393_v31 = vmul.f32 0.0078125, %v355_v50 }
 0x177   :  { %984 = vmatmul.mubr.bf16.gmra.mrb[36].mxu0 %v6699_v30  ;;  %v228_v1 = vpop.xlane.xlu0 %227  ;;  %v581_v36 = vmul.f32 %v5613_v45, %v485_v18  ;;  %v618_v38 = vmul.f32 %v6500_v43, %v580_v7  ;;  %v488_v7 = vsub.f32 %v6450_v3, %v6685_v29 }
 0x178   :  { %v520_v9 = vadd.f32 1e-05, %v456_v20  ;;  %v457_v19 = vsub.f32 %v393_v31, %v425_v57  ;;  %v6705_v46 = vmul.f32 0.0078125, %v228_v1  ;;  %993 = vmatprep.mubr.bf16.mxu0 %v6155_v42 }
 0x179   :  { %v230_v58 = vpop.xlane.xlu1 %229  ;;  %v619_v51 = vmul.f32 %v6500_v43, %v581_v36  ;;  %v656_v48 = vadd.f32 %v6508_v8, %v618_v38  ;;  %v489_v38 = vsub.f32 %v6452_v6, %v6693_v60 }
 0x17a   :  { %5618 = vrsqrt.f32 %v520_v9  ;;  %v521_v23 = vadd.f32 1e-05, %v457_v19  ;;  %v426_v47 = vmul.f32 %v6705_v46, %v6705_v46  ;;  %v6713_v53 = vmul.f32 0.0078125, %v230_v58 }
 0x17b   :  { %v357_v32 = vpop.xlane.xlu0 %356  ;;  %v657_v11 = vadd.f32 %v6508_v8, %v619_v51 }
 0x17c   :  { %v5615_v52 = vpop.eup %5614  ;;  %5620 = vrsqrt.f32 %v521_v23  ;;  %v394_v55 = vmul.f32 0.0078125, %v357_v32  ;;  %v427_v61 = vmul.f32 %v6713_v53, %v6713_v53 }
 0x17d   :  { %v359_v0 = vpop.xlane.xlu1 %358  ;;  %v6719_v54 = vpack.c.bf16 %v657_v11, %v656_v48  ;;  %v582_v63 = vmul.f32 %v5615_v52, %v486_v4 }
 0x17e   :  { %v5617_v59 = vpop.eup %5616  ;;  %v458_v16 = vsub.f32 %v394_v55, %v426_v47  ;;  %v395_v13 = vmul.f32 0.0078125, %v359_v0  ;;  %v490_v0 = vsub.f32 %v6460_v10, %v6705_v46 }
 0x17f   :  { %994 = vmatmul.mubr.bf16.gmra.mrb[40].mxu0 %v6719_v54  ;;  %v232_v49 = vpop.xlane.xlu0 %231  ;;  %v583_v37 = vmul.f32 %v5617_v59, %v487_v41  ;;  %v620_v24 = vmul.f32 %v6500_v43, %v582_v63 }
 0x180   :  { %v522_v34 = vadd.f32 1e-05, %v458_v16  ;;  %v459_v5 = vsub.f32 %v395_v13, %v427_v61  ;;  %v6725_v14 = vmul.f32 0.0078125, %v232_v49  ;;  %1003 = vmatprep.mubr.bf16.mxu0 %v6155_v42 }
 0x181   :  { %v234_v62 = vpop.xlane.xlu1 %233  ;;  %v621_v27 = vmul.f32 %v6500_v43, %v583_v37  ;;  %v658_v20 = vadd.f32 %v6508_v8, %v620_v24  ;;  %v491_v37 = vsub.f32 %v6462_v12, %v6713_v53  ;;  %v5476_v53 = vld [vmem:[#allocation8 + $0x38] ss:$12 sps:$4 sm:$0xff]  }
 0x182   :  { %5622 = vrsqrt.f32 %v522_v34  ;;  %v523_v18 = vadd.f32 1e-05, %v459_v5  ;;  %v428_v50 = vmul.f32 %v6725_v14, %v6725_v14  ;;  %v6733_v45 = vmul.f32 0.0078125, %v234_v62  ;;  %v5475_v5 = vld [vmem:[#allocation8 + $0x20] ss:$12 sps:$4 sm:$0xff]  }
 0x183   :  { %v361_v57 = vpop.xlane.xlu0 %360  ;;  %v659_v31 = vadd.f32 %v6508_v8, %v621_v27 }
 0x184   :  { %v5619_v1 = vpop.eup %5618  ;;  %5624 = vrsqrt.f32 %v523_v18  ;;  %v396_v36 = vmul.f32 0.0078125, %v361_v57  ;;  %v429_v3 = vmul.f32 %v6733_v45, %v6733_v45 }
 0x185   :  { %v363_v9 = vpop.xlane.xlu1 %362  ;;  %v6739_v19 = vpack.c.bf16 %v659_v31, %v658_v20  ;;  %v584_v58 = vmul.f32 %v5619_v1, %v488_v7  ;;  %v492_v1 = vsub.f32 %v6470_v15, %v6725_v14  ;;  %v5478_v14 = vld [vmem:[#allocation8 + $0x68] ss:$12 sps:$4 sm:$0xff]  }
 0x186   :  { %v5621_v51 = vpop.eup %5620  ;;  %v460_v29 = vsub.f32 %v396_v36, %v428_v50  ;;  %v397_v23 = vmul.f32 0.0078125, %v363_v9 }
 0x187   :  { %1004 = vmatmul.mubr.bf16.gmra.mrb[44].mxu0 %v6739_v19  ;;  %v236_v47 = vpop.xlane.xlu0 %235  ;;  %v585_v4 = vmul.f32 %v5621_v51, %v489_v38  ;;  %v622_v32 = vmul.f32 %v6500_v43, %v584_v58  ;;  %v5477_v51 = vld [vmem:[#allocation8 + $0x50] ss:$12 sps:$4 sm:$0xff]  }
 0x188   :  { %v524_v48 = vadd.f32 1e-05, %v460_v29  ;;  %v461_v11 = vsub.f32 %v397_v23, %v429_v3  ;;  %v6745_v52 = vmul.f32 0.0078125, %v236_v47 }
 0x189   :  { %v238_v6 = vpop.xlane.xlu1 %237  ;;  %v623_v60 = vmul.f32 %v6500_v43, %v585_v4  ;;  %v660_v61 = vadd.f32 %v6508_v8, %v622_v32 }
 0x18a   :  { %5626 = vrsqrt.f32 %v524_v48  ;;  %v525_v55 = vadd.f32 1e-05, %v461_v11  ;;  %v430_v41 = vmul.f32 %v6745_v52, %v6745_v52  ;;  %v271_v63 = vmul.f32 0.0078125, %v238_v6  ;;  %v5479_v6 = vld [vmem:[#allocation8 + $0x80] ss:$12 sps:$4 sm:$0xff]  }
 0x18b   :  { %v365_v59 = vpop.xlane.xlu0 %364  ;;  %v661_v16 = vadd.f32 %v6508_v8, %v623_v60  ;;  %v494_v4 = vsub.f32 %v6480_v21, %v6745_v52  ;;  %v5480_v52 = vld [vmem:[#allocation8 + $0x98] ss:$12 sps:$4 sm:$0xff]  }
 0x18c   :  { %v5623_v13 = vpop.eup %5622  ;;  %5628 = vrsqrt.f32 %v525_v55  ;;  %v398_v49 = vmul.f32 0.0078125, %v365_v59  ;;  %v431_v18 = vmul.f32 %v271_v63, %v271_v63  ;;  %v495_v48 = vsub.f32 %v6482_v22, %v271_v63 }
 0x18d   :  { %v367_v24 = vpop.xlane.xlu1 %366  ;;  %v6756_v34 = vpack.c.bf16 %v661_v16, %v660_v61  ;;  %v586_v62 = vmul.f32 %v5623_v13, %v490_v0  ;;  %v5481_v61 = vld [vmem:[#allocation8 + $0xb0] ss:$12 sps:$4 sm:$0xff]  }
 0x18e   :  { %v5625_v27 = vpop.eup %5624  ;;  %v462_v10 = vsub.f32 %v398_v49, %v430_v41  ;;  %v399_v46 = vmul.f32 0.0078125, %v367_v24 }
 0x18f   :  { %1014 = vmatmul.mubr.bf16.vlgmr.msra.gmra.mrb[0].mxu1 %v6756_v34  ;;  %v587_v50 = vmul.f32 %v5625_v27, %v491_v37  ;;  %v624_v7 = vmul.f32 %v6500_v43, %v586_v62 }
 0x190   :  { %v526_v57 = vadd.f32 1e-05, %v462_v10  ;;  %v463_v20 = vsub.f32 %v399_v46, %v431_v18  ;;  %5194 = vmatpush3.bf16.msra.mxu1 %v6490_v26  ;;  %1023 = vmatprep.mubr.bf16.mxu1 %v6155_v42  ;;  %v493_v26 = vsub.f32 %v6472_v17, %v6733_v45 }
 0x191   :  { %5195 = vmatprep.subr.bf16.mxu1 %v5475_v5  ;;  %v625_v12 = vmul.f32 %v6500_v43, %v587_v50  ;;  %v662_v36 = vadd.f32 %v6508_v8, %v624_v7 }
 0x192   :  { %5630 = vrsqrt.f32 %v526_v57  ;;  %v527_v31 = vadd.f32 1e-05, %v463_v20 }
 0x193   :  { %v663_v38 = vadd.f32 %v6508_v8, %v625_v12 }
 0x194   :  { %v5627_v9 = vpop.eup %5626  ;;  %5632 = vrsqrt.f32 %v527_v31  ;;  %5196 = vmatpush3.bf16.msra.mxu1 %v5475_v5 }
 0x195   :  { %v681_v58 = vpack.c.bf16 %v663_v38, %v662_v36  ;;  %5197 = vmatprep.subr.bf16.mxu1 %v5476_v53  ;;  %v588_v3 = vmul.f32 %v5627_v9, %v492_v1 }
 0x196   :  { %v5629_v29 = vpop.eup %5628 }
 0x197   :  { %1024 = vmatmul.mubr.bf16.gmra.mrb[4].mxu1 %v681_v58  ;;  %v589_v23 = vmul.f32 %v5629_v29, %v493_v26  ;;  %v626_v47 = vmul.f32 %v6500_v43, %v588_v3 }
 0x198   :  { %5198 = vmatpush3.bf16.msra.mxu1 %v5476_v53  ;;  %1033 = vmatprep.mubr.bf16.mxu1 %v6155_v42 }
 0x199   :  { %5199 = vmatprep.subr.bf16.mxu1 %v5477_v51  ;;  %v627_v15 = vmul.f32 %v6500_v43, %v589_v23  ;;  %v664_v17 = vadd.f32 %v6508_v8, %v626_v47 }
 0x19b   :  { %v665_v45 = vadd.f32 %v6508_v8, %v627_v15 }
 0x19c   :  { %v5631_v32 = vpop.eup %5630  ;;  %5200 = vmatpush3.bf16.msra.mxu1 %v5477_v51 }
 0x19d   :  { %v682_v11 = vpack.c.bf16 %v665_v45, %v664_v17  ;;  %5201 = vmatprep.subr.bf16.mxu1 %v5478_v14  ;;  %v590_v60 = vmul.f32 %v5631_v32, %v494_v4 }
 0x19e   :  { %v5633_v55 = vpop.eup %5632 }
 0x19f   :  { %1034 = vmatmul.mubr.bf16.gmra.mrb[8].mxu1 %v682_v11  ;;  %v591_v41 = vmul.f32 %v5633_v55, %v495_v48  ;;  %v628_v0 = vmul.f32 %v6500_v43, %v590_v60 }
 0x1a0   :  { %5202 = vmatpush3.bf16.msra.mxu1 %v5478_v14  ;;  %1043 = vmatprep.mubr.bf16.mxu1 %v6155_v42 }
 0x1a1   :  { %5203 = vmatprep.subr.bf16.mxu1 %v5479_v6  ;;  %v629_v21 = vmul.f32 %v6500_v43, %v591_v41  ;;  %v666_v59 = vadd.f32 %v6508_v8, %v628_v0  ;;  %v718_v43 = vlaneseq }
 0x1a3   :  { %v667_v22 = vadd.f32 %v6508_v8, %v629_v21  ;;  %v6796_v8 = vshrl.u32 %v718_v43, 7 }
 0x1a4   :  { %5204 = vmatpush3.bf16.msra.mxu1 %v5479_v6 }
 0x1a5   :  { %v683_v63 = vpack.c.bf16 %v667_v22, %v666_v59  ;;  %5205 = vmatprep.subr.bf16.mxu1 %v5480_v52 }
 0x1a7   :  { %1044 = vmatmul.mubr.bf16.gmra.mrb[12].mxu1 %v683_v63 }
 0x1a8   :  { %5206 = vmatpush3.bf16.msra.mxu1 %v5480_v52  ;;  %5209 = vmatprep.mubr.bf16.mxu1 %v6519_v39  ;;  %v720_v39 = vsub.s32 0, %v6796_v8 }
 0x1a9   :  { %5207 = vmatprep.subr.bf16.mxu1 %v5481_v61 }
 0x1ac   :  { %5208 = vmatpush3.bf16.msra.mxu1 %v5481_v61 }
 0x1af   :  { %5210 = vmatmul.mubr.bf16.vlgmr.msra.gmra.mrb[16].mxu1 %v6539_v33  ;;  %v6802_v33 = vld [vmem:[%s8915_s4] sm:$0x7] }
 0x1b0   :  { %5213 = vmatprep.mubr.bf16.mxu1 %v6559_v25  ;;  %v8925_v25 = vsub.s32 1, %v6796_v8 }
 0x1b7   :  { %5214 = vmatmul.mubr.bf16.gmra.mrb[20].mxu1 %v6579_v2  ;;  %v6808_v2 = vrot.slane %v6802_v33, %v720_v39 }
 0x1b8   :  { %5217 = vmatprep.mubr.bf16.mxu1 %v6599_v35 }
 0x1bf   :  { %5218 = vmatmul.mubr.bf16.gmra.mrb[24].mxu1 %v6619_v44  ;;  %v6813_v44 = vrot.slane %v6802_v33, %v8925_v25 }
 0x1c0   :  { %5221 = vmatprep.mubr.bf16.mxu1 %v6639_v28 }
 0x1c7   :  { %5222 = vmatmul.mubr.bf16.gmra.mrb[28].mxu1 %v6659_v56 }
 0x1c8   :  { %5225 = vmatprep.mubr.bf16.mxu1 %v6679_v40 }
 0x1cf   :  { %5226 = vmatmul.mubr.bf16.gmra.mrb[32].mxu1 %v6699_v30 }
 0x1d0   :  { %5229 = vmatprep.mubr.bf16.mxu1 %v6719_v54 }
 0x1d7   :  { %5230 = vmatmul.mubr.bf16.gmra.mrb[36].mxu1 %v6739_v19 }
 0x1d8   :  { %5233 = vmatprep.mubr.bf16.mxu1 %v6756_v34 }
 0x1df   :  { %5234 = vmatmul.mubr.bf16.gmra.mrb[40].mxu1 %v681_v58 }
 0x1e0   :  { %5237 = vmatprep.mubr.bf16.mxu1 %v682_v11 }
 0x1e7   :  { %5238 = vmatmul.mubr.bf16.gmra.mrb[44].mxu1 %v683_v63 }
 0x202   :  { %v895_v35 = vpop.f32.mrb[0].mxu0 }
 0x203   :  { %v897_v28 = vpop.f32.mrb[1].mxu0  ;;  %v896_v40 = vadd.f32 %v895_v35, %v6808_v2 }
 0x204   :  { %v899_v56 = vpop.f32.mrb[2].mxu0  ;;  %v898_v19 = vadd.f32 %v897_v28, %v6813_v44 }
 0x205   :  { %v900_v30 = vadd.f32 %v899_v56, %v6808_v2  ;;  %v901_v54 = vpop.f32.mrb[3].mxu0 }
 0x206   :  { %v902_v16 = vadd.f32 %v901_v54, %v6813_v44 }
 0x207   :  { %v1215_v13 = vpack.c.bf16 %v900_v30, %v896_v40 }
 0x208   :  { %v1231_v49 = vpack.c.bf16 %v902_v16, %v898_v19 }
 0x209   :  { %5257 = vmatprep.mubr.bf16.mxu1 %v1215_v13 }
 0x20a   :  { %v905_v37 = vpop.f32.mrb[4].mxu0  ;;  %5241 = vmatprep.subr.bf16.mxu1 %v1231_v49 }
 0x20b   :  { %v907_v24 = vpop.f32.mrb[5].mxu0  ;;  %5242 = vmatpush3.bf16.xpose.msra.mxu1 %v1231_v49  ;;  %v6820_v5 = vadd.f32 %v905_v37, %v6808_v2 }
 0x20c   :  { %v909_v34 = vpop.f32.mrb[6].mxu0  ;;  %v908_v18 = vadd.f32 %v907_v24, %v6813_v44 }
 0x20d   :  { %v6823_v62 = vadd.f32 %v909_v34, %v6808_v2  ;;  %v911_v27 = vpop.f32.mrb[7].mxu0 }
 0x20e   :  { %v912_v10 = vadd.f32 %v911_v27, %v6813_v44 }
 0x20f   :  { %v1216_v46 = vpack.c.bf16 %v6823_v62, %v6820_v5 }
 0x210   :  { %v1232_v50 = vpack.c.bf16 %v912_v10, %v908_v18 }
 0x212   :  { %v915_v7 = vpop.f32.mrb[8].mxu0  ;;  %5243 = vmatprep.subr.bf16.mxu1 %v1232_v50 }
 0x213   :  { %v917_v57 = vpop.f32.mrb[9].mxu0  ;;  %5244 = vmatpush3.bf16.xpose.msra.mxu1 %v1232_v50  ;;  %v6830_v12 = vadd.f32 %v915_v7, %v6808_v2 }
 0x214   :  { %v919_v20 = vpop.f32.mrb[10].mxu0  ;;  %v918_v1 = vadd.f32 %v917_v57, %v6813_v44 }
 0x215   :  { %v6833_v53 = vadd.f32 %v919_v20, %v6808_v2  ;;  %v921_v31 = vpop.f32.mrb[11].mxu0 }
 0x216   :  { %v922_v36 = vadd.f32 %v921_v31, %v6813_v44 }
 0x217   :  { %v1217_v38 = vpack.c.bf16 %v6833_v53, %v6830_v12 }
 0x218   :  { %v1233_v9 = vpack.c.bf16 %v922_v36, %v918_v1 }
 0x21a   :  { %v925_v26 = vpop.f32.mrb[12].mxu0  ;;  %5245 = vmatprep.subr.bf16.mxu1 %v1233_v9 }
 0x21b   :  { %v927_v58 = vpop.f32.mrb[13].mxu0  ;;  %5246 = vmatpush3.bf16.xpose.msra.mxu1 %v1233_v9  ;;  %v6840_v3 = vadd.f32 %v925_v26, %v6808_v2 }
 0x21c   :  { %v929_v51 = vpop.f32.mrb[14].mxu0  ;;  %v928_v47 = vadd.f32 %v927_v58, %v6813_v44 }
 0x21d   :  { %v6843_v29 = vadd.f32 %v929_v51, %v6808_v2  ;;  %v931_v23 = vpop.f32.mrb[15].mxu0 }
 0x21e   :  { %v932_v15 = vadd.f32 %v931_v23, %v6813_v44 }
 0x21f   :  { %v1218_v14 = vpack.c.bf16 %v6843_v29, %v6840_v3 }
 0x220   :  { %v1234_v4 = vpack.c.bf16 %v932_v15, %v928_v47 }
 0x222   :  { %v935_v17 = vpop.f32.mrb[16].mxu0  ;;  %5247 = vmatprep.subr.bf16.mxu1 %v1234_v4 }
 0x223   :  { %v937_v45 = vpop.f32.mrb[17].mxu0  ;;  %5248 = vmatpush3.bf16.xpose.msra.mxu1 %v1234_v4  ;;  %v6850_v48 = vadd.f32 %v935_v17, %v6808_v2 }
 0x224   :  { %v939_v32 = vpop.f32.mrb[18].mxu0  ;;  %v938_v60 = vadd.f32 %v937_v45, %v6813_v44 }
 0x225   :  { %v6853_v11 = vadd.f32 %v939_v32, %v6808_v2  ;;  %v941_v6 = vpop.f32.mrb[19].mxu0 }
 0x226   :  { %v942_v55 = vadd.f32 %v941_v6, %v6813_v44 }
 0x227   :  { %v1219_v41 = vpack.c.bf16 %v6853_v11, %v6850_v48 }
 0x228   :  { %v1235_v0 = vpack.c.bf16 %v942_v55, %v938_v60 }
 0x22a   :  { %v945_v21 = vpop.f32.mrb[20].mxu0  ;;  %5249 = vmatprep.subr.bf16.mxu1 %v1235_v0 }
 0x22b   :  { %v947_v52 = vpop.f32.mrb[21].mxu0  ;;  %5250 = vmatpush3.bf16.xpose.msra.mxu1 %v1235_v0  ;;  %v6860_v22 = vadd.f32 %v945_v21, %v6808_v2 }
 0x22c   :  { %v949_v59 = vpop.f32.mrb[22].mxu0  ;;  %v948_v35 = vadd.f32 %v947_v52, %v6813_v44 }
 0x22d   :  { %v6863_v63 = vadd.f32 %v949_v59, %v6808_v2  ;;  %v951_v61 = vpop.f32.mrb[23].mxu0 }
 0x22e   :  { %v952_v28 = vadd.f32 %v951_v61, %v6813_v44 }
 0x22f   :  { %v1220_v56 = vpack.c.bf16 %v6863_v63, %v6860_v22 }
 0x230   :  { %v1236_v40 = vpack.c.bf16 %v952_v28, %v948_v35 }
 0x232   :  { %v955_v30 = vpop.f32.mrb[24].mxu0  ;;  %5251 = vmatprep.subr.bf16.mxu1 %v1236_v40 }
 0x233   :  { %v957_v54 = vpop.f32.mrb[25].mxu0  ;;  %5252 = vmatpush3.bf16.xpose.msra.mxu1 %v1236_v40  ;;  %v6870_v16 = vadd.f32 %v955_v30, %v6808_v2 }
 0x234   :  { %v959_v19 = vpop.f32.mrb[26].mxu0  ;;  %v958_v37 = vadd.f32 %v957_v54, %v6813_v44 }
 0x235   :  { %v6873_v13 = vadd.f32 %v959_v19, %v6808_v2  ;;  %v961_v49 = vpop.f32.mrb[27].mxu0 }
 0x236   :  { %v962_v24 = vadd.f32 %v961_v49, %v6813_v44 }
 0x237   :  { %v1221_v34 = vpack.c.bf16 %v6873_v13, %v6870_v16 }
 0x238   :  { %v1237_v27 = vpack.c.bf16 %v962_v24, %v958_v37 }
 0x23a   :  { %v965_v18 = vpop.f32.mrb[28].mxu0  ;;  %5253 = vmatprep.subr.bf16.mxu1 %v1237_v27 }
 0x23b   :  { %v967_v10 = vpop.f32.mrb[29].mxu0  ;;  %5254 = vmatpush3.bf16.xpose.msra.mxu1 %v1237_v27  ;;  %v6880_v7 = vadd.f32 %v965_v18, %v6808_v2 }
 0x23c   :  { %v969_v50 = vpop.f32.mrb[30].mxu0  ;;  %v968_v31 = vadd.f32 %v967_v10, %v6813_v44 }
 0x23d   :  { %v970_v57 = vadd.f32 %v969_v50, %v6808_v2  ;;  %v971_v20 = vpop.f32.mrb[31].mxu0 }
 0x23e   :  { %v972_v1 = vadd.f32 %v971_v20, %v6813_v44 }
 0x23f   :  { %v1222_v36 = vpack.c.bf16 %v970_v57, %v6880_v7 }
 0x240   :  { %v1238_v9 = vpack.c.bf16 %v972_v1, %v968_v31 }
 0x242   :  { %v975_v26 = vpop.f32.mrb[32].mxu0  ;;  %5255 = vmatprep.subr.bf16.mxu1 %v1238_v9 }
 0x243   :  { %v977_v58 = vpop.f32.mrb[33].mxu0  ;;  %5256 = vmatpush3.bf16.xpose.msra.mxu1 %v1238_v9  ;;  %v976_v23 = vadd.f32 %v975_v26, %v6808_v2 }
 0x244   :  { %v979_v51 = vpop.f32.mrb[34].mxu0  ;;  %v978_v4 = vadd.f32 %v977_v58, %v6813_v44 }
 0x245   :  { %v980_v47 = vadd.f32 %v979_v51, %v6808_v2  ;;  %v981_v15 = vpop.f32.mrb[35].mxu0 }
 0x246   :  { %v982_v17 = vadd.f32 %v981_v15, %v6813_v44 }
 0x247   :  { %v1223_v45 = vpack.c.bf16 %v980_v47, %v976_v23 }
 0x248   :  { %v1239_v32 = vpack.c.bf16 %v982_v17, %v978_v4 }
 0x249   :  { %5289 = vmatprep.mubr.bf16.mxu0 %v1223_v45 }
 0x24a   :  { %v985_v6 = vpop.f32.mrb[36].mxu0  ;;  %5258 = vmatmul.mubr.bf16.vlgmr.msra.gmra.mrb[48].mxu1 %v1216_v46  ;;  %5273 = vmatprep.subr.bf16.mxu0 %v1239_v32 }
 0x24b   :  { %v987_v60 = vpop.f32.mrb[37].mxu0  ;;  %5261 = vmatprep.mubr.bf16.mxu1 %v1217_v38  ;;  %5274 = vmatpush3.bf16.xpose.msra.mxu0 %v1239_v32  ;;  %v6897_v0 = vadd.f32 %v985_v6, %v6808_v2 }
 0x24c   :  { %v989_v55 = vpop.f32.mrb[38].mxu0  ;;  %v988_v59 = vadd.f32 %v987_v60, %v6813_v44 }
 0x24d   :  { %v6900_v21 = vadd.f32 %v989_v55, %v6808_v2  ;;  %v991_v52 = vpop.f32.mrb[39].mxu0 }
 0x24e   :  { %v992_v5 = vadd.f32 %v991_v52, %v6813_v44 }
 0x24f   :  { %v1224_v62 = vpack.c.bf16 %v6900_v21, %v6897_v0 }
 0x250   :  { %v1240_v46 = vpack.c.bf16 %v992_v5, %v988_v59 }
 0x252   :  { %v995_v61 = vpop.f32.mrb[40].mxu0  ;;  %5262 = vmatmul.mubr.bf16.gmra.mrb[52].mxu1 %v1218_v14  ;;  %5275 = vmatprep.subr.bf16.mxu0 %v1240_v46 }
 0x253   :  { %v997_v12 = vpop.f32.mrb[41].mxu0  ;;  %5265 = vmatprep.mubr.bf16.mxu1 %v1219_v41  ;;  %5276 = vmatpush3.bf16.xpose.msra.mxu0 %v1240_v46  ;;  %v6913_v38 = vadd.f32 %v995_v61, %v6808_v2 }
 0x254   :  { %v999_v53 = vpop.f32.mrb[42].mxu0  ;;  %v998_v40 = vadd.f32 %v997_v12, %v6813_v44 }
 0x255   :  { %v6916_v35 = vadd.f32 %v999_v53, %v6808_v2  ;;  %v1001_v28 = vpop.f32.mrb[43].mxu0 }
 0x256   :  { %v1002_v3 = vadd.f32 %v1001_v28, %v6813_v44  ;;  %v8926_v28 = vsub.s32 2, %v6796_v8 }
 0x257   :  { %v1225_v29 = vpack.c.bf16 %v6916_v35, %v6913_v38 }
 0x258   :  { %v1241_v14 = vpack.c.bf16 %v1002_v3, %v998_v40 }
 0x25a   :  { %v1005_v30 = vpop.f32.mrb[44].mxu0  ;;  %5266 = vmatmul.mubr.bf16.gmra.mrb[56].mxu1 %v1220_v56  ;;  %5277 = vmatprep.subr.bf16.mxu0 %v1241_v14 }
 0x25b   :  { %v1007_v48 = vpop.f32.mrb[45].mxu0  ;;  %5269 = vmatprep.mubr.bf16.mxu1 %v1221_v34  ;;  %5278 = vmatpush3.bf16.xpose.msra.mxu0 %v1241_v14  ;;  %v6926_v41 = vadd.f32 %v1005_v30, %v6808_v2 }
 0x25c   :  { %v1009_v11 = vpop.f32.mrb[46].mxu0  ;;  %v1008_v16 = vadd.f32 %v1007_v48, %v6813_v44  ;;  %v6979_v48 = vrot.slane %v6802_v33, %v8926_v28 }
 0x25d   :  { %v6929_v54 = vadd.f32 %v1009_v11, %v6808_v2  ;;  %v1011_v19 = vpop.f32.mrb[47].mxu0 }
 0x25e   :  { %v1012_v13 = vadd.f32 %v1011_v19, %v6813_v44 }
 0x25f   :  { %v1226_v22 = vpack.c.bf16 %v6929_v54, %v6926_v41 }
 0x260   :  { %v1242_v63 = vpack.c.bf16 %v1012_v13, %v1008_v16 }
 0x262   :  { %v1015_v56 = vpop.f32.mrb[0].mxu1  ;;  %5270 = vmatmul.mubr.bf16.gmra.mrb[60].mxu1 %v1222_v36  ;;  %5279 = vmatprep.subr.bf16.mxu0 %v1242_v63 }
 0x263   :  { %v1017_v49 = vpop.f32.mrb[1].mxu1  ;;  %5280 = vmatpush3.bf16.xpose.msra.mxu0 %v1242_v63  ;;  %v6936_v24 = vadd.f32 %v1015_v56, %v6808_v2 }
 0x264   :  { %v1019_v37 = vpop.f32.mrb[2].mxu1  ;;  %v1018_v18 = vadd.f32 %v1017_v49, %v6813_v44 }
 0x265   :  { %v6939_v34 = vadd.f32 %v1019_v37, %v6808_v2  ;;  %v1021_v27 = vpop.f32.mrb[3].mxu1 }
 0x266   :  { %v1022_v10 = vadd.f32 %v1021_v27, %v6813_v44 }
 0x267   :  { %v1227_v50 = vpack.c.bf16 %v6939_v34, %v6936_v24 }
 0x268   :  { %v1243_v7 = vpack.c.bf16 %v1022_v10, %v1018_v18 }
 0x26a   :  { %v1025_v57 = vpop.f32.mrb[4].mxu1  ;;  %5281 = vmatprep.subr.bf16.mxu0 %v1243_v7 }
 0x26b   :  { %v1027_v20 = vpop.f32.mrb[5].mxu1  ;;  %5282 = vmatpush3.bf16.xpose.msra.mxu0 %v1243_v7  ;;  %v6946_v1 = vadd.f32 %v1025_v57, %v6808_v2 }
 0x26c   :  { %v1029_v31 = vpop.f32.mrb[6].mxu1  ;;  %v1028_v26 = vadd.f32 %v1027_v20, %v6813_v44 }
 0x26d   :  { %v6949_v36 = vadd.f32 %v1029_v31, %v6808_v2  ;;  %v1031_v9 = vpop.f32.mrb[7].mxu1 }
 0x26e   :  { %v1032_v58 = vadd.f32 %v1031_v9, %v6813_v44 }
 0x26f   :  { %v1228_v51 = vpack.c.bf16 %v6949_v36, %v6946_v1 }
 0x270   :  { %v1244_v23 = vpack.c.bf16 %v1032_v58, %v1028_v26 }
 0x272   :  { %v1035_v47 = vpop.f32.mrb[8].mxu1  ;;  %5283 = vmatprep.subr.bf16.mxu0 %v1244_v23 }
 0x273   :  { %v1037_v15 = vpop.f32.mrb[9].mxu1  ;;  %5284 = vmatpush3.bf16.xpose.msra.mxu0 %v1244_v23  ;;  %v6956_v17 = vadd.f32 %v1035_v47, %v6808_v2 }
 0x274   :  { %v1039_v4 = vpop.f32.mrb[10].mxu1  ;;  %v1038_v6 = vadd.f32 %v1037_v15, %v6813_v44 }
 0x275   :  { %v6959_v45 = vadd.f32 %v1039_v4, %v6808_v2  ;;  %v1041_v32 = vpop.f32.mrb[11].mxu1 }
 0x276   :  { %v1042_v60 = vadd.f32 %v1041_v32, %v6813_v44 }
 0x277   :  { %v1229_v55 = vpack.c.bf16 %v6959_v45, %v6956_v17 }
 0x278   :  { %v1245_v52 = vpack.c.bf16 %v1042_v60, %v1038_v6 }
 0x27a   :  { %v1045_v59 = vpop.f32.mrb[12].mxu1  ;;  %5285 = vmatprep.subr.bf16.mxu0 %v1245_v52 }
 0x27b   :  { %v1047_v5 = vpop.f32.mrb[13].mxu1  ;;  %5286 = vmatpush3.bf16.xpose.msra.mxu0 %v1245_v52  ;;  %v6966_v61 = vadd.f32 %v1045_v59, %v6808_v2 }
 0x27c   :  { %v1049_v46 = vpop.f32.mrb[14].mxu1  ;;  %v1048_v40 = vadd.f32 %v1047_v5, %v6813_v44 }
 0x27d   :  { %v6969_v12 = vadd.f32 %v1049_v46, %v6808_v2  ;;  %v1051_v53 = vpop.f32.mrb[15].mxu1 }
 0x27e   :  { %v1052_v3 = vadd.f32 %v1051_v53, %v6813_v44 }
 0x27f   :  { %v1230_v14 = vpack.c.bf16 %v6969_v12, %v6966_v61 }
 0x280   :  { %v1246_v30 = vpack.c.bf16 %v1052_v3, %v1048_v40 }
 0x282   :  { %v5211_v11 = vpop.f32.mrb[16].mxu1  ;;  %5287 = vmatprep.subr.bf16.mxu0 %v1246_v30 }
 0x283   :  { %v1088_v2 = vpop.f32.mrb[17].mxu1  ;;  %5288 = vmatpush3.bf16.xpose.msra.mxu0 %v1246_v30  ;;  %v1097_v16 = vadd.f32 %v5211_v11, %v6979_v48 }
 0x284   :  { %v5212_v19 = vpop.f32.mrb[18].mxu1  ;;  %v1089_v44 = vadd.f32 %v1088_v2, %v6979_v48 }
 0x285   :  { %v1100_v13 = vadd.f32 %v5212_v19, %v6979_v48  ;;  %v1091_v63 = vpop.f32.mrb[19].mxu1 }
 0x286   :  { %v1092_v56 = vadd.f32 %v1091_v63, %v6979_v48 }
 0x287   :  { %v1248_v49 = vpack.c.bf16 %v1100_v13, %v1097_v16 }
 0x288   :  { %v1247_v37 = vpack.c.bf16 %v1092_v56, %v1089_v44 }
 0x28a   :  { %v5215_v27 = vpop.f32.mrb[20].mxu1  ;;  %5290 = vmatmul.mubr.bf16.vlgmr.msra.gmra.mrb[48].mxu0 %v1224_v62  ;;  %5305 = vmatprep.subr.bf16.mxu1 %v1247_v37 }
 0x28b   :  { %v1104_v33 = vpop.f32.mrb[21].mxu1  ;;  %5293 = vmatprep.mubr.bf16.mxu0 %v1225_v29  ;;  %5306 = vmatpush3.bf16.msra.mxu1 %v1247_v37  ;;  %v1113_v10 = vadd.f32 %v5215_v27, %v6979_v48 }
 0x28c   :  { %v5216_v18 = vpop.f32.mrb[22].mxu1  ;;  %5307 = vmatprep.subr.bf16.mxu1 %v1248_v49  ;;  %v1105_v20 = vadd.f32 %v1104_v33, %v6979_v48 }
 0x28d   :  { %v1116_v7 = vadd.f32 %v5216_v18, %v6979_v48  ;;  %v1107_v57 = vpop.f32.mrb[23].mxu1 }
 0x28e   :  { %v1108_v31 = vadd.f32 %v1107_v57, %v6979_v48 }
 0x28f   :  { %v1250_v0 = vpack.c.bf16 %v1116_v7, %v1113_v10  ;;  %5308 = vmatpush3.bf16.msra.mxu1 %v1248_v49 }
 0x290   :  { %v1249_v21 = vpack.c.bf16 %v1108_v31, %v1105_v20 }
 0x292   :  { %v5219_v62 = vpop.f32.mrb[24].mxu1  ;;  %5294 = vmatmul.mubr.bf16.gmra.mrb[52].mxu0 %v1226_v22  ;;  %5309 = vmatprep.subr.bf16.mxu1 %v1249_v21 }
 0x293   :  { %v1120_v38 = vpop.f32.mrb[25].mxu1  ;;  %5297 = vmatprep.mubr.bf16.mxu0 %v1227_v50  ;;  %5310 = vmatpush3.bf16.msra.mxu1 %v1249_v21  ;;  %v1129_v29 = vadd.f32 %v5219_v62, %v6979_v48 }
 0x294   :  { %v5220_v35 = vpop.f32.mrb[26].mxu1  ;;  %5311 = vmatprep.subr.bf16.mxu1 %v1250_v0  ;;  %v1121_v58 = vadd.f32 %v1120_v38, %v6979_v48 }
 0x295   :  { %v1132_v9 = vadd.f32 %v5220_v35, %v6979_v48  ;;  %v1123_v26 = vpop.f32.mrb[27].mxu1 }
 0x296   :  { %v1124_v23 = vadd.f32 %v1123_v26, %v6979_v48  ;;  %v1267_v26 = vadd.s32 8, %v6796_v8 }
 0x297   :  { %v1252_v41 = vpack.c.bf16 %v1132_v9, %v1129_v29  ;;  %5312 = vmatpush3.bf16.msra.mxu1 %v1250_v0  ;;  %v7052_v29 = vand.u32 127, %v718_v43 }
 0x298   :  { %v1251_v54 = vpack.c.bf16 %v1124_v23, %v1121_v58  ;;  %v1268_v23 = vadd.s32 16, %v6796_v8 }
 0x299   :  { %v1298_v9 = vcvt.s32.f32 %v7052_v29  ;;  %vm1282_vm0 = vcmp.le.s32.totalorder %v7052_v29, %v6796_v8  ;;  %vm1283_vm1 = vcmp.le.s32.totalorder %v7052_v29, %v1267_v26  ;;  %v1281_v26 = vadd.s32 120, %v6796_v8 }
 0x29a   :  { %v5223_v22 = vpop.f32.mrb[28].mxu1  ;;  %5298 = vmatmul.mubr.bf16.gmra.mrb[56].mxu0 %v1228_v51  ;;  %5313 = vmatprep.subr.bf16.mxu1 %v1251_v54  ;;  %vm1284_vm2 = vcmp.le.s32.totalorder %v7052_v29, %v1268_v23 }
 0x29b   :  { %v1136_v24 = vpop.f32.mrb[29].mxu1  ;;  %5301 = vmatprep.mubr.bf16.mxu0 %v1229_v55  ;;  %5314 = vmatpush3.bf16.msra.mxu1 %v1251_v54  ;;  %v1145_v50 = vadd.f32 %v5223_v22, %v6979_v48  ;;  %v7056_v58 = vmul.f32 0.00390625, %v1298_v9  ;;  %v1270_v54 = vadd.s32 32, %v6796_v8  ;;  %vm1297_vm15 = vcmp.le.s32.totalorder %v7052_v29, %v1281_v26 }
 0x29c   :  { %v5224_v34 = vpop.f32.mrb[30].mxu1  ;;  %5315 = vmatprep.subr.bf16.mxu1 %v1252_v41  ;;  %v1137_v4 = vadd.f32 %v1136_v24, %v6979_v48 }
 0x29d   :  { %v1148_v47 = vadd.f32 %v5224_v34, %v6979_v48  ;;  %v1139_v15 = vpop.f32.mrb[31].mxu1  ;;  %v7069_v24 = vsel %vm1283_vm1, %v7056_v58, -10000.0  ;;  %vm1286_vm4 = vcmp.le.s32.totalorder %v7052_v29, %v1270_v54 }
 0x29e   :  { %v1140_v32 = vadd.f32 %v1139_v15, %v6979_v48  ;;  %v7077_v15 = vsel %vm1284_vm2, %v7056_v58, -10000.0 }
 0x29f   :  { %v1254_v1 = vpack.c.bf16 %v1148_v47, %v1145_v50  ;;  %5316 = vmatpush3.bf16.msra.mxu1 %v1252_v41  ;;  %v7064_v41 = vsel %vm1282_vm0, %v7056_v58, -10000.0  ;;  %v1271_v47 = vadd.s32 40, %v6796_v8 }
 0x2a0   :  { %v1253_v36 = vpack.c.bf16 %v1140_v32, %v1137_v4 }
 0x2a1   :  { %vm1287_vm5 = vcmp.le.s32.totalorder %v7052_v29, %v1271_v47 }
 0x2a2   :  { %v5227_v51 = vpop.f32.mrb[32].mxu1  ;;  %5302 = vmatmul.mubr.bf16.gmra.mrb[60].mxu0 %v1230_v14  ;;  %5317 = vmatprep.subr.bf16.mxu1 %v1253_v36 }
 0x2a3   :  { %v1161_v17 = vadd.f32 %v5227_v51, %v6979_v48  ;;  %v1152_v45 = vpop.f32.mrb[33].mxu1  ;;  %5318 = vmatpush3.bf16.msra.mxu1 %v1253_v36 }
 0x2a4   :  { %v5228_v6 = vpop.f32.mrb[34].mxu1  ;;  %5319 = vmatprep.subr.bf16.mxu1 %v1254_v1  ;;  %v1153_v52 = vadd.f32 %v1152_v45, %v6979_v48  ;;  %v7095_v45 = vsel %vm1286_vm4, %v7056_v58, -10000.0 }
 0x2a5   :  { %v1164_v60 = vadd.f32 %v5228_v6, %v6979_v48  ;;  %v1155_v55 = vpop.f32.mrb[35].mxu1 }
 0x2a6   :  { %v1156_v59 = vadd.f32 %v1155_v55, %v6979_v48  ;;  %v1274_v55 = vadd.s32 64, %v6796_v8 }
 0x2a7   :  { %v7022_v5 = vpack.c.bf16 %v1164_v60, %v1161_v17  ;;  %5320 = vmatpush3.bf16.msra.mxu1 %v1254_v1  ;;  %v1272_v1 = vadd.s32 48, %v6796_v8  ;;  %v1273_v17 = vadd.s32 56, %v6796_v8 }
 0x2a8   :  { %v7024_v46 = vpack.c.bf16 %v1156_v59, %v1153_v52  ;;  %v7104_v59 = vsel %vm1287_vm5, %v7056_v58, -10000.0  ;;  %vm1290_vm8 = vcmp.le.s32.totalorder %v7052_v29, %v1274_v55 }
 0x2a9   :  { %vm1288_vm6 = vcmp.le.s32.totalorder %v7052_v29, %v1272_v1  ;;  %vm1289_vm7 = vcmp.le.s32.totalorder %v7052_v29, %v1273_v17 }
 0x2aa   :  { %v5231_v61 = vpop.f32.mrb[36].mxu1  ;;  %5337 = vmatprep.subr.bf16.mxu1 %v7024_v46 }
 0x2ab   :  { %v1177_v12 = vadd.f32 %v5231_v61, %v6979_v48  ;;  %v1168_v53 = vpop.f32.mrb[37].mxu1 }
 0x2ac   :  { %v1169_v40 = vadd.f32 %v1168_v53, %v6979_v48  ;;  %v5232_v3 = vpop.f32.mrb[38].mxu1  ;;  %v1275_v53 = vadd.s32 72, %v6796_v8 }
 0x2ad   :  { %v1180_v14 = vadd.f32 %v5232_v3, %v6979_v48  ;;  %v1171_v30 = vpop.f32.mrb[39].mxu1 }
 0x2ae   :  { %v1172_v11 = vadd.f32 %v1171_v30, %v6979_v48  ;;  %v1276_v30 = vadd.s32 80, %v6796_v8  ;;  %vm1291_vm9 = vcmp.le.s32.totalorder %v7052_v29, %v1275_v53 }
 0x2af   :  { %v7031_v2 = vpack.c.bf16 %v1180_v14, %v1177_v12 }
 0x2b0   :  { %v7033_v19 = vpack.c.bf16 %v1172_v11, %v1169_v40  ;;  %v7113_v40 = vsel %vm1288_vm6, %v7056_v58, -10000.0  ;;  %v7122_v11 = vsel %vm1289_vm7, %v7056_v58, -10000.0  ;;  %vm1292_vm10 = vcmp.le.s32.totalorder %v7052_v29, %v1276_v30 }
 0x2b2   :  { %v5235_v16 = vpop.f32.mrb[40].mxu1 }
 0x2b3   :  { %v1193_v13 = vadd.f32 %v5235_v16, %v6979_v48  ;;  %v1184_v63 = vpop.f32.mrb[41].mxu1 }
 0x2b4   :  { %v1185_v44 = vadd.f32 %v1184_v63, %v6979_v48  ;;  %v5236_v56 = vpop.f32.mrb[42].mxu1  ;;  %v7131_v63 = vsel %vm1290_vm8, %v7056_v58, -10000.0 }
 0x2b5   :  { %v1196_v49 = vadd.f32 %v5236_v56, %v6979_v48  ;;  %v1187_v37 = vpop.f32.mrb[43].mxu1 }
 0x2b6   :  { %v1188_v27 = vadd.f32 %v1187_v37, %v6979_v48 }
 0x2b7   :  { %v7039_v33 = vpack.c.bf16 %v1196_v49, %v1193_v13  ;;  %v1277_v13 = vadd.s32 88, %v6796_v8  ;;  %v1278_v49 = vadd.s32 96, %v6796_v8 }
 0x2b8   :  { %v7041_v18 = vpack.c.bf16 %v1188_v27, %v1185_v44  ;;  %v7140_v27 = vsel %vm1291_vm9, %v7056_v58, -10000.0 }
 0x2b9   :  { %vm1293_vm11 = vcmp.le.s32.totalorder %v7052_v29, %v1277_v13  ;;  %vm1294_vm12 = vcmp.le.s32.totalorder %v7052_v29, %v1278_v49 }
 0x2ba   :  { %v5239_v10 = vpop.f32.mrb[44].mxu1  ;;  %v1312_v23 = vsel %vm1294_vm12, %v7056_v58, -10000.0 }
 0x2bb   :  { %v1209_v7 = vadd.f32 %v5239_v10, %v6979_v48  ;;  %v1200_v57 = vpop.f32.mrb[45].mxu1 }
 0x2bc   :  { %v1201_v20 = vadd.f32 %v1200_v57, %v6979_v48  ;;  %v5240_v31 = vpop.f32.mrb[46].mxu1  ;;  %v1279_v57 = vadd.s32 104, %v6796_v8 }
 0x2bd   :  { %v1212_v0 = vadd.f32 %v5240_v31, %v6979_v48  ;;  %v1203_v21 = vpop.f32.mrb[47].mxu1 }
 0x2be   :  { %v1204_v62 = vadd.f32 %v1203_v21, %v6979_v48  ;;  %v1269_v48 = vadd.s32 24, %v6796_v8  ;;  %v1280_v21 = vadd.s32 112, %v6796_v8  ;;  %vm1295_vm13 = vcmp.le.s32.totalorder %v7052_v29, %v1279_v57 }
 0x2bf   :  { %v7047_v38 = vpack.c.bf16 %v1212_v0, %v1209_v7 }
 0x2c0   :  { %v7049_v35 = vpack.c.bf16 %v1204_v62, %v1201_v20  ;;  %vm1285_vm3 = vcmp.le.s32.totalorder %v7052_v29, %v1269_v48  ;;  %v1310_v20 = vsel %vm1292_vm10, %v7056_v58, -10000.0  ;;  %v1311_v62 = vsel %vm1293_vm11, %v7056_v58, -10000.0 }
 0x2c1   :  { %v7086_v36 = vsel %vm1285_vm3, %v7056_v58, -10000.0  ;;  %vm1296_vm14 = vcmp.le.s32.totalorder %v7052_v29, %v1280_v21 }
 0x31d   :  { %v5259_v43 = vpop.f32.mrb[48].mxu1 }
 0x31e   :  { %v1350_v22 = vpop.f32.mrb[49].mxu1  ;;  %v7089_v51 = vadd.f32 %v5259_v43, %v7077_v15 }
 0x31f   :  { %v7072_v34 = vadd.f32 %v1350_v22, %v7064_v41  ;;  %v5260_v50 = vpop.f32.mrb[50].mxu1  ;;  %v1313_v22 = vsel %vm1295_vm13, %v7056_v58, -10000.0 }
 0x320   :  { %v1353_v4 = vpop.f32.mrb[51].mxu1  ;;  %v7098_v6 = vadd.f32 %v5260_v50, %v7086_v36 }
 0x321   :  { %v7080_v32 = vadd.f32 %v1353_v4, %v7069_v24  ;;  %1542 = vmax.xlane.f32.xlu0 %v7072_v34  ;;  %v1314_v4 = vsel %vm1296_vm14, %v7056_v58, -10000.0 }
 0x323   :  { %1544 = vmax.xlane.f32.xlu1 %v7080_v32 }
 0x325   :  { %1546 = vmax.xlane.f32.xlu0 %v7089_v51  ;;  %v5263_v60 = vpop.f32.mrb[52].mxu1 }
 0x326   :  { %v1366_v52 = vpop.f32.mrb[53].mxu1  ;;  %v7125_v16 = vadd.f32 %v5263_v60, %v7113_v40  ;;  %v1315_v60 = vsel %vm1297_vm15, %v7056_v58, -10000.0 }
 0x327   :  { %v7107_v61 = vadd.f32 %v1366_v52, %v7095_v45  ;;  %1548 = vmax.xlane.f32.xlu1 %v7098_v6  ;;  %v5264_v12 = vpop.f32.mrb[54].mxu1 }
 0x328   :  { %v1369_v3 = vpop.f32.mrb[55].mxu1  ;;  %v7134_v44 = vadd.f32 %v5264_v12, %v7122_v11 }
 0x329   :  { %v7116_v14 = vadd.f32 %v1369_v3, %v7104_v59  ;;  %1550 = vmax.xlane.f32.xlu0 %v7107_v61 }
 0x32b   :  { %1552 = vmax.xlane.f32.xlu1 %v7116_v14 }
 0x32d   :  { %1554 = vmax.xlane.f32.xlu0 %v7125_v16  ;;  %v5267_v56 = vpop.f32.mrb[56].mxu1 }
 0x32e   :  { %v1382_v37 = vpop.f32.mrb[57].mxu1  ;;  %v7156_v9 = vadd.f32 %v5267_v56, %v1310_v20 }
 0x32f   :  { %v7143_v10 = vadd.f32 %v1382_v37, %v7131_v63  ;;  %1556 = vmax.xlane.f32.xlu1 %v7134_v44  ;;  %v5268_v7 = vpop.f32.mrb[58].mxu1 }
 0x330   :  { %v1385_v31 = vpop.f32.mrb[59].mxu1  ;;  %v7162_v48 = vadd.f32 %v5268_v7, %v1311_v62 }
 0x331   :  { %v7150_v0 = vadd.f32 %v1385_v31, %v7140_v27  ;;  %1558 = vmax.xlane.f32.xlu0 %v7143_v10 }
 0x333   :  { %1560 = vmax.xlane.f32.xlu1 %v7150_v0 }
 0x335   :  { %1562 = vmax.xlane.f32.xlu0 %v7156_v9  ;;  %v5271_v43 = vpop.f32.mrb[60].mxu1 }
 0x336   :  { %v1398_v54 = vpop.f32.mrb[61].mxu1  ;;  %v7176_v55 = vadd.f32 %v5271_v43, %v1314_v4 }
 0x337   :  { %v7167_v50 = vadd.f32 %v1398_v54, %v1312_v23  ;;  %1564 = vmax.xlane.f32.xlu1 %v7162_v48  ;;  %v5272_v47 = vpop.f32.mrb[62].mxu1 }
 0x338   :  { %v1401_v1 = vpop.f32.mrb[63].mxu1  ;;  %v7179_v52 = vadd.f32 %v5272_v47, %v1315_v60 }
 0x339   :  { %v7172_v17 = vadd.f32 %v1401_v1, %v1313_v22  ;;  %1566 = vmax.xlane.f32.xlu0 %v7167_v50 }
 0x33b   :  { %1568 = vmax.xlane.f32.xlu1 %v7172_v17 }
 0x33d   :  { %1570 = vmax.xlane.f32.xlu0 %v7176_v55 }
 0x33f   :  { %1572 = vmax.xlane.f32.xlu1 %v7179_v52 }
 0x35d   :  { %v5291_v29 = vpop.f32.mrb[48].mxu0 }
 0x35e   :  { %v7184_v12 = vadd.f32 %v5291_v29, %v7077_v15  ;;  %v1447_v53 = vpop.f32.mrb[49].mxu0 }
 0x35f   :  { %v7187_v3 = vadd.f32 %v1447_v53, %v7064_v41  ;;  %v5292_v30 = vpop.f32.mrb[50].mxu0 }
 0x360   :  { %v7190_v58 = vadd.f32 %v5292_v30, %v7086_v36  ;;  %v1450_v13 = vpop.f32.mrb[51].mxu0 }
 0x361   :  { %v7193_v56 = vadd.f32 %v1450_v13, %v7069_v24  ;;  %1574 = vmax.xlane.f32.xlu0 %v7187_v3 }
 0x363   :  { %1576 = vmax.xlane.f32.xlu1 %v7193_v56 }
 0x365   :  { %1578 = vmax.xlane.f32.xlu0 %v7184_v12  ;;  %v5295_v15 = vpop.f32.mrb[52].mxu0 }
 0x366   :  { %v7199_v49 = vadd.f32 %v5295_v15, %v7113_v40  ;;  %v1463_v41 = vpop.f32.mrb[53].mxu0 }
 0x367   :  { %v7202_v37 = vadd.f32 %v1463_v41, %v7095_v45  ;;  %1580 = vmax.xlane.f32.xlu1 %v7190_v58  ;;  %v5296_v36 = vpop.f32.mrb[54].mxu0 }
 0x368   :  { %v7206_v24 = vadd.f32 %v5296_v36, %v7122_v11  ;;  %v1466_v7 = vpop.f32.mrb[55].mxu0 }
 0x369   :  { %v7209_v57 = vadd.f32 %v1466_v7, %v7104_v59  ;;  %1582 = vmax.xlane.f32.xlu0 %v7202_v37 }
 0x36b   :  { %1584 = vmax.xlane.f32.xlu1 %v7209_v57 }
 0x36d   :  { %1586 = vmax.xlane.f32.xlu0 %v7199_v49  ;;  %v5299_v40 = vpop.f32.mrb[56].mxu0 }
 0x36e   :  { %v7214_v31 = vadd.f32 %v5299_v40, %v1310_v20  ;;  %v1479_v45 = vpop.f32.mrb[57].mxu0 }
 0x36f   :  { %v7217_v21 = vadd.f32 %v1479_v45, %v7131_v63  ;;  %1588 = vmax.xlane.f32.xlu1 %v7206_v24  ;;  %v5300_v11 = vpop.f32.mrb[58].mxu0 }
 0x370   :  { %v7220_v26 = vadd.f32 %v5300_v11, %v1311_v62  ;;  %v1482_v59 = vpop.f32.mrb[59].mxu0 }
 0x371   :  { %v7223_v43 = vadd.f32 %v1482_v59, %v7140_v27  ;;  %1590 = vmax.xlane.f32.xlu0 %v7217_v21 }
 0x373   :  { %1592 = vmax.xlane.f32.xlu1 %v7223_v43 }
 0x375   :  { %1594 = vmax.xlane.f32.xlu0 %v7214_v31  ;;  %v5303_v20 = vpop.f32.mrb[60].mxu0 }
 0x376   :  { %v7228_v54 = vadd.f32 %v5303_v20, %v1314_v4  ;;  %v1495_v63 = vpop.f32.mrb[61].mxu0 }
 0x377   :  { %v7230_v47 = vadd.f32 %v1495_v63, %v1312_v23  ;;  %1596 = vmax.xlane.f32.xlu1 %v7220_v26  ;;  %v5304_v62 = vpop.f32.mrb[62].mxu0 }
 0x378   :  { %v7233_v1 = vadd.f32 %v5304_v62, %v1315_v60  ;;  %v1498_v29 = vpop.f32.mrb[63].mxu0 }
 0x379   :  { %v7235_v27 = vadd.f32 %v1498_v29, %v1313_v22  ;;  %1598 = vmax.xlane.f32.xlu0 %v7230_v47 }
 0x37b   :  { %1600 = vmax.xlane.f32.xlu1 %v7235_v27 }
 0x37d   :  { %1602 = vmax.xlane.f32.xlu0 %v7228_v54 }
 0x37f   :  { %1604 = vmax.xlane.f32.xlu1 %v7233_v1 }
 0x3ae   :  { %v1543_v4 = vpop.xlane.xlu0 %1542 }
 0x3af   :  { %v1606_v23 = vsub.f32 %v7072_v34, %v1543_v4 }
 0x3b0   :  { %v1545_v53 = vpop.xlane.xlu1 %1544 }
 0x3b1   :  { %v1607_v30 = vsub.f32 %v7080_v32, %v1545_v53 }
 0x3b2   :  { %v1547_v13 = vpop.xlane.xlu0 %1546 }
 0x3b3   :  { %v1638_v60 = vpack.c.bf16 %v1607_v30, %v1606_v23  ;;  %v1608_v22 = vsub.f32 %v7089_v51, %v1547_v13 }
 0x3b4   :  { %v1549_v15 = vpop.xlane.xlu1 %1548 }
 0x3b5   :  { %v1655_v41 = vmul.bf16 1069105081, %v1638_v60  ;;  %v1609_v36 = vsub.f32 %v7098_v6, %v1549_v15 }
 0x3b6   :  { %v1551_v7 = vpop.xlane.xlu0 %1550 }
 0x3b7   :  { %5634 = vpow.bf16 %v1655_v41  ;;  %v1639_v40 = vpack.c.bf16 %v1609_v36, %v1608_v22  ;;  %v1610_v59 = vsub.f32 %v7107_v61, %v1551_v7 }
 0x3b8   :  { %v1553_v45 = vpop.xlane.xlu1 %1552 }
 0x3b9   :  { %v1658_v11 = vmul.bf16 1069105081, %v1639_v40  ;;  %v1611_v20 = vsub.f32 %v7116_v14, %v1553_v45 }
 0x3ba   :  { %v1555_v34 = vpop.xlane.xlu0 %1554 }
 0x3bb   :  { %5636 = vpow.bf16 %v1658_v11  ;;  %v1640_v32 = vpack.c.bf16 %v1611_v20, %v1610_v59  ;;  %v1612_v29 = vsub.f32 %v7125_v16, %v1555_v34 }
 0x3bc   :  { %v1557_v63 = vpop.xlane.xlu1 %1556 }
 0x3bd   :  { %v1661_v62 = vmul.bf16 1069105081, %v1640_v32  ;;  %v1613_v51 = vsub.f32 %v7134_v44, %v1557_v63 }
 0x3be   :  { %v1559_v4 = vpop.xlane.xlu0 %1558 }
 0x3bf   :  { %5638 = vpow.bf16 %v1661_v62  ;;  %v1641_v6 = vpack.c.bf16 %v1613_v51, %v1612_v29  ;;  %v1614_v30 = vsub.f32 %v7143_v10, %v1559_v4 }
 0x3c0   :  { %v1561_v53 = vpop.xlane.xlu1 %1560 }
 0x3c1   :  { %v1664_v23 = vmul.bf16 1069105081, %v1641_v6  ;;  %v1615_v61 = vsub.f32 %v7150_v0, %v1561_v53 }
 0x3c2   :  { %v5635_v13 = vpop.eup %5634  ;;  %v1563_v14 = vpop.xlane.xlu0 %1562 }
 0x3c3   :  { %5640 = vpow.bf16 %v1664_v23  ;;  %v1642_v60 = vpack.c.bf16 %v1615_v61, %v1614_v30  ;;  %5321 = vmatprep.mubr.bf16.mxu1 %v5635_v13  ;;  %v1702_v15 = vunpack.c.l.bf16 %v5635_v13  ;;  %v1703_v22 = vunpack.c.h.bf16 %v5635_v13 }
 0x3c4   :  { %v1565_v41 = vpop.xlane.xlu1 %1564  ;;  %v1616_v44 = vsub.f32 %v7156_v9, %v1563_v14 }
 0x3c5   :  { %v1667_v16 = vmul.bf16 1069105081, %v1642_v60  ;;  %v1617_v36 = vsub.f32 %v7162_v48, %v1565_v41  ;;  %1734 = vadd.xlane.f32.xlu0 %v1702_v15  ;;  %1736 = vadd.xlane.f32.xlu1 %v1703_v22 }
 0x3c6   :  { %v5637_v7 = vpop.eup %5636  ;;  %v1567_v40 = vpop.xlane.xlu0 %1566 }
 0x3c7   :  { %5642 = vpow.bf16 %v1667_v16  ;;  %v1643_v10 = vpack.c.bf16 %v1617_v36, %v1616_v44  ;;  %5322 = vmatmul.mubr.bf16.vlgmr.msra.gmra.mrb[64].mxu1 %v5637_v7  ;;  %v1704_v0 = vunpack.c.l.bf16 %v5637_v7  ;;  %v1705_v11 = vunpack.c.h.bf16 %v5637_v7  ;;  %v5482_v16 = vld [vmem:[#allocation10] sm:$0xff]  }
 0x3c8   :  { %5338 = vmatpush3.bf16.msra.mxu1 %v7024_v46  ;;  %v1569_v45 = vpop.xlane.xlu1 %1568  ;;  %v1618_v20 = vsub.f32 %v7167_v50, %v1567_v40  ;;  %5369 = vmatprep.subr.bf16.mxu0 %v5482_v16 }
 0x3c9   :  { %v1670_v59 = vmul.bf16 1069105081, %v1643_v10  ;;  %v1619_v34 = vsub.f32 %v7172_v17, %v1569_v45  ;;  %5339 = vmatprep.subr.bf16.mxu1 %v7022_v5  ;;  %1738 = vadd.xlane.f32.xlu0 %v1704_v0 }
 0x3ca   :  { %v5639_v9 = vpop.eup %5638  ;;  %1740 = vadd.xlane.f32.xlu1 %v1705_v11  ;;  %v1571_v48 = vpop.xlane.xlu0 %1570  ;;  %5370 = vmatpush3.bf16.msra.mxu0 %v5482_v16 }
 0x3cb   :  { %5644 = vpow.bf16 %v1670_v59  ;;  %v1644_v32 = vpack.c.bf16 %v1619_v34, %v1618_v20  ;;  %5325 = vmatprep.mubr.bf16.mxu1 %v5639_v9  ;;  %v1706_v63 = vunpack.c.l.bf16 %v5639_v9  ;;  %v1707_v62 = vunpack.c.h.bf16 %v5639_v9 }
 0x3cc   :  { %5340 = vmatpush3.bf16.msra.mxu1 %v7022_v5  ;;  %v1573_v46 = vpop.xlane.xlu1 %1572  ;;  %v1620_v51 = vsub.f32 %v7176_v55, %v1571_v48 }
 0x3cd   :  { %v1673_v29 = vmul.bf16 1069105081, %v1644_v32  ;;  %v1621_v50 = vsub.f32 %v7179_v52, %v1573_v46  ;;  %5341 = vmatprep.subr.bf16.mxu1 %v7033_v19  ;;  %1742 = vadd.xlane.f32.xlu0 %v1706_v63 }
 0x3ce   :  { %v5641_v17 = vpop.eup %5640  ;;  %1744 = vadd.xlane.f32.xlu1 %v1707_v62 }
 0x3cf   :  { %5646 = vpow.bf16 %v1673_v29  ;;  %v1645_v4 = vpack.c.bf16 %v1621_v50, %v1620_v51  ;;  %5326 = vmatmul.mubr.bf16.gmra.mrb[68].mxu1 %v5641_v17  ;;  %v1708_v6 = vunpack.c.l.bf16 %v5641_v17  ;;  %v1709_v53 = vunpack.c.h.bf16 %v5641_v17 }
 0x3d0   :  { %5342 = vmatpush3.bf16.msra.mxu1 %v7033_v19 }
 0x3d1   :  { %v1676_v5 = vmul.bf16 1069105081, %v1645_v4  ;;  %5343 = vmatprep.subr.bf16.mxu1 %v7031_v2  ;;  %1746 = vadd.xlane.f32.xlu0 %v1708_v6 }
 0x3d2   :  { %v5643_v23 = vpop.eup %5642  ;;  %1748 = vadd.xlane.f32.xlu1 %v1709_v53 }
 0x3d3   :  { %5648 = vpow.bf16 %v1676_v5  ;;  %5329 = vmatprep.mubr.bf16.mxu1 %v5643_v23  ;;  %v1710_v55 = vunpack.c.l.bf16 %v5643_v23  ;;  %v1711_v52 = vunpack.c.h.bf16 %v5643_v23 }
 0x3d4   :  { %5344 = vmatpush3.bf16.msra.mxu1 %v7031_v2 }
 0x3d5   :  { %5345 = vmatprep.subr.bf16.mxu1 %v7041_v18  ;;  %1750 = vadd.xlane.f32.xlu0 %v1710_v55 }
 0x3d6   :  { %v5645_v30 = vpop.eup %5644  ;;  %1752 = vadd.xlane.f32.xlu1 %v1711_v52 }
 0x3d7   :  { %5330 = vmatmul.mubr.bf16.gmra.mrb[72].mxu1 %v5645_v30  ;;  %v1712_v61 = vunpack.c.l.bf16 %v5645_v30  ;;  %v1713_v19 = vunpack.c.h.bf16 %v5645_v30 }
 0x3d8   :  { %5346 = vmatpush3.bf16.msra.mxu1 %v7041_v18 }
 0x3d9   :  { %5347 = vmatprep.subr.bf16.mxu1 %v7039_v33  ;;  %1754 = vadd.xlane.f32.xlu0 %v1712_v61 }
 0x3da   :  { %v5647_v13 = vpop.eup %5646  ;;  %1756 = vadd.xlane.f32.xlu1 %v1713_v19 }
 0x3db   :  { %5333 = vmatprep.mubr.bf16.mxu1 %v5647_v13  ;;  %v1714_v14 = vunpack.c.l.bf16 %v5647_v13  ;;  %v1715_v60 = vunpack.c.h.bf16 %v5647_v13 }
 0x3dc   :  { %5348 = vmatpush3.bf16.msra.mxu1 %v7039_v33  ;;  %v5483_v33 = vld [vmem:[#allocation10 + $0x8] sm:$0xff]  }
 0x3dd   :  { %5349 = vmatprep.subr.bf16.mxu1 %v7049_v35  ;;  %1758 = vadd.xlane.f32.xlu0 %v1714_v14 }
 0x3de   :  { %v5649_v2 = vpop.eup %5648  ;;  %1760 = vadd.xlane.f32.xlu1 %v1715_v60  ;;  %5371 = vmatprep.subr.bf16.mxu0 %v5483_v33 }
 0x3df   :  { %5334 = vmatmul.mubr.bf16.gmra.mrb[76].mxu1 %v5649_v2  ;;  %v1716_v15 = vunpack.c.l.bf16 %v5649_v2  ;;  %v1717_v41 = vunpack.c.h.bf16 %v5649_v2  ;;  %5372 = vmatpush3.bf16.msra.mxu0 %v5483_v33 }
 0x3e0   :  { %5350 = vmatpush3.bf16.msra.mxu1 %v7049_v35  ;;  %v5484_v35 = vld [vmem:[#allocation10 + $0x10] sm:$0xff]  }
 0x3e1   :  { %5351 = vmatprep.subr.bf16.mxu1 %v7047_v38  ;;  %1762 = vadd.xlane.f32.xlu0 %v1716_v15 }
 0x3e2   :  { %1764 = vadd.xlane.f32.xlu1 %v1717_v41  ;;  %5373 = vmatprep.subr.bf16.mxu0 %v5484_v35 }
 0x3e3   :  { %5374 = vmatpush3.bf16.msra.mxu0 %v5484_v35 }
 0x3e4   :  { %5352 = vmatpush3.bf16.msra.mxu1 %v7047_v38 }
 0x3ee   :  { %v1575_v18 = vpop.xlane.xlu0 %1574 }
 0x3ef   :  { %v1622_v44 = vsub.f32 %v7187_v3, %v1575_v18  ;;  %v5485_v3 = vld [vmem:[#allocation10 + $0x18] sm:$0xff]  }
 0x3f0   :  { %v1577_v22 = vpop.xlane.xlu1 %1576  ;;  %5375 = vmatprep.subr.bf16.mxu0 %v5485_v3 }
 0x3f1   :  { %v1623_v36 = vsub.f32 %v7193_v56, %v1577_v22  ;;  %5376 = vmatpush3.bf16.msra.mxu0 %v5485_v3 }
 0x3f2   :  { %v1579_v7 = vpop.xlane.xlu0 %1578 }
 0x3f3   :  { %v1646_v40 = vpack.c.bf16 %v1623_v36, %v1622_v44  ;;  %v1624_v45 = vsub.f32 %v7184_v12, %v1579_v7 }
 0x3f4   :  { %v1581_v10 = vpop.xlane.xlu1 %1580 }
 0x3f5   :  { %v1679_v0 = vmul.bf16 1069105081, %v1646_v40  ;;  %v1625_v38 = vsub.f32 %v7190_v58, %v1581_v10  ;;  %v5486_v10 = vld [vmem:[#allocation10 + $0x20] sm:$0xff]  }
 0x3f6   :  { %v1583_v11 = vpop.xlane.xlu0 %1582  ;;  %5377 = vmatprep.subr.bf16.mxu0 %v5486_v10 }
 0x3f7   :  { %5650 = vpow.bf16 %v1679_v0  ;;  %v1647_v59 = vpack.c.bf16 %v1625_v38, %v1624_v45  ;;  %v1626_v34 = vsub.f32 %v7202_v37, %v1583_v11  ;;  %5378 = vmatpush3.bf16.msra.mxu0 %v5486_v10 }
 0x3f8   :  { %v1585_v20 = vpop.xlane.xlu1 %1584 }
 0x3f9   :  { %v1682_v56 = vmul.bf16 1069105081, %v1647_v59  ;;  %v1627_v9 = vsub.f32 %v7209_v57, %v1585_v20  ;;  %v5488_v59 = vld [vmem:[#allocation10 + $0x30] sm:$0xff]  }
 0x3fa   :  { %v1587_v48 = vpop.xlane.xlu0 %1586 }
 0x3fb   :  { %5652 = vpow.bf16 %v1682_v56  ;;  %v1648_v32 = vpack.c.bf16 %v1627_v9, %v1626_v34  ;;  %v1628_v58 = vsub.f32 %v7199_v49, %v1587_v48  ;;  %v5489_v34 = vld [vmem:[#allocation10 + $0x38] sm:$0xff]  }
 0x3fc   :  { %v1589_v63 = vpop.xlane.xlu1 %1588 }
 0x3fd   :  { %v1685_v12 = vmul.bf16 1069105081, %v1648_v32  ;;  %v1629_v46 = vsub.f32 %v7206_v24, %v1589_v63 }
 0x3fe   :  { %v1591_v62 = vpop.xlane.xlu0 %1590 }
 0x3ff   :  { %5654 = vpow.bf16 %v1685_v12  ;;  %v1649_v29 = vpack.c.bf16 %v1629_v46, %v1628_v58  ;;  %v1630_v37 = vsub.f32 %v7217_v21, %v1591_v62 }
 0x400   :  { %v1593_v51 = vpop.xlane.xlu1 %1592 }
 0x401   :  { %v1688_v50 = vmul.bf16 1069105081, %v1649_v29  ;;  %v1631_v57 = vsub.f32 %v7223_v43, %v1593_v51 }
 0x402   :  { %v5651_v17 = vpop.eup %5650  ;;  %v1595_v4 = vpop.xlane.xlu0 %1594 }
 0x403   :  { %5656 = vpow.bf16 %v1688_v50  ;;  %v1650_v6 = vpack.c.bf16 %v1631_v57, %v1630_v37  ;;  %5353 = vmatprep.mubr.bf16.mxu1 %v5651_v17  ;;  %v1718_v53 = vunpack.c.l.bf16 %v5651_v17  ;;  %v1719_v49 = vunpack.c.h.bf16 %v5651_v17 }
 0x404   :  { %v1597_v5 = vpop.xlane.xlu1 %1596  ;;  %v1632_v24 = vsub.f32 %v7214_v31, %v1595_v4 }
 0x405   :  { %v1691_v23 = vmul.bf16 1069105081, %v1650_v6  ;;  %v1633_v55 = vsub.f32 %v7220_v26, %v1597_v5  ;;  %1766 = vadd.xlane.f32.xlu0 %v1718_v53  ;;  %1768 = vadd.xlane.f32.xlu1 %v1719_v49 }
 0x406   :  { %v5653_v52 = vpop.eup %5652  ;;  %v1599_v30 = vpop.xlane.xlu0 %1598 }
 0x407   :  { %5658 = vpow.bf16 %v1691_v23  ;;  %v1651_v21 = vpack.c.bf16 %v1633_v55, %v1632_v24  ;;  %5354 = vmatmul.mubr.bf16.vlgmr.msra.gmra.mrb[80].mxu1 %v5653_v52  ;;  %v1720_v43 = vunpack.c.l.bf16 %v5653_v52  ;;  %v1721_v19 = vunpack.c.h.bf16 %v5653_v52 }
 0x408   :  { %v1601_v61 = vpop.xlane.xlu1 %1600  ;;  %v1634_v14 = vsub.f32 %v7230_v47, %v1599_v30 }
 0x409   :  { %v1694_v13 = vmul.bf16 1069105081, %v1651_v21  ;;  %v1635_v60 = vsub.f32 %v7235_v27, %v1601_v61  ;;  %1770 = vadd.xlane.f32.xlu0 %v1720_v43  ;;  %1772 = vadd.xlane.f32.xlu1 %v1721_v19 }
 0x40a   :  { %v5655_v2 = vpop.eup %5654  ;;  %v1603_v31 = vpop.xlane.xlu0 %1602 }
 0x40b   :  { %5660 = vpow.bf16 %v1694_v13  ;;  %v1652_v26 = vpack.c.bf16 %v1635_v60, %v1634_v14  ;;  %5357 = vmatprep.mubr.bf16.mxu1 %v5655_v2  ;;  %v1722_v15 = vunpack.c.l.bf16 %v5655_v2  ;;  %v1723_v18 = vunpack.c.h.bf16 %v5655_v2 }
 0x40c   :  { %v1605_v41 = vpop.xlane.xlu1 %1604  ;;  %v1636_v16 = vsub.f32 %v7228_v54, %v1603_v31 }
 0x40d   :  { %v1697_v22 = vmul.bf16 1069105081, %v1652_v26  ;;  %v1637_v33 = vsub.f32 %v7233_v1, %v1605_v41  ;;  %1774 = vadd.xlane.f32.xlu0 %v1722_v15  ;;  %1776 = vadd.xlane.f32.xlu1 %v1723_v18  ;;  %v5487_v1 = vld [vmem:[#allocation10 + $0x28] sm:$0xff]  }
 0x40e   :  { %v5657_v44 = vpop.eup %5656  ;;  %5379 = vmatprep.subr.bf16.mxu0 %v5487_v1 }
 0x40f   :  { %5662 = vpow.bf16 %v1697_v22  ;;  %v1653_v47 = vpack.c.bf16 %v1637_v33, %v1636_v16  ;;  %5358 = vmatmul.mubr.bf16.gmra.mrb[84].mxu1 %v5657_v44  ;;  %v1724_v27 = vunpack.c.l.bf16 %v5657_v44  ;;  %v1725_v36 = vunpack.c.h.bf16 %v5657_v44  ;;  %5380 = vmatpush3.bf16.msra.mxu0 %v5487_v1 }
 0x410   :  { %5381 = vmatprep.subr.bf16.mxu0 %v5488_v59 }
 0x411   :  { %v1700_v7 = vmul.bf16 1069105081, %v1653_v47  ;;  %1778 = vadd.xlane.f32.xlu0 %v1724_v27  ;;  %1780 = vadd.xlane.f32.xlu1 %v1725_v36 }
 0x412   :  { %v5659_v40 = vpop.eup %5658 }
 0x413   :  { %5664 = vpow.bf16 %v1700_v7  ;;  %5361 = vmatprep.mubr.bf16.mxu1 %v5659_v40  ;;  %v1726_v35 = vunpack.c.l.bf16 %v5659_v40  ;;  %v1727_v0 = vunpack.c.h.bf16 %v5659_v40  ;;  %5382 = vmatpush3.bf16.msra.mxu0 %v5488_v59 }
 0x414   :  { %5383 = vmatprep.subr.bf16.mxu0 %v5489_v34 }
 0x415   :  { %1782 = vadd.xlane.f32.xlu0 %v1726_v35  ;;  %1784 = vadd.xlane.f32.xlu1 %v1727_v0 }
 0x416   :  { %v5661_v54 = vpop.eup %5660 }
 0x417   :  { %5362 = vmatmul.mubr.bf16.gmra.mrb[88].mxu1 %v5661_v54  ;;  %v1728_v45 = vunpack.c.l.bf16 %v5661_v54  ;;  %v1729_v38 = vunpack.c.h.bf16 %v5661_v54  ;;  %5384 = vmatpush3.bf16.msra.mxu0 %v5489_v34 }
 0x419   :  { %1786 = vadd.xlane.f32.xlu0 %v1728_v45  ;;  %1788 = vadd.xlane.f32.xlu1 %v1729_v38 }
 0x41a   :  { %v5663_v11 = vpop.eup %5662 }
 0x41b   :  { %5365 = vmatprep.mubr.bf16.mxu1 %v5663_v11  ;;  %v1731_v20 = vunpack.c.h.bf16 %v5663_v11  ;;  %v1730_v3 = vunpack.c.l.bf16 %v5663_v11 }
 0x41d   :  { %1790 = vadd.xlane.f32.xlu0 %v1730_v3  ;;  %1792 = vadd.xlane.f32.xlu1 %v1731_v20 }
 0x41e   :  { %v5665_v56 = vpop.eup %5664 }
 0x41f   :  { %5366 = vmatmul.mubr.bf16.gmra.mrb[92].mxu1 %v5665_v56  ;;  %v1733_v9 = vunpack.c.h.bf16 %v5665_v56  ;;  %v1732_v48 = vunpack.c.l.bf16 %v5665_v56 }
 0x420   :  { %3092 = vmatprep.mubr.bf16.mxu1 %v6155_v42 }
 0x421   :  { %1794 = vadd.xlane.f32.xlu0 %v1732_v48  ;;  %1796 = vadd.xlane.f32.xlu1 %v1733_v9 }
 0x452   :  { %v1735_v32 = vpop.xlane.xlu0 %1734  ;;  %v1737_v63 = vpop.xlane.xlu1 %1736 }
 0x453   :  { %5666 = vrcp.f32 %v1735_v32 }
 0x456   :  { %v1739_v12 = vpop.xlane.xlu0 %1738 }
 0x457   :  { %v1741_v58 = vpop.xlane.xlu1 %1740  ;;  %5668 = vrcp.f32 %v1739_v12 }
 0x458   :  { %5670 = vrcp.f32 %v1741_v58 }
 0x459   :  { %5672 = vrcp.f32 %v1737_v63 }
 0x45a   :  { %v1743_v46 = vpop.xlane.xlu0 %1742 }
 0x45b   :  { %v1745_v62 = vpop.xlane.xlu1 %1744  ;;  %5674 = vrcp.f32 %v1743_v46 }
 0x45d   :  { %v5667_v57 = vpop.eup %5666 }
 0x45e   :  { %v1747_v29 = vpop.xlane.xlu0 %1746 }
 0x45f   :  { %v1749_v51 = vpop.xlane.xlu1 %1748  ;;  %5676 = vrcp.f32 %v1747_v29 }
 0x460   :  { %5678 = vrcp.f32 %v1749_v51 }
 0x461   :  { %v5669_v6 = vpop.eup %5668  ;;  %5680 = vrcp.f32 %v1745_v62 }
 0x462   :  { %v1751_v50 = vpop.xlane.xlu0 %1750  ;;  %v5671_v49 = vpop.eup %5670 }
 0x463   :  { %v1753_v37 = vpop.xlane.xlu1 %1752  ;;  %v5673_v24 = vpop.eup %5672  ;;  %5682 = vrcp.f32 %v1751_v50 }
 0x465   :  { %v5675_v60 = vpop.eup %5674 }
 0x466   :  { %v1755_v17 = vpop.xlane.xlu0 %1754 }
 0x467   :  { %v1757_v53 = vpop.xlane.xlu1 %1756  ;;  %5684 = vrcp.f32 %v1755_v17 }
 0x468   :  { %5686 = vrcp.f32 %v1757_v53 }
 0x469   :  { %v5677_v31 = vpop.eup %5676  ;;  %5688 = vrcp.f32 %v1753_v37 }
 0x46a   :  { %v1759_v19 = vpop.xlane.xlu0 %1758  ;;  %v5679_v15 = vpop.eup %5678 }
 0x46b   :  { %v1761_v14 = vpop.xlane.xlu1 %1760  ;;  %v5681_v18 = vpop.eup %5680  ;;  %5690 = vrcp.f32 %v1759_v19 }
 0x46d   :  { %v5683_v10 = vpop.eup %5682 }
 0x46e   :  { %v1763_v44 = vpop.xlane.xlu0 %1762 }
 0x46f   :  { %v1765_v36 = vpop.xlane.xlu1 %1764  ;;  %5692 = vrcp.f32 %v1763_v44 }
 0x470   :  { %5694 = vrcp.f32 %v1765_v36 }
 0x471   :  { %v5685_v0 = vpop.eup %5684  ;;  %5696 = vrcp.f32 %v1761_v14 }
 0x472   :  { %v5687_v1 = vpop.eup %5686 }
 0x473   :  { %v5689_v38 = vpop.eup %5688 }
 0x475   :  { %v5691_v48 = vpop.eup %5690 }
 0x479   :  { %v5693_v63 = vpop.eup %5692 }
 0x47a   :  { %v5695_v58 = vpop.eup %5694 }
 0x47b   :  { %v5697_v62 = vpop.eup %5696 }
 0x492   :  { %v1769_v53 = vpop.xlane.xlu1 %1768 }
 0x49a   :  { %v5323_v4 = vpop.f32.mrb[64].mxu1 }
 0x49b   :  { %v1832_v5 = vpop.f32.mrb[65].mxu1  ;;  %v2026_v55 = vmul.f32 %v5669_v6, %v5323_v4  ;;  %v1767_v6 = vpop.xlane.xlu0 %1766 }
 0x49c   :  { %v5324_v23 = vpop.f32.mrb[66].mxu1  ;;  %v2024_v21 = vmul.f32 %v5667_v57, %v1832_v5  ;;  %5698 = vrcp.f32 %v1767_v6 }
 0x49d   :  { %v2027_v52 = vmul.f32 %v5671_v49, %v5324_v23  ;;  %v1835_v30 = vpop.f32.mrb[67].mxu1  ;;  %v1773_v49 = vpop.xlane.xlu1 %1772 }
 0x49e   :  { %v2025_v43 = vmul.f32 %v5673_v24, %v1835_v30 }
 0x49f   :  { %v2057_v61 = vpack.c.bf16 %v2027_v52, %v2026_v55  ;;  %v1771_v5 = vpop.xlane.xlu0 %1770 }
 0x4a0   :  { %v2056_v13 = vpack.c.bf16 %v2025_v43, %v2024_v21  ;;  %5700 = vrcp.f32 %v1771_v5 }
 0x4a1   :  { %v1777_v24 = vpop.xlane.xlu1 %1776  ;;  %5702 = vrcp.f32 %v1773_v49 }
 0x4a2   :  { %v5327_v2 = vpop.f32.mrb[68].mxu1  ;;  %5385 = vmatprep.mubr.bf16.mxu0 %v2056_v13  ;;  %5704 = vrcp.f32 %v1769_v53 }
 0x4a3   :  { %v1848_v26 = vpop.f32.mrb[69].mxu1  ;;  %5386 = vmatmul.mubr.bf16.vlgmr.msra.gmra.mrb[64].mxu0 %v2057_v61  ;;  %v2030_v22 = vmul.f32 %v5677_v31, %v5327_v2  ;;  %v1775_v23 = vpop.xlane.xlu0 %1774 }
 0x4a4   :  { %v5328_v41 = vpop.f32.mrb[70].mxu1  ;;  %v2028_v47 = vmul.f32 %v5675_v60, %v1848_v26  ;;  %5706 = vrcp.f32 %v1775_v23 }
 0x4a5   :  { %v2031_v16 = vmul.f32 %v5679_v15, %v5328_v41  ;;  %v1851_v33 = vpop.f32.mrb[71].mxu1  ;;  %v1781_v52 = vpop.xlane.xlu1 %1780 }
 0x4a6   :  { %v2029_v27 = vmul.f32 %v5681_v18, %v1851_v33  ;;  %v5699_v43 = vpop.eup %5698 }
 0x4a7   :  { %v2059_v7 = vpack.c.bf16 %v2031_v16, %v2030_v22  ;;  %v1779_v55 = vpop.xlane.xlu0 %1778 }
 0x4a8   :  { %v2058_v40 = vpack.c.bf16 %v2029_v27, %v2028_v47  ;;  %5708 = vrcp.f32 %v1779_v55 }
 0x4a9   :  { %v1785_v21 = vpop.xlane.xlu1 %1784  ;;  %5710 = vrcp.f32 %v1781_v52 }
 0x4aa   :  { %v5331_v35 = vpop.f32.mrb[72].mxu1  ;;  %5389 = vmatprep.mubr.bf16.mxu0 %v2058_v40  ;;  %v5701_v13 = vpop.eup %5700  ;;  %5712 = vrcp.f32 %v1777_v24 }
 0x4ab   :  { %v1864_v54 = vpop.f32.mrb[73].mxu1  ;;  %5390 = vmatmul.mubr.bf16.gmra.mrb[68].mxu0 %v2059_v7  ;;  %v2034_v11 = vmul.f32 %v5685_v0, %v5331_v35  ;;  %v1783_v30 = vpop.xlane.xlu0 %1782 }
 0x4ac   :  { %v5332_v45 = vpop.f32.mrb[74].mxu1  ;;  %v2032_v3 = vmul.f32 %v5683_v10, %v1864_v54  ;;  %v5703_v2 = vpop.eup %5702  ;;  %5714 = vrcp.f32 %v1783_v30 }
 0x4ad   :  { %v2035_v59 = vmul.f32 %v5687_v1, %v5332_v45  ;;  %v1867_v20 = vpop.f32.mrb[75].mxu1  ;;  %v1789_v14 = vpop.xlane.xlu1 %1788 }
 0x4ae   :  { %v2033_v56 = vmul.f32 %v5689_v38, %v1867_v20  ;;  %v5705_v26 = vpop.eup %5704 }
 0x4af   :  { %v2061_v34 = vpack.c.bf16 %v2035_v59, %v2034_v11  ;;  %v1787_v61 = vpop.xlane.xlu0 %1786  ;;  %v5707_v36 = vpop.eup %5706 }
 0x4b0   :  { %v2060_v9 = vpack.c.bf16 %v2033_v56, %v2032_v3  ;;  %5716 = vrcp.f32 %v1787_v61 }
 0x4b1   :  { %v1793_v27 = vpop.xlane.xlu1 %1792  ;;  %5718 = vrcp.f32 %v1789_v14 }
 0x4b2   :  { %v5335_v32 = vpop.f32.mrb[76].mxu1  ;;  %5393 = vmatprep.mubr.bf16.mxu0 %v2060_v9  ;;  %v5709_v40 = vpop.eup %5708  ;;  %5720 = vrcp.f32 %v1785_v21 }
 0x4b3   :  { %v1880_v12 = vpop.f32.mrb[77].mxu1  ;;  %5394 = vmatmul.mubr.bf16.gmra.mrb[72].mxu0 %v2061_v34  ;;  %v2038_v29 = vmul.f32 %v5693_v63, %v5335_v32  ;;  %v1791_v44 = vpop.xlane.xlu0 %1790 }
 0x4b4   :  { %v5336_v46 = vpop.f32.mrb[78].mxu1  ;;  %v2036_v37 = vmul.f32 %v5691_v48, %v1880_v12  ;;  %v5711_v35 = vpop.eup %5710  ;;  %5722 = vrcp.f32 %v1791_v44  ;;  %v5495_v44 = vld [vmem:[#allocation11 + $0xc] ss:$16 sps:$4 sm:$0xff]  }
 0x4b5   :  { %v2039_v51 = vmul.f32 %v5695_v58, %v5336_v46  ;;  %v1883_v50 = vpop.f32.mrb[79].mxu1  ;;  %v5713_v54 = vpop.eup %5712  ;;  %3253 = vmatprep.subr.bf16.mxu0 %v5495_v44  ;;  %v5514_v44 = vld [vmem:[#allocation11 + $0x80] ss:$16 sps:$4 sm:$0xff]  }
 0x4b6   :  { %v2037_v57 = vmul.f32 %v5697_v62, %v1883_v50  ;;  %v1797_v3 = vpop.xlane.xlu1 %1796  ;;  %v5715_v9 = vpop.eup %5714 }
 0x4b7   :  { %v2063_v17 = vpack.c.bf16 %v2039_v51, %v2038_v29  ;;  %v1795_v11 = vpop.xlane.xlu0 %1794 }
 0x4b8   :  { %v2062_v4 = vpack.c.bf16 %v2037_v57, %v2036_v37  ;;  %5724 = vrcp.f32 %v1795_v11  ;;  %v5925_v11 = vld [vmem:[#allocation2 + $0x18] sm:$0xff] }
 0x4b9   :  { %5726 = vrcp.f32 %v1797_v3 }
 0x4ba   :  { %5397 = vmatprep.mubr.bf16.mxu0 %v2062_v4  ;;  %v5717_v32 = vpop.eup %5716  ;;  %5728 = vrcp.f32 %v1793_v27 }
 0x4bb   :  { %5398 = vmatmul.mubr.bf16.gmra.mrb[76].mxu0 %v2063_v17  ;;  %v5719_v12 = vpop.eup %5718 }
 0x4bc   :  { %v5721_v46 = vpop.eup %5720 }
 0x4be   :  { %v5723_v4 = vpop.eup %5722 }
 0x4c2   :  { %v5725_v53 = vpop.eup %5724 }
 0x4c3   :  { %v5727_v49 = vpop.eup %5726 }
 0x4c4   :  { %v5729_v24 = vpop.eup %5728 }
 0x4da   :  { %v5355_v19 = vpop.f32.mrb[80].mxu1 }
 0x4db   :  { %v1929_v60 = vpop.f32.mrb[81].mxu1  ;;  %v2042_v15 = vmul.f32 %v5701_v13, %v5355_v19  ;;  %v7293_v13 = vld [vmem:[%s8917_s6] ss:$0 sm:$0xff] }
 0x4dc   :  { %v5356_v31 = vpop.f32.mrb[82].mxu1  ;;  %v2040_v22 = vmul.f32 %v5699_v43, %v1929_v60 }
 0x4dd   :  { %v2043_v41 = vmul.f32 %v5703_v2, %v5356_v31  ;;  %v1932_v18 = vpop.f32.mrb[83].mxu1 }
 0x4de   :  { %v2041_v16 = vmul.f32 %v5705_v26, %v1932_v18 }
 0x4df   :  { %v2065_v33 = vpack.c.bf16 %v2043_v41, %v2042_v15  ;;  %v5922_v15 = vld [vmem:[#allocation2] sm:$0xff] }
 0x4e0   :  { %v2064_v47 = vpack.c.bf16 %v2041_v16, %v2040_v22  ;;  %v5490_v22 = vld [vmem:[#allocation11] ss:$16 sps:$4 sm:$0xff]   ;;  %v5492_v16 = vld [vmem:[#allocation11 + $0x4] ss:$16 sps:$4 sm:$0xff]  }
 0x4e1   :  { %3060 = vmatprep.subr.bf16.mxu1 %v5492_v16  ;;  %v5516_v16 = vld [vmem:[#allocation11 + $0x84] ss:$16 sps:$4 sm:$0xff]  }
 0x4e2   :  { %v5359_v7 = vpop.f32.mrb[84].mxu1  ;;  %5401 = vmatprep.mubr.bf16.mxu0 %v2064_v47  ;;  %v5923_v47 = vld [vmem:[#allocation2 + $0x8] sm:$0xff]  ;;  %3061 = vmatpush1.bf16.msra.mxu1 %v5490_v22 }
 0x4e3   :  { %v1945_v10 = vpop.f32.mrb[85].mxu1  ;;  %5402 = vmatmul.mubr.bf16.gmra.mrb[80].mxu0 %v2065_v33  ;;  %v2046_v1 = vmul.f32 %v5709_v40, %v5359_v7  ;;  %v5493_v33 = vld [vmem:[#allocation11 + $0x8] ss:$16 sps:$4 sm:$0xff]  }
 0x4e4   :  { %v5360_v0 = vpop.f32.mrb[86].mxu1  ;;  %v2044_v59 = vmul.f32 %v5707_v36, %v1945_v10  ;;  %3254 = vmatpush1.bf16.msra.mxu0 %v5493_v33  ;;  %v5519_v33 = vld [vmem:[#allocation11 + $0x8c] ss:$16 sps:$4 sm:$0xff]  }
 0x4e5   :  { %v2047_v45 = vmul.f32 %v5711_v35, %v5360_v0  ;;  %v1948_v38 = vpop.f32.mrb[87].mxu1 }
 0x4e6   :  { %v2045_v20 = vmul.f32 %v5713_v54, %v1948_v38 }
 0x4e7   :  { %v2067_v56 = vpack.c.bf16 %v2047_v45, %v2046_v1  ;;  %v5924_v45 = vld [vmem:[#allocation2 + $0x10] sm:$0xff] }
 0x4e8   :  { %v2066_v34 = vpack.c.bf16 %v2045_v20, %v2044_v59 }
 0x4ea   :  { %v5363_v48 = vpop.f32.mrb[88].mxu1  ;;  %5405 = vmatprep.mubr.bf16.mxu0 %v2066_v34 }
 0x4eb   :  { %v1961_v63 = vpop.f32.mrb[89].mxu1  ;;  %5406 = vmatmul.mubr.bf16.gmra.mrb[84].mxu0 %v2067_v56  ;;  %v2050_v62 = vmul.f32 %v5717_v32, %v5363_v48 }
 0x4ec   :  { %v5364_v58 = vpop.f32.mrb[90].mxu1  ;;  %v2048_v50 = vmul.f32 %v5715_v9, %v1961_v63 }
 0x4ed   :  { %v2051_v29 = vmul.f32 %v5719_v12, %v5364_v58  ;;  %v1964_v51 = vpop.f32.mrb[91].mxu1  ;;  %v5926_v12 = vld [vmem:[#allocation2 + $0x20] sm:$0xff] }
 0x4ee   :  { %v2049_v37 = vmul.f32 %v5721_v46, %v1964_v51  ;;  %v5927_v46 = vld [vmem:[#allocation2 + $0x28] sm:$0xff]  ;;  %v5501_v51 = vld [vmem:[#allocation11 + $0x2c] ss:$16 sps:$4 sm:$0xff]  }
 0x4ef   :  { %v2069_v57 = vpack.c.bf16 %v2051_v29, %v2050_v62  ;;  %v5498_v29 = vld [vmem:[#allocation11 + $0x24] ss:$16 sps:$4 sm:$0xff]   ;;  %3255 = vmatprep.subr.bf16.mxu0 %v5501_v51  ;;  %v5537_v51 = vld [vmem:[#allocation11 + $0xec] ss:$16 sps:$4 sm:$0xff]  }
 0x4f0   :  { %v2068_v17 = vpack.c.bf16 %v2049_v37, %v2048_v50  ;;  %v5496_v50 = vld [vmem:[#allocation11 + $0x20] ss:$16 sps:$4 sm:$0xff]   ;;  %v5499_v37 = vld [vmem:[#allocation11 + $0x28] ss:$16 sps:$4 sm:$0xff]   ;;  %3062 = vmatprep.subr.bf16.mxu1 %v5498_v29 }
 0x4f1   :  { %3063 = vmatpush1.bf16.msra.mxu1 %v5496_v50  ;;  %3256 = vmatpush1.bf16.msra.mxu0 %v5499_v37  ;;  %v5532_v50 = vld [vmem:[#allocation11 + $0xe0] ss:$16 sps:$4 sm:$0xff]   ;;  %v5535_v37 = vld [vmem:[#allocation11 + $0xe8] ss:$16 sps:$4 sm:$0xff]  }
 0x4f2   :  { %v5367_v6 = vpop.f32.mrb[92].mxu1  ;;  %5409 = vmatprep.mubr.bf16.mxu0 %v2068_v17 }
 0x4f3   :  { %v1977_v5 = vpop.f32.mrb[93].mxu1  ;;  %5410 = vmatmul.mubr.bf16.gmra.mrb[88].mxu0 %v2069_v57  ;;  %v2054_v55 = vmul.f32 %v5725_v53, %v5367_v6 }
 0x4f4   :  { %v5368_v23 = vpop.f32.mrb[94].mxu1  ;;  %v2052_v21 = vmul.f32 %v5723_v4, %v1977_v5 }
 0x4f5   :  { %v2055_v52 = vmul.f32 %v5727_v49, %v5368_v23  ;;  %v1980_v30 = vpop.f32.mrb[95].mxu1  ;;  %v5504_v23 = vld [vmem:[#allocation11 + $0x44] ss:$16 sps:$4 sm:$0xff]  }
 0x4f6   :  { %v2053_v43 = vmul.f32 %v5729_v24, %v1980_v30  ;;  %v5507_v24 = vld [vmem:[#allocation11 + $0x4c] ss:$16 sps:$4 sm:$0xff]   ;;  %v5505_v30 = vld [vmem:[#allocation11 + $0x48] ss:$16 sps:$4 sm:$0xff]   ;;  %3064 = vmatprep.subr.bf16.mxu1 %v5504_v23 }
 0x4f7   :  { %v2071_v61 = vpack.c.bf16 %v2055_v52, %v2054_v55  ;;  %v5502_v52 = vld [vmem:[#allocation11 + $0x40] ss:$16 sps:$4 sm:$0xff]   ;;  %3257 = vmatprep.subr.bf16.mxu0 %v5507_v24 }
 0x4f8   :  { %v2070_v19 = vpack.c.bf16 %v2053_v43, %v2052_v21  ;;  %v5928_v21 = vld [vmem:[#allocation2 + $0x30] sm:$0xff]  ;;  %3065 = vmatpush1.bf16.msra.mxu1 %v5502_v52  ;;  %3258 = vmatpush1.bf16.msra.mxu0 %v5505_v30  ;;  %v5934_v23 = vld [vmem:[#allocation2 + $0x60] sm:$0xff] }
 0x4fa   :  { %5413 = vmatprep.mubr.bf16.mxu0 %v2070_v19 }
 0x4fb   :  { %5414 = vmatmul.mubr.bf16.gmra.mrb[92].mxu0 %v2071_v61  ;;  %v5929_v61 = vld [vmem:[#allocation2 + $0x38] sm:$0xff] }
 0x4fc   :  { %3285 = vmatprep.mubr.bf16.mxu0 %v6155_v42 }
 0x576   :  { %v5387_v14 = vpop.f32.mrb[64].mxu0 }
 0x577   :  { %v2177_v60 = vpop.f32.mrb[65].mxu0  ;;  %v2186_v36 = vadd.f32 %v5387_v14, %v7293_v13  ;;  %v5510_v14 = vld [vmem:[#allocation11 + $0x64] ss:$16 sps:$4 sm:$0xff]  }
 0x578   :  { %v2178_v2 = vadd.f32 %v7293_v13, %v2177_v60  ;;  %v5388_v31 = vpop.f32.mrb[66].mxu0  ;;  %v5513_v60 = vld [vmem:[#allocation11 + $0x6c] ss:$16 sps:$4 sm:$0xff]   ;;  %3066 = vmatprep.subr.bf16.mxu1 %v5510_v14 }
 0x579   :  { %v2180_v26 = vpop.f32.mrb[67].mxu0  ;;  %v2189_v35 = vadd.f32 %v5388_v31, %v7293_v13  ;;  %v7309_v38 = vadd.f32 %v5924_v45, %v2186_v36  ;;  %v5511_v31 = vld [vmem:[#allocation11 + $0x68] ss:$16 sps:$4 sm:$0xff]   ;;  %3259 = vmatprep.subr.bf16.mxu0 %v5513_v60  ;;  %v5930_v36 = vld [vmem:[#allocation2 + $0x40] sm:$0xff]  ;;  %v5936_v14 = vld [vmem:[#allocation2 + $0x70] sm:$0xff] }
 0x57a   :  { %v7296_v41 = vadd.f32 %v5922_v15, %v2178_v2  ;;  %v2181_v18 = vadd.f32 %v7293_v13, %v2180_v26  ;;  %v5508_v2 = vld [vmem:[#allocation11 + $0x60] ss:$16 sps:$4 sm:$0xff]   ;;  %3260 = vmatpush1.bf16.msra.mxu0 %v5511_v31 }
 0x57b   :  { %8990 = vst [vmem:[#allocation22_spill] sm:$0xff] %v7309_v38  ;;  %v7311_v59 = vadd.f32 %v5925_v11, %v2189_v35  ;;  %v2436_v56 = vmul.f32 %v7309_v38, %v7309_v38  ;;  %3067 = vmatpush1.bf16.msra.mxu1 %v5508_v2  ;;  %3261 = vmatprep.subr.bf16.mxu0 %v5519_v33  ;;  %v5522_v35 = vld [vmem:[#allocation11 + $0xa4] ss:$16 sps:$4 sm:$0xff]   ;;  %v5938_v33 = vld [vmem:[#allocation2 + $0x80] sm:$0xff] }
 0x57c   :  { %8988 = vst [vmem:[#allocation20_spill] sm:$0xff] %v7296_v41  ;;  %v7299_v27 = vadd.f32 %v5923_v47, %v2181_v18  ;;  %2338 = vadd.xlane.f32.xlu0 %v7296_v41  ;;  %v2434_v40 = vmul.f32 %v7296_v41, %v7296_v41  ;;  %v5517_v47 = vld [vmem:[#allocation11 + $0x88] ss:$16 sps:$4 sm:$0xff]   ;;  %3068 = vmatprep.subr.bf16.mxu1 %v5516_v16 }
 0x57d   :  { %8991 = vst [vmem:[#allocation23_spill] sm:$0xff] %v7311_v59  ;;  %v2437_v32 = vmul.f32 %v7311_v59, %v7311_v59  ;;  %v5937_v2 = vld [vmem:[#allocation2 + $0x78] sm:$0xff] }
 0x57e   :  { %8989 = vst [vmem:[#allocation21_spill] sm:$0xff] %v7299_v27  ;;  %2340 = vadd.xlane.f32.xlu1 %v7299_v27  ;;  %v5391_v7 = vpop.f32.mrb[68].mxu0  ;;  %v2435_v54 = vmul.f32 %v7299_v27, %v7299_v27  ;;  %3262 = vmatpush1.bf16.msra.mxu0 %v5517_v47 }
 0x57f   :  { %v2193_v10 = vpop.f32.mrb[69].mxu0  ;;  %v2202_v57 = vadd.f32 %v5391_v7, %v7293_v13  ;;  %3069 = vmatpush1.bf16.msra.mxu1 %v5514_v44 }
 0x580   :  { %2466 = vadd.xlane.f32.xlu0 %v2434_v40  ;;  %v5392_v0 = vpop.f32.mrb[70].mxu0  ;;  %v2194_v20 = vadd.f32 %v7293_v13, %v2193_v10  ;;  %v5931_v40 = vld [vmem:[#allocation2 + $0x48] sm:$0xff]  ;;  %3070 = vmatprep.subr.bf16.mxu1 %v5522_v35 }
 0x581   :  { %v2196_v1 = vpop.f32.mrb[71].mxu0  ;;  %v2205_v53 = vadd.f32 %v5392_v0, %v7293_v13  ;;  %v7345_v43 = vadd.f32 %v5928_v21, %v2202_v57  ;;  %v5525_v0 = vld [vmem:[#allocation11 + $0xac] ss:$16 sps:$4 sm:$0xff]  }
 0x582   :  { %2468 = vadd.xlane.f32.xlu1 %v2435_v54  ;;  %v2197_v9 = vadd.f32 %v7293_v13, %v2196_v1  ;;  %v7325_v58 = vadd.f32 %v5926_v12, %v2194_v20  ;;  %v5520_v54 = vld [vmem:[#allocation11 + $0xa0] ss:$16 sps:$4 sm:$0xff]   ;;  %v5523_v1 = vld [vmem:[#allocation11 + $0xa8] ss:$16 sps:$4 sm:$0xff]   ;;  %3263 = vmatprep.subr.bf16.mxu0 %v5525_v0 }
 0x583   :  { %8994 = vst [vmem:[#allocation26_spill] sm:$0xff] %v7345_v43  ;;  %v7347_v19 = vadd.f32 %v5929_v61, %v2205_v53  ;;  %v2440_v15 = vmul.f32 %v7345_v43, %v7345_v43  ;;  %3071 = vmatpush1.bf16.msra.mxu1 %v5520_v54  ;;  %3264 = vmatpush1.bf16.msra.mxu0 %v5523_v1 }
 0x584   :  { %2342 = vadd.xlane.f32.xlu0 %v7309_v38  ;;  %8992 = vst [vmem:[#allocation24_spill] sm:$0xff] %v7325_v58  ;;  %v7327_v62 = vadd.f32 %v5927_v46, %v2197_v9  ;;  %v2438_v4 = vmul.f32 %v7325_v58, %v7325_v58  ;;  %v5531_v9 = vld [vmem:[#allocation11 + $0xcc] ss:$16 sps:$4 sm:$0xff]   ;;  %v5933_v46 = vld [vmem:[#allocation2 + $0x58] sm:$0xff] }
 0x585   :  { %8995 = vst [vmem:[#allocation27_spill] sm:$0xff] %v7347_v19  ;;  %v2441_v22 = vmul.f32 %v7347_v19, %v7347_v19  ;;  %3265 = vmatprep.subr.bf16.mxu0 %v5531_v9 }
 0x586   :  { %2344 = vadd.xlane.f32.xlu1 %v7311_v59  ;;  %v7316_v3 = vpop.f32.mrb[72].mxu0  ;;  %8993 = vst [vmem:[#allocation25_spill] sm:$0xff] %v7327_v62  ;;  %v2439_v49 = vmul.f32 %v7327_v62, %v7327_v62 }
 0x587   :  { %v2209_v34 = vpop.f32.mrb[73].mxu0  ;;  %v2218_v45 = vadd.f32 %v7316_v3, %v7293_v13  ;;  %v5529_v3 = vld [vmem:[#allocation11 + $0xc8] ss:$16 sps:$4 sm:$0xff]  }
 0x588   :  { %2470 = vadd.xlane.f32.xlu0 %v2436_v56  ;;  %v7321_v48 = vpop.f32.mrb[74].mxu0  ;;  %v2210_v26 = vadd.f32 %v7293_v13, %v2209_v34  ;;  %v5528_v34 = vld [vmem:[#allocation11 + $0xc4] ss:$16 sps:$4 sm:$0xff]   ;;  %3266 = vmatpush1.bf16.msra.mxu0 %v5529_v3 }
 0x589   :  { %v2212_v63 = vpop.f32.mrb[75].mxu0  ;;  %v2221_v20 = vadd.f32 %v7321_v48, %v7293_v13  ;;  %3072 = vmatprep.subr.bf16.mxu1 %v5528_v34  ;;  %v5534_v48 = vld [vmem:[#allocation11 + $0xe4] ss:$16 sps:$4 sm:$0xff]   ;;  %3267 = vmatprep.subr.bf16.mxu0 %v5537_v51  ;;  %v5940_v34 = vld [vmem:[#allocation2 + $0x90] sm:$0xff] }
 0x58a   :  { %2472 = vadd.xlane.f32.xlu1 %v2437_v32  ;;  %v2213_v18 = vadd.f32 %v7293_v13, %v2212_v63  ;;  %v7357_v7 = vadd.f32 %v5930_v36, %v2210_v26  ;;  %v5526_v32 = vld [vmem:[#allocation11 + $0xc0] ss:$16 sps:$4 sm:$0xff]   ;;  %v5939_v36 = vld [vmem:[#allocation2 + $0x88] sm:$0xff] }
 0x58b   :  { %v5932_v63 = vld [vmem:[#allocation2 + $0x50] sm:$0xff]  ;;  %3073 = vmatpush1.bf16.msra.mxu1 %v5526_v32  ;;  %v7373_v29 = vadd.f32 %v5933_v46, %v2221_v20  ;;  %v5941_v32 = vld [vmem:[#allocation2 + $0x98] sm:$0xff] }
 0x58c   :  { %2346 = vadd.xlane.f32.xlu0 %v7325_v58  ;;  %8996 = vst [vmem:[#allocation28_spill] sm:$0xff] %v7357_v7  ;;  %v7359_v10 = vadd.f32 %v5931_v40, %v2213_v18  ;;  %v2442_v11 = vmul.f32 %v7357_v7, %v7357_v7  ;;  %v7371_v12 = vadd.f32 %v5932_v63, %v2218_v45 }
 0x58d   :  { %8999 = vst [vmem:[#allocation31_spill] sm:$0xff] %v7373_v29  ;;  %3074 = vmatprep.subr.bf16.mxu1 %v5534_v48  ;;  %3268 = vmatpush1.bf16.msra.mxu0 %v5535_v37 }
 0x58e   :  { %2348 = vadd.xlane.f32.xlu1 %v7327_v62  ;;  %v7332_v17 = vpop.f32.mrb[76].mxu0  ;;  %8997 = vst [vmem:[#allocation29_spill] sm:$0xff] %v7359_v10  ;;  %v2443_v56 = vmul.f32 %v7359_v10, %v7359_v10  ;;  %8998 = vst [vmem:[#allocation30_spill] sm:$0xff] %v7371_v12 }
 0x58f   :  { %v7336_v6 = vpop.f32.mrb[77].mxu0  ;;  %3075 = vmatpush1.bf16.msra.mxu1 %v5532_v50  ;;  %v2234_v30 = vadd.f32 %v7332_v17, %v7293_v13 }
 0x590   :  { %2474 = vadd.xlane.f32.xlu0 %v2438_v4  ;;  %v7339_v5 = vpop.f32.mrb[78].mxu0  ;;  %v2226_v57 = vadd.f32 %v7293_v13, %v7336_v6  ;;  %v2444_v4 = vmul.f32 %v7371_v12, %v7371_v12  ;;  %v5935_v6 = vld [vmem:[#allocation2 + $0x68] sm:$0xff] }
 0x591   :  { %v7343_v55 = vpop.f32.mrb[79].mxu0  ;;  %v2237_v21 = vadd.f32 %v7339_v5, %v7293_v13  ;;  %v7399_v60 = vadd.f32 %v5936_v14, %v2234_v30 }
 0x592   :  { %2476 = vadd.xlane.f32.xlu1 %v2439_v49  ;;  %v2229_v53 = vadd.f32 %v7293_v13, %v7343_v55  ;;  %v2445_v49 = vmul.f32 %v7373_v29, %v7373_v29  ;;  %v7385_v24 = vadd.f32 %v5934_v23, %v2226_v57  ;;  %v5943_v23 = vld [vmem:[#allocation2 + $0xa8] sm:$0xff] }
 0x593   :  { %9002 = vst [vmem:[#allocation34_spill] sm:$0xff] %v7399_v60  ;;  %v7401_v31 = vadd.f32 %v5937_v2, %v2237_v21  ;;  %v2448_v26 = vmul.f32 %v7399_v60, %v7399_v60 }
 0x594   :  { %2350 = vadd.xlane.f32.xlu0 %v7345_v43  ;;  %9000 = vst [vmem:[#allocation32_spill] sm:$0xff] %v7385_v24  ;;  %v7387_v52 = vadd.f32 %v5935_v6, %v2229_v53  ;;  %v2446_v55 = vmul.f32 %v7385_v24, %v7385_v24  ;;  %v5942_v53 = vld [vmem:[#allocation2 + $0xa0] sm:$0xff] }
 0x595   :  { %9003 = vst [vmem:[#allocation35_spill] sm:$0xff] %v7401_v31 }
 0x596   :  { %2352 = vadd.xlane.f32.xlu1 %v7347_v19  ;;  %9001 = vst [vmem:[#allocation33_spill] sm:$0xff] %v7387_v52  ;;  %v2447_v61 = vmul.f32 %v7387_v52, %v7387_v52 }
 0x598   :  { %2478 = vadd.xlane.f32.xlu0 %v2440_v15 }
 0x59a   :  { %2480 = vadd.xlane.f32.xlu1 %v2441_v22  ;;  %v2449_v22 = vmul.f32 %v7401_v31, %v7401_v31 }
 0x59c   :  { %2354 = vadd.xlane.f32.xlu0 %v7357_v7 }
 0x59e   :  { %2356 = vadd.xlane.f32.xlu1 %v7359_v10 }
 0x5a0   :  { %2482 = vadd.xlane.f32.xlu0 %v2442_v11 }
 0x5a2   :  { %2484 = vadd.xlane.f32.xlu1 %v2443_v56 }
 0x5a4   :  { %2358 = vadd.xlane.f32.xlu0 %v7371_v12 }
 0x5a6   :  { %2360 = vadd.xlane.f32.xlu1 %v7373_v29 }
 0x5a8   :  { %2486 = vadd.xlane.f32.xlu0 %v2444_v4 }
 0x5aa   :  { %2488 = vadd.xlane.f32.xlu1 %v2445_v49 }
 0x5ac   :  { %2362 = vadd.xlane.f32.xlu0 %v7385_v24 }
 0x5ae   :  { %2364 = vadd.xlane.f32.xlu1 %v7387_v52 }
 0x5b0   :  { %2490 = vadd.xlane.f32.xlu0 %v2446_v55 }
 0x5b2   :  { %2492 = vadd.xlane.f32.xlu1 %v2447_v61 }
 0x5b4   :  { %2366 = vadd.xlane.f32.xlu0 %v7399_v60 }
 0x5b6   :  { %2368 = vadd.xlane.f32.xlu1 %v7401_v31  ;;  %v5403_v17 = vpop.f32.mrb[80].mxu0 }
 0x5b7   :  { %v2241_v5 = vpop.f32.mrb[81].mxu0  ;;  %v2250_v35 = vadd.f32 %v5403_v17, %v7293_v13 }
 0x5b8   :  { %v2242_v15 = vadd.f32 %v7293_v13, %v2241_v5  ;;  %2494 = vadd.xlane.f32.xlu0 %v2448_v26  ;;  %v5404_v18 = vpop.f32.mrb[82].mxu0  ;;  %v5944_v5 = vld [vmem:[#allocation2 + $0xb0] sm:$0xff] }
 0x5b9   :  { %v2244_v16 = vpop.f32.mrb[83].mxu0  ;;  %v2253_v45 = vadd.f32 %v5404_v18, %v7293_v13  ;;  %v7423_v9 = vadd.f32 %v5940_v34, %v2250_v35  ;;  %v5945_v18 = vld [vmem:[#allocation2 + $0xb8] sm:$0xff]  ;;  %v5946_v35 = vld [vmem:[#allocation2 + $0xc0] sm:$0xff]  ;;  %v5948_v34 = vld [vmem:[#allocation2 + $0xd0] sm:$0xff] }
 0x5ba   :  { %v7410_v44 = vadd.f32 %v5938_v33, %v2242_v15  ;;  %v2245_v47 = vadd.f32 %v7293_v13, %v2244_v16  ;;  %2496 = vadd.xlane.f32.xlu1 %v2449_v22 }
 0x5bb   :  { %9006 = vst [vmem:[#allocation38_spill] sm:$0xff] %v7423_v9  ;;  %v7425_v3 = vadd.f32 %v5941_v32, %v2253_v45  ;;  %v2452_v48 = vmul.f32 %v7423_v9, %v7423_v9 }
 0x5bc   :  { %9004 = vst [vmem:[#allocation36_spill] sm:$0xff] %v7410_v44  ;;  %v7413_v40 = vadd.f32 %v5939_v36, %v2245_v47  ;;  %2370 = vadd.xlane.f32.xlu0 %v7410_v44  ;;  %v2450_v54 = vmul.f32 %v7410_v44, %v7410_v44 }
 0x5bd   :  { %9007 = vst [vmem:[#allocation39_spill] sm:$0xff] %v7425_v3  ;;  %v2453_v57 = vmul.f32 %v7425_v3, %v7425_v3 }
 0x5be   :  { %9005 = vst [vmem:[#allocation37_spill] sm:$0xff] %v7413_v40  ;;  %2372 = vadd.xlane.f32.xlu1 %v7413_v40  ;;  %v5407_v0 = vpop.f32.mrb[84].mxu0  ;;  %v2451_v20 = vmul.f32 %v7413_v40, %v7413_v40 }
 0x5bf   :  { %v2257_v1 = vpop.f32.mrb[85].mxu0  ;;  %v2266_v30 = vadd.f32 %v5407_v0, %v7293_v13 }
 0x5c0   :  { %2498 = vadd.xlane.f32.xlu0 %v2450_v54  ;;  %v5408_v11 = vpop.f32.mrb[86].mxu0  ;;  %v2258_v63 = vadd.f32 %v7293_v13, %v2257_v1  ;;  %v5947_v54 = vld [vmem:[#allocation2 + $0xc8] sm:$0xff] }
 0x5c1   :  { %v2260_v56 = vpop.f32.mrb[87].mxu0  ;;  %v2269_v14 = vadd.f32 %v5408_v11, %v7293_v13  ;;  %v7447_v15 = vadd.f32 %v5944_v5, %v2266_v30  ;;  %v5953_v5 = vld [vmem:[#allocation2 + $0xf8] sm:$0xff] }
 0x5c2   :  { %2500 = vadd.xlane.f32.xlu1 %v2451_v20  ;;  %v2261_v50 = vadd.f32 %v7293_v13, %v2260_v56  ;;  %v7435_v49 = vadd.f32 %v5942_v53, %v2258_v63  ;;  %v5949_v63 = vld [vmem:[#allocation2 + $0xd8] sm:$0xff]  ;;  %v5951_v53 = vld [vmem:[#allocation2 + $0xe8] sm:$0xff] }
 0x5c3   :  { %9010 = vst [vmem:[#allocation42_spill] sm:$0xff] %v7447_v15  ;;  %v7449_v22 = vadd.f32 %v5945_v18, %v2269_v14  ;;  %v2456_v33 = vmul.f32 %v7447_v15, %v7447_v15 }
 0x5c4   :  { %2374 = vadd.xlane.f32.xlu0 %v7423_v9  ;;  %9008 = vst [vmem:[#allocation40_spill] sm:$0xff] %v7435_v49  ;;  %v7437_v6 = vadd.f32 %v5943_v23, %v2261_v50  ;;  %v2454_v21 = vmul.f32 %v7435_v49, %v7435_v49 }
 0x5c5   :  { %9011 = vst [vmem:[#allocation43_spill] sm:$0xff] %v7449_v22  ;;  %v2457_v36 = vmul.f32 %v7449_v22, %v7449_v22 }
 0x5c6   :  { %2376 = vadd.xlane.f32.xlu1 %v7425_v3  ;;  %v5411_v46 = vpop.f32.mrb[88].mxu0  ;;  %9009 = vst [vmem:[#allocation41_spill] sm:$0xff] %v7437_v6  ;;  %v2455_v17 = vmul.f32 %v7437_v6, %v7437_v6 }
 0x5c7   :  { %v2273_v51 = vpop.f32.mrb[89].mxu0  ;;  %v2282_v45 = vadd.f32 %v5411_v46, %v7293_v13 }
 0x5c8   :  { %2502 = vadd.xlane.f32.xlu0 %v2452_v48  ;;  %v5412_v37 = vpop.f32.mrb[90].mxu0  ;;  %v2274_v16 = vadd.f32 %v7293_v13, %v2273_v51 }
 0x5c9   :  { %v2276_v4 = vpop.f32.mrb[91].mxu0  ;;  %v2285_v20 = vadd.f32 %v5412_v37, %v7293_v13  ;;  %v7471_v32 = vadd.f32 %v5948_v34, %v2282_v45 }
 0x5ca   :  { %2504 = vadd.xlane.f32.xlu1 %v2453_v57  ;;  %v2277_v47 = vadd.f32 %v7293_v13, %v2276_v4  ;;  %v7459_v0 = vadd.f32 %v5946_v35, %v2274_v16  ;;  %v5950_v57 = vld [vmem:[#allocation2 + $0xe0] sm:$0xff] }
 0x5cb   :  { %9014 = vst [vmem:[#allocation46_spill] sm:$0xff] %v7471_v32  ;;  %v7473_v48 = vadd.f32 %v5949_v63, %v2285_v20  ;;  %v2460_v51 = vmul.f32 %v7471_v32, %v7471_v32 }
 0x5cc   :  { %2378 = vadd.xlane.f32.xlu0 %v7435_v49  ;;  %9012 = vst [vmem:[#allocation44_spill] sm:$0xff] %v7459_v0  ;;  %v7461_v1 = vadd.f32 %v5947_v54, %v2277_v47  ;;  %v2458_v11 = vmul.f32 %v7459_v0, %v7459_v0 }
 0x5cd   :  { %9015 = vst [vmem:[#allocation47_spill] sm:$0xff] %v7473_v48  ;;  %v2461_v37 = vmul.f32 %v7473_v48, %v7473_v48 }
 0x5ce   :  { %2380 = vadd.xlane.f32.xlu1 %v7437_v6  ;;  %v5415_v55 = vpop.f32.mrb[92].mxu0  ;;  %9013 = vst [vmem:[#allocation45_spill] sm:$0xff] %v7461_v1  ;;  %v2459_v56 = vmul.f32 %v7461_v1, %v7461_v1 }
 0x5cf   :  { %v2289_v61 = vpop.f32.mrb[93].mxu0  ;;  %v2298_v30 = vadd.f32 %v5415_v55, %v7293_v13 }
 0x5d0   :  { %2506 = vadd.xlane.f32.xlu0 %v2454_v21  ;;  %v5416_v2 = vpop.f32.mrb[94].mxu0  ;;  %v2290_v46 = vadd.f32 %v7293_v13, %v2289_v61 }
 0x5d1   :  { %v2292_v26 = vpop.f32.mrb[95].mxu0  ;;  %v2301_v61 = vadd.f32 %v5416_v2, %v7293_v13 }
 0x5d2   :  { %2508 = vadd.xlane.f32.xlu1 %v2455_v17  ;;  %v2293_v50 = vadd.f32 %v7293_v13, %v2292_v26  ;;  %v7483_v4 = vadd.f32 %v5950_v57, %v2290_v46  ;;  %v5952_v17 = vld [vmem:[#allocation2 + $0xf0] sm:$0xff] }
 0x5d3   :  { %v7495_v26 = vadd.f32 %v5952_v17, %v2298_v30  ;;  %v7497_v18 = vadd.f32 %v5953_v5, %v2301_v61 }
 0x5d4   :  { %2382 = vadd.xlane.f32.xlu0 %v7447_v15  ;;  %9016 = vst [vmem:[#allocation48_spill] sm:$0xff] %v7483_v4  ;;  %v7485_v23 = vadd.f32 %v5951_v53, %v2293_v50  ;;  %v2462_v21 = vmul.f32 %v7483_v4, %v7483_v4 }
 0x5d5   :  { %9018 = vst [vmem:[#allocation50_spill] sm:$0xff] %v7495_v26  ;;  %9019 = vst [vmem:[#allocation51_spill] sm:$0xff] %v7497_v18  ;;  %v2464_v55 = vmul.f32 %v7495_v26, %v7495_v26  ;;  %v2465_v13 = vmul.f32 %v7497_v18, %v7497_v18 }
 0x5d6   :  { %2384 = vadd.xlane.f32.xlu1 %v7449_v22  ;;  %9017 = vst [vmem:[#allocation49_spill] sm:$0xff] %v7485_v23  ;;  %v2463_v14 = vmul.f32 %v7485_v23, %v7485_v23 }
 0x5d8   :  { %2510 = vadd.xlane.f32.xlu0 %v2456_v33 }
 0x5da   :  { %2512 = vadd.xlane.f32.xlu1 %v2457_v36 }
 0x5dc   :  { %2386 = vadd.xlane.f32.xlu0 %v7459_v0 }
 0x5de   :  { %2388 = vadd.xlane.f32.xlu1 %v7461_v1 }
 0x5e0   :  { %2514 = vadd.xlane.f32.xlu0 %v2458_v11 }
 0x5e2   :  { %2516 = vadd.xlane.f32.xlu1 %v2459_v56 }
 0x5e4   :  { %2390 = vadd.xlane.f32.xlu0 %v7471_v32 }
 0x5e6   :  { %2392 = vadd.xlane.f32.xlu1 %v7473_v48 }
 0x5e8   :  { %2518 = vadd.xlane.f32.xlu0 %v2460_v51 }
 0x5ea   :  { %2520 = vadd.xlane.f32.xlu1 %v2461_v37 }
 0x5ec   :  { %2394 = vadd.xlane.f32.xlu0 %v7483_v4 }
 0x5ee   :  { %2396 = vadd.xlane.f32.xlu1 %v7485_v23 }
 0x5f0   :  { %2522 = vadd.xlane.f32.xlu0 %v2462_v21 }
 0x5f2   :  { %2524 = vadd.xlane.f32.xlu1 %v2463_v14 }
 0x5f4   :  { %2398 = vadd.xlane.f32.xlu0 %v7495_v26 }
 0x5f6   :  { %2400 = vadd.xlane.f32.xlu1 %v7497_v18 }
 0x5f8   :  { %2526 = vadd.xlane.f32.xlu0 %v2464_v55 }
 0x5fa   :  { %2528 = vadd.xlane.f32.xlu1 %v2465_v13 }
 0x609   :  { %v2339_v2 = vpop.xlane.xlu0 %2338 }
 0x60a   :  { %v2402_v16 = vmul.f32 0.0078125, %v2339_v2 }
 0x60b   :  { %v2341_v33 = vpop.xlane.xlu1 %2340 }
 0x60c   :  { %v2403_v47 = vmul.f32 0.0078125, %v2341_v33  ;;  %v2562_v35 = vmul.f32 %v2402_v16, %v2402_v16 }
 0x60d   :  { %v2467_v36 = vpop.xlane.xlu0 %2466 }
 0x60e   :  { %v2530_v54 = vmul.f32 0.0078125, %v2467_v36  ;;  %v2563_v11 = vmul.f32 %v2403_v47, %v2403_v47 }
 0x60f   :  { %v2469_v45 = vpop.xlane.xlu1 %2468 }
 0x610   :  { %v2594_v20 = vsub.f32 %v2530_v54, %v2562_v35  ;;  %v2531_v56 = vmul.f32 0.0078125, %v2469_v45  ;;  %v2626_v54 = vsub.f32 %v7296_v41, %v2402_v16 }
 0x611   :  { %v2343_v34 = vpop.xlane.xlu0 %2342 }
 0x612   :  { %v2658_v63 = vadd.f32 1e-05, %v2594_v20  ;;  %v2595_v46 = vsub.f32 %v2531_v56, %v2563_v11  ;;  %v7505_v51 = vmul.f32 0.0078125, %v2343_v34 }
 0x613   :  { %v2345_v50 = vpop.xlane.xlu1 %2344 }
 0x614   :  { %5730 = vrsqrt.f32 %v2658_v63  ;;  %v2659_v37 = vadd.f32 1e-05, %v2595_v46  ;;  %v7507_v57 = vmul.f32 0.0078125, %v2345_v50  ;;  %v2564_v30 = vmul.f32 %v7505_v51, %v7505_v51  ;;  %v7523_v63 = vld [vmem:[%s8918_s7] ss:$0 sm:$0xff] }
 0x615   :  { %v2471_v53 = vpop.xlane.xlu0 %2470  ;;  %v2627_v46 = vsub.f32 %v7299_v27, %v2403_v47  ;;  %v7534_v47 = vld [vmem:[%s8919_s8] ss:$0 sm:$0xff] }
 0x616   :  { %5732 = vrsqrt.f32 %v2659_v37  ;;  %v2532_v21 = vmul.f32 0.0078125, %v2471_v53  ;;  %v2565_v14 = vmul.f32 %v7507_v57, %v7507_v57 }
 0x617   :  { %v2473_v61 = vpop.xlane.xlu1 %2472 }
 0x618   :  { %v2596_v17 = vsub.f32 %v2532_v21, %v2564_v30  ;;  %v2533_v5 = vmul.f32 0.0078125, %v2473_v61 }
 0x619   :  { %v2347_v55 = vpop.xlane.xlu0 %2346 }
 0x61a   :  { %v2660_v13 = vadd.f32 1e-05, %v2596_v17  ;;  %v2597_v2 = vsub.f32 %v2533_v5, %v2565_v14  ;;  %v7513_v33 = vmul.f32 0.0078125, %v2347_v55  ;;  %v5538_v5 = vld [vmem:[#allocation13 + $0x40] sm:$0xff]  }
 0x61b   :  { %v2349_v36 = vpop.xlane.xlu1 %2348  ;;  %v5540_v55 = vld [vmem:[#allocation13 + $0xc0] sm:$0xff]   ;;  %4969 = vmatprep.subr.bf16.mxu1 %v5538_v5 }
 0x61c   :  { %5734 = vrsqrt.f32 %v2660_v13  ;;  %v2661_v35 = vadd.f32 1e-05, %v2597_v2  ;;  %v7516_v45 = vmul.f32 0.0078125, %v2349_v36  ;;  %v2566_v56 = vmul.f32 %v7513_v33, %v7513_v33  ;;  %5081 = vmatprep.subr.bf16.mxu0 %v5540_v55  ;;  %v5541_v5 = vld [vmem:[#allocation13 + $0x80] sm:$0xff]  }
 0x61d   :  { %v2475_v11 = vpop.xlane.xlu0 %2474 }
 0x61e   :  { %v5731_v20 = vpop.eup %5730  ;;  %5736 = vrsqrt.f32 %v2661_v35  ;;  %v2534_v34 = vmul.f32 0.0078125, %v2475_v11  ;;  %v2567_v16 = vmul.f32 %v7516_v45, %v7516_v45 }
 0x61f   :  { %v2722_v50 = vmul.f32 %v5731_v20, %v2626_v54  ;;  %v2477_v37 = vpop.xlane.xlu1 %2476  ;;  %v2628_v20 = vsub.f32 %v7309_v38, %v7505_v51  ;;  %v5539_v51 = vld [vmem:[#allocation13] sm:$0xff]  }
 0x620   :  { %v5733_v53 = vpop.eup %5732  ;;  %v2598_v30 = vsub.f32 %v2534_v34, %v2566_v56  ;;  %v2535_v21 = vmul.f32 0.0078125, %v2477_v37 }
 0x621   :  { %v2723_v61 = vmul.f32 %v5733_v53, %v2627_v46  ;;  %v2351_v14 = vpop.xlane.xlu0 %2350  ;;  %v2760_v17 = vmul.f32 %v7523_v63, %v2722_v50 }
 0x622   :  { %v2662_v13 = vadd.f32 1e-05, %v2598_v30  ;;  %v2599_v2 = vsub.f32 %v2535_v21, %v2567_v16  ;;  %v7529_v36 = vmul.f32 0.0078125, %v2351_v14  ;;  %v2629_v30 = vsub.f32 %v7311_v59, %v7507_v57 }
 0x623   :  { %v2353_v35 = vpop.xlane.xlu1 %2352  ;;  %v2761_v54 = vmul.f32 %v7523_v63, %v2723_v61  ;;  %v2798_v46 = vadd.f32 %v7534_v47, %v2760_v17 }
 0x624   :  { %5738 = vrsqrt.f32 %v2662_v13  ;;  %v2663_v11 = vadd.f32 1e-05, %v2599_v2  ;;  %v7539_v56 = vmul.f32 0.0078125, %v2353_v35  ;;  %v2568_v53 = vmul.f32 %v7529_v36, %v7529_v36  ;;  %v5542_v35 = vld [vmem:[#allocation13 + $0x48] sm:$0xff]  }
 0x625   :  { %v2479_v34 = vpop.xlane.xlu0 %2478  ;;  %v2799_v50 = vadd.f32 %v7534_v47, %v2761_v54  ;;  %v5544_v54 = vld [vmem:[#allocation13 + $0xc8] sm:$0xff]  }
 0x626   :  { %v5735_v37 = vpop.eup %5734  ;;  %5740 = vrsqrt.f32 %v2663_v11  ;;  %v2536_v16 = vmul.f32 0.0078125, %v2479_v34  ;;  %v2569_v17 = vmul.f32 %v7539_v56, %v7539_v56 }
 0x627   :  { %v2481_v21 = vpop.xlane.xlu1 %2480  ;;  %v2830_v61 = vpack.c.bf16 %v2799_v50, %v2798_v46  ;;  %v2724_v14 = vmul.f32 %v5735_v37, %v2628_v20  ;;  %v5543_v37 = vld [vmem:[#allocation13 + $0x8] sm:$0xff]  }
 0x628   :  { %v5737_v55 = vpop.eup %5736  ;;  %v2600_v13 = vsub.f32 %v2536_v16, %v2568_v53  ;;  %v2537_v2 = vmul.f32 0.0078125, %v2481_v21  ;;  %v5545_v16 = vld [vmem:[#allocation13 + $0x88] sm:$0xff]   ;;  %v2630_v21 = vsub.f32 %v7325_v58, %v7513_v33  ;;  %v5547_v33 = vld [vmem:[#allocation13 + $0x10] sm:$0xff]  }
 0x629   :  { %v2355_v11 = vpop.xlane.xlu0 %2354  ;;  %3093 = vmatmul.mubr.bf16.vlgmr.msra.gmra.mrb[96].mxu1 %v2830_v61  ;;  %3286 = vmatmul.mubr.bf16.vlgmr.msra.gmra.mrb[96].mxu0 %v2830_v61  ;;  %v2725_v34 = vmul.f32 %v5737_v55, %v2629_v30  ;;  %v2762_v25 = vmul.f32 %v7523_v63, %v2724_v14  ;;  %v5546_v30 = vld [vmem:[#allocation13 + $0x50] sm:$0xff]  }
 0x62a   :  { %v2664_v57 = vadd.f32 1e-05, %v2600_v13  ;;  %v2601_v28 = vsub.f32 %v2537_v2, %v2569_v17  ;;  %v7550_v46 = vmul.f32 0.0078125, %v2355_v11  ;;  %3102 = vmatprep.mubr.bf16.mxu1 %v6155_v42  ;;  %3295 = vmatprep.mubr.bf16.mxu0 %v6155_v42  ;;  %v5548_v11 = vld [vmem:[#allocation13 + $0xd0] sm:$0xff]  }
 0x62b   :  { %v2357_v20 = vpop.xlane.xlu1 %2356  ;;  %v2763_v50 = vmul.f32 %v7523_v63, %v2725_v34  ;;  %4970 = vmatpush3.bf16.msra.mxu1 %v5539_v51  ;;  %5082 = vmatpush3.bf16.msra.mxu0 %v5541_v5  ;;  %v2800_v55 = vadd.f32 %v7534_v47, %v2762_v25  ;;  %v2631_v5 = vsub.f32 %v7327_v62, %v7516_v45 }
 0x62c   :  { %5742 = vrsqrt.f32 %v2664_v57  ;;  %v2665_v53 = vadd.f32 1e-05, %v2601_v28  ;;  %4971 = vmatprep.subr.bf16.mxu1 %v5542_v35  ;;  %5083 = vmatprep.subr.bf16.mxu0 %v5544_v54  ;;  %v7557_v61 = vmul.f32 0.0078125, %v2357_v20  ;;  %v2570_v51 = vmul.f32 %v7550_v46, %v7550_v46 }
 0x62d   :  { %v2483_v14 = vpop.xlane.xlu0 %2482  ;;  %v2801_v17 = vadd.f32 %v7534_v47, %v2763_v50  ;;  %v5549_v50 = vld [vmem:[#allocation13 + $0x90] sm:$0xff]  }
 0x62e   :  { %v5739_v13 = vpop.eup %5738  ;;  %5744 = vrsqrt.f32 %v2665_v53  ;;  %v2538_v28 = vmul.f32 0.0078125, %v2483_v14  ;;  %v2571_v25 = vmul.f32 %v7557_v61, %v7557_v61  ;;  %v5550_v53 = vld [vmem:[#allocation13 + $0x58] sm:$0xff]  }
 0x62f   :  { %v2485_v2 = vpop.xlane.xlu1 %2484  ;;  %v2831_v35 = vpack.c.bf16 %v2801_v17, %v2800_v55  ;;  %v2726_v54 = vmul.f32 %v5739_v13, %v2630_v21  ;;  %4972 = vmatpush3.bf16.msra.mxu1 %v5543_v37  ;;  %5084 = vmatpush3.bf16.msra.mxu0 %v5545_v16  ;;  %v5552_v21 = vld [vmem:[#allocation13 + $0xd8] sm:$0xff]  }
 0x630   :  { %v5741_v34 = vpop.eup %5740  ;;  %v2602_v57 = vsub.f32 %v2538_v28, %v2570_v51  ;;  %v2539_v20 = vmul.f32 0.0078125, %v2485_v2  ;;  %4973 = vmatprep.subr.bf16.mxu1 %v5546_v30  ;;  %5085 = vmatprep.subr.bf16.mxu0 %v5548_v11  ;;  %v5551_v30 = vld [vmem:[#allocation13 + $0x18] sm:$0xff]   ;;  %v2632_v2 = vsub.f32 %v7345_v43, %v7529_v36 }
 0x631   :  { %v2359_v14 = vpop.xlane.xlu0 %2358  ;;  %3103 = vmatmul.mubr.bf16.gmra.mrb[100].mxu1 %v2831_v35  ;;  %3296 = vmatmul.mubr.bf16.gmra.mrb[100].mxu0 %v2831_v35  ;;  %v2727_v45 = vmul.f32 %v5741_v34, %v2631_v5  ;;  %v2764_v55 = vmul.f32 %v7523_v63, %v2726_v54  ;;  %v5553_v5 = vld [vmem:[#allocation13 + $0x98] sm:$0xff]  }
 0x632   :  { %v2666_v37 = vadd.f32 1e-05, %v2602_v57  ;;  %v2603_v17 = vsub.f32 %v2539_v20, %v2571_v25  ;;  %v7568_v13 = vmul.f32 0.0078125, %v2359_v14  ;;  %3112 = vmatprep.mubr.bf16.mxu1 %v6155_v42  ;;  %3305 = vmatprep.mubr.bf16.mxu0 %v6155_v42  ;;  %v2633_v20 = vsub.f32 %v7347_v19, %v7539_v56 }
 0x633   :  { %v2361_v51 = vpop.xlane.xlu1 %2360  ;;  %v2765_v16 = vmul.f32 %v7523_v63, %v2727_v45  ;;  %4974 = vmatpush3.bf16.msra.mxu1 %v5547_v33  ;;  %5086 = vmatpush3.bf16.msra.mxu0 %v5549_v50  ;;  %v2802_v34 = vadd.f32 %v7534_v47, %v2764_v55 }
 0x634   :  { %5746 = vrsqrt.f32 %v2666_v37  ;;  %v2667_v28 = vadd.f32 1e-05, %v2603_v17  ;;  %4975 = vmatprep.subr.bf16.mxu1 %v5550_v53  ;;  %v7575_v35 = vmul.f32 0.0078125, %v2361_v51  ;;  %5087 = vmatprep.subr.bf16.mxu0 %v5552_v21  ;;  %v2572_v33 = vmul.f32 %v7568_v13, %v7568_v13 }
 0x635   :  { %v2487_v54 = vpop.xlane.xlu0 %2486  ;;  %v2803_v25 = vadd.f32 %v7534_v47, %v2765_v16 }
 0x636   :  { %v5743_v57 = vpop.eup %5742  ;;  %5748 = vrsqrt.f32 %v2667_v28  ;;  %v2540_v11 = vmul.f32 0.0078125, %v2487_v54  ;;  %v2573_v45 = vmul.f32 %v7575_v35, %v7575_v35 }
 0x637   :  { %v2489_v50 = vpop.xlane.xlu1 %2488  ;;  %v2832_v53 = vpack.c.bf16 %v2803_v25, %v2802_v34  ;;  %v2728_v36 = vmul.f32 %v5743_v57, %v2632_v2  ;;  %4976 = vmatpush3.bf16.msra.mxu1 %v5551_v30  ;;  %5088 = vmatpush3.bf16.msra.mxu0 %v5553_v5  ;;  %v2634_v5 = vsub.f32 %v7357_v7, %v7550_v46 }
 0x638   :  { %v5745_v14 = vpop.eup %5744  ;;  %v2604_v55 = vsub.f32 %v2540_v11, %v2572_v33  ;;  %v2541_v37 = vmul.f32 0.0078125, %v2489_v50 }
 0x639   :  { %v2363_v21 = vpop.xlane.xlu0 %2362  ;;  %3113 = vmatmul.mubr.bf16.gmra.mrb[104].mxu1 %v2832_v53  ;;  %3306 = vmatmul.mubr.bf16.gmra.mrb[104].mxu0 %v2832_v53  ;;  %v2729_v17 = vmul.f32 %v5745_v14, %v2633_v20  ;;  %v2766_v51 = vmul.f32 %v7523_v63, %v2728_v36  ;;  %v2635_v53 = vsub.f32 %v7359_v10, %v7557_v61 }
 0x63a   :  { %v2668_v16 = vadd.f32 1e-05, %v2604_v55  ;;  %v2605_v28 = vsub.f32 %v2541_v37, %v2573_v45  ;;  %v7586_v56 = vmul.f32 0.0078125, %v2363_v21  ;;  %3122 = vmatprep.mubr.bf16.mxu1 %v6155_v42  ;;  %3315 = vmatprep.mubr.bf16.mxu0 %v6155_v42 }
 0x63b   :  { %v2365_v30 = vpop.xlane.xlu1 %2364  ;;  %v2767_v2 = vmul.f32 %v7523_v63, %v2729_v17  ;;  %v2804_v57 = vadd.f32 %v7534_v47, %v2766_v51 }
 0x63c   :  { %5750 = vrsqrt.f32 %v2668_v16  ;;  %v2669_v54 = vadd.f32 1e-05, %v2605_v28  ;;  %v7593_v34 = vmul.f32 0.0078125, %v2365_v30  ;;  %v2574_v20 = vmul.f32 %v7586_v56, %v7586_v56 }
 0x63d   :  { %v2491_v25 = vpop.xlane.xlu0 %2490  ;;  %v2805_v33 = vadd.f32 %v7534_v47, %v2767_v2 }
 0x63e   :  { %v5747_v11 = vpop.eup %5746  ;;  %5752 = vrsqrt.f32 %v2669_v54  ;;  %v2542_v50 = vmul.f32 0.0078125, %v2491_v25  ;;  %v2575_v55 = vmul.f32 %v7593_v34, %v7593_v34  ;;  %v2636_v25 = vsub.f32 %v7371_v12, %v7568_v13 }
 0x63f   :  { %v2493_v36 = vpop.xlane.xlu1 %2492  ;;  %v2833_v14 = vpack.c.bf16 %v2805_v33, %v2804_v57  ;;  %v2730_v45 = vmul.f32 %v5747_v11, %v2634_v5 }
 0x640   :  { %v5749_v46 = vpop.eup %5748  ;;  %v2606_v37 = vsub.f32 %v2542_v50, %v2574_v20  ;;  %v2543_v21 = vmul.f32 0.0078125, %v2493_v36 }
 0x641   :  { %v2367_v17 = vpop.xlane.xlu0 %2366  ;;  %3123 = vmatmul.mubr.bf16.gmra.mrb[108].mxu1 %v2833_v14  ;;  %3316 = vmatmul.mubr.bf16.gmra.mrb[108].mxu0 %v2833_v14  ;;  %v2731_v51 = vmul.f32 %v5749_v46, %v2635_v53  ;;  %v2768_v16 = vmul.f32 %v7523_v63, %v2730_v45  ;;  %v2637_v14 = vsub.f32 %v7373_v29, %v7575_v35 }
 0x642   :  { %v2670_v28 = vadd.f32 1e-05, %v2606_v37  ;;  %v2607_v30 = vsub.f32 %v2543_v21, %v2575_v55  ;;  %v7604_v2 = vmul.f32 0.0078125, %v2367_v17  ;;  %3132 = vmatprep.mubr.bf16.mxu1 %v6155_v42  ;;  %3325 = vmatprep.mubr.bf16.mxu0 %v6155_v42 }
 0x643   :  { %v2369_v61 = vpop.xlane.xlu1 %2368  ;;  %v2769_v54 = vmul.f32 %v7523_v63, %v2731_v51  ;;  %v2806_v11 = vadd.f32 %v7534_v47, %v2768_v16 }
 0x644   :  { %5754 = vrsqrt.f32 %v2670_v28  ;;  %v2671_v5 = vadd.f32 1e-05, %v2607_v30  ;;  %v7611_v57 = vmul.f32 0.0078125, %v2369_v61  ;;  %v2576_v53 = vmul.f32 %v7604_v2, %v7604_v2 }
 0x645   :  { %v2495_v33 = vpop.xlane.xlu0 %2494  ;;  %v2807_v20 = vadd.f32 %v7534_v47, %v2769_v54 }
 0x646   :  { %v5751_v50 = vpop.eup %5750  ;;  %5756 = vrsqrt.f32 %v2671_v5  ;;  %v2544_v36 = vmul.f32 0.0078125, %v2495_v33  ;;  %v2577_v37 = vmul.f32 %v7611_v57, %v7611_v57  ;;  %v2638_v33 = vsub.f32 %v7385_v24, %v7586_v56 }
 0x647   :  { %v2497_v45 = vpop.xlane.xlu1 %2496  ;;  %v2834_v46 = vpack.c.bf16 %v2807_v20, %v2806_v11  ;;  %v2732_v55 = vmul.f32 %v5751_v50, %v2636_v25 }
 0x648   :  { %v5753_v13 = vpop.eup %5752  ;;  %v2608_v21 = vsub.f32 %v2544_v36, %v2576_v53  ;;  %v2545_v17 = vmul.f32 0.0078125, %v2497_v45 }
 0x649   :  { %v2371_v51 = vpop.xlane.xlu0 %2370  ;;  %3133 = vmatmul.mubr.bf16.gmra.mrb[112].mxu1 %v2834_v46  ;;  %3326 = vmatmul.mubr.bf16.gmra.mrb[112].mxu0 %v2834_v46  ;;  %v2733_v16 = vmul.f32 %v5753_v13, %v2637_v14  ;;  %v2770_v28 = vmul.f32 %v7523_v63, %v2732_v55  ;;  %v2639_v46 = vsub.f32 %v7387_v52, %v7593_v34 }
 0x64a   :  { %v2672_v30 = vadd.f32 1e-05, %v2608_v21  ;;  %v2609_v61 = vsub.f32 %v2545_v17, %v2577_v37  ;;  %v7622_v54 = vmul.f32 0.0078125, %v2371_v51  ;;  %3142 = vmatprep.mubr.bf16.mxu1 %v6155_v42  ;;  %3335 = vmatprep.mubr.bf16.mxu0 %v6155_v42 }
 0x64b   :  { %v2373_v35 = vpop.xlane.xlu1 %2372  ;;  %v2771_v5 = vmul.f32 %v7523_v63, %v2733_v16  ;;  %v2808_v50 = vadd.f32 %v7534_v47, %v2770_v28 }
 0x64c   :  { %5758 = vrsqrt.f32 %v2672_v30  ;;  %v2673_v25 = vadd.f32 1e-05, %v2609_v61  ;;  %v7629_v11 = vmul.f32 0.0078125, %v2373_v35  ;;  %v2578_v14 = vmul.f32 %v7622_v54, %v7622_v54 }
 0x64d   :  { %v2499_v20 = vpop.xlane.xlu0 %2498  ;;  %v2809_v53 = vadd.f32 %v7534_v47, %v2771_v5 }
 0x64e   :  { %v5755_v36 = vpop.eup %5754  ;;  %5760 = vrsqrt.f32 %v2673_v25  ;;  %v2546_v45 = vmul.f32 0.0078125, %v2499_v20  ;;  %v2579_v21 = vmul.f32 %v7629_v11, %v7629_v11  ;;  %v2640_v20 = vsub.f32 %v7399_v60, %v7604_v2 }
 0x64f   :  { %v2501_v55 = vpop.xlane.xlu1 %2500  ;;  %v2835_v13 = vpack.c.bf16 %v2809_v53, %v2808_v50  ;;  %v2734_v37 = vmul.f32 %v5755_v36, %v2638_v33 }
 0x650   :  { %v5757_v56 = vpop.eup %5756  ;;  %v2610_v17 = vsub.f32 %v2546_v45, %v2578_v14  ;;  %v2547_v51 = vmul.f32 0.0078125, %v2501_v55 }
 0x651   :  { %v2375_v16 = vpop.xlane.xlu0 %2374  ;;  %3143 = vmatmul.mubr.bf16.gmra.mrb[116].mxu1 %v2835_v13  ;;  %3336 = vmatmul.mubr.bf16.gmra.mrb[116].mxu0 %v2835_v13  ;;  %v2735_v28 = vmul.f32 %v5757_v56, %v2639_v46  ;;  %v2772_v30 = vmul.f32 %v7523_v63, %v2734_v37  ;;  %v2641_v13 = vsub.f32 %v7401_v31, %v7611_v57 }
 0x652   :  { %v2674_v61 = vadd.f32 1e-05, %v2610_v17  ;;  %v2611_v35 = vsub.f32 %v2547_v51, %v2579_v21  ;;  %v7640_v5 = vmul.f32 0.0078125, %v2375_v16  ;;  %3152 = vmatprep.mubr.bf16.mxu1 %v6155_v42  ;;  %3345 = vmatprep.mubr.bf16.mxu0 %v6155_v42 }
 0x653   :  { %v2377_v34 = vpop.xlane.xlu1 %2376  ;;  %v2773_v25 = vmul.f32 %v7523_v63, %v2735_v28  ;;  %v2810_v36 = vadd.f32 %v7534_v47, %v2772_v30 }
 0x654   :  { %5762 = vrsqrt.f32 %v2674_v61  ;;  %v2675_v33 = vadd.f32 1e-05, %v2611_v35  ;;  %v7647_v50 = vmul.f32 0.0078125, %v2377_v34  ;;  %v2580_v46 = vmul.f32 %v7640_v5, %v7640_v5 }
 0x655   :  { %v2503_v53 = vpop.xlane.xlu0 %2502  ;;  %v2811_v14 = vadd.f32 %v7534_v47, %v2773_v25 }
 0x656   :  { %v5759_v45 = vpop.eup %5758  ;;  %5764 = vrsqrt.f32 %v2675_v33  ;;  %v2548_v55 = vmul.f32 0.0078125, %v2503_v53  ;;  %v2581_v17 = vmul.f32 %v7647_v50, %v7647_v50  ;;  %v2642_v53 = vsub.f32 %v7410_v44, %v7622_v54 }
 0x657   :  { %v2505_v37 = vpop.xlane.xlu1 %2504  ;;  %v2836_v56 = vpack.c.bf16 %v2811_v14, %v2810_v36  ;;  %v2736_v21 = vmul.f32 %v5759_v45, %v2640_v20 }
 0x658   :  { %v5761_v2 = vpop.eup %5760  ;;  %v2612_v51 = vsub.f32 %v2548_v55, %v2580_v46  ;;  %v2549_v16 = vmul.f32 0.0078125, %v2505_v37 }
 0x659   :  { %v2379_v28 = vpop.xlane.xlu0 %2378  ;;  %3153 = vmatmul.mubr.bf16.gmra.mrb[120].mxu1 %v2836_v56  ;;  %3346 = vmatmul.mubr.bf16.gmra.mrb[120].mxu0 %v2836_v56  ;;  %v2737_v30 = vmul.f32 %v5761_v2, %v2641_v13  ;;  %v2774_v61 = vmul.f32 %v7523_v63, %v2736_v21  ;;  %v2643_v56 = vsub.f32 %v7413_v40, %v7629_v11 }
 0x65a   :  { %v2676_v35 = vadd.f32 1e-05, %v2612_v51  ;;  %v2613_v34 = vsub.f32 %v2549_v16, %v2581_v17  ;;  %v7658_v25 = vmul.f32 0.0078125, %v2379_v28  ;;  %3162 = vmatprep.mubr.bf16.mxu1 %v6155_v42  ;;  %3355 = vmatprep.mubr.bf16.mxu0 %v6155_v42 }
 0x65b   :  { %v2381_v57 = vpop.xlane.xlu1 %2380  ;;  %v2775_v33 = vmul.f32 %v7523_v63, %v2737_v30  ;;  %v2812_v45 = vadd.f32 %v7534_v47, %v2774_v61 }
 0x65c   :  { %5766 = vrsqrt.f32 %v2676_v35  ;;  %v2677_v20 = vadd.f32 1e-05, %v2613_v34  ;;  %v7665_v36 = vmul.f32 0.0078125, %v2381_v57  ;;  %v2582_v13 = vmul.f32 %v7658_v25, %v7658_v25 }
 0x65d   :  { %v2507_v14 = vpop.xlane.xlu0 %2506  ;;  %v2813_v46 = vadd.f32 %v7534_v47, %v2775_v33 }
 0x65e   :  { %v5763_v55 = vpop.eup %5762  ;;  %5768 = vrsqrt.f32 %v2677_v20  ;;  %v2550_v37 = vmul.f32 0.0078125, %v2507_v14  ;;  %v2583_v51 = vmul.f32 %v7665_v36, %v7665_v36  ;;  %v2644_v14 = vsub.f32 %v7423_v9, %v7640_v5 }
 0x65f   :  { %v2509_v21 = vpop.xlane.xlu1 %2508  ;;  %v2837_v2 = vpack.c.bf16 %v2813_v46, %v2812_v45  ;;  %v2738_v17 = vmul.f32 %v5763_v55, %v2642_v53 }
 0x660   :  { %v5765_v54 = vpop.eup %5764  ;;  %v2614_v16 = vsub.f32 %v2550_v37, %v2582_v13  ;;  %v2551_v28 = vmul.f32 0.0078125, %v2509_v21 }
 0x661   :  { %v2383_v30 = vpop.xlane.xlu0 %2382  ;;  %3163 = vmatmul.mubr.bf16.gmra.mrb[124].mxu1 %v2837_v2  ;;  %3356 = vmatmul.mubr.bf16.gmra.mrb[124].mxu0 %v2837_v2  ;;  %v2739_v61 = vmul.f32 %v5765_v54, %v2643_v56  ;;  %v2776_v35 = vmul.f32 %v7523_v63, %v2738_v17  ;;  %v2645_v2 = vsub.f32 %v7425_v3, %v7647_v50 }
 0x662   :  { %v2678_v34 = vadd.f32 1e-05, %v2614_v16  ;;  %v2615_v57 = vsub.f32 %v2551_v28, %v2583_v51  ;;  %v7676_v33 = vmul.f32 0.0078125, %v2383_v30  ;;  %3172 = vmatprep.mubr.bf16.mxu1 %v6155_v42  ;;  %3365 = vmatprep.mubr.bf16.mxu0 %v6155_v42 }
 0x663   :  { %v2385_v11 = vpop.xlane.xlu1 %2384  ;;  %v2777_v20 = vmul.f32 %v7523_v63, %v2739_v61  ;;  %v2814_v55 = vadd.f32 %v7534_v47, %v2776_v35 }
 0x664   :  { %5770 = vrsqrt.f32 %v2678_v34  ;;  %v2679_v53 = vadd.f32 1e-05, %v2615_v57  ;;  %v7683_v45 = vmul.f32 0.0078125, %v2385_v11  ;;  %v2584_v56 = vmul.f32 %v7676_v33, %v7676_v33 }
 0x665   :  { %v2511_v46 = vpop.xlane.xlu0 %2510  ;;  %v2815_v13 = vadd.f32 %v7534_v47, %v2777_v20 }
 0x666   :  { %v5767_v37 = vpop.eup %5766  ;;  %5772 = vrsqrt.f32 %v2679_v53  ;;  %v2552_v21 = vmul.f32 0.0078125, %v2511_v46  ;;  %v2585_v16 = vmul.f32 %v7683_v45, %v7683_v45  ;;  %v2646_v46 = vsub.f32 %v7435_v49, %v7658_v25 }
 0x667   :  { %v2513_v17 = vpop.xlane.xlu1 %2512  ;;  %v2838_v54 = vpack.c.bf16 %v2815_v13, %v2814_v55  ;;  %v2740_v51 = vmul.f32 %v5767_v37, %v2644_v14 }
 0x668   :  { %v5769_v5 = vpop.eup %5768  ;;  %v2616_v28 = vsub.f32 %v2552_v21, %v2584_v56  ;;  %v2553_v30 = vmul.f32 0.0078125, %v2513_v17 }
 0x669   :  { %v2387_v61 = vpop.xlane.xlu0 %2386  ;;  %3173 = vmatmul.mubr.bf16.gmra.mrb[128].mxu1 %v2838_v54  ;;  %3366 = vmatmul.mubr.bf16.gmra.mrb[128].mxu0 %v2838_v54  ;;  %v2741_v35 = vmul.f32 %v5769_v5, %v2645_v2  ;;  %v2778_v34 = vmul.f32 %v7523_v63, %v2740_v51  ;;  %v2647_v54 = vsub.f32 %v7437_v6, %v7665_v36 }
 0x66a   :  { %v2680_v57 = vadd.f32 1e-05, %v2616_v28  ;;  %v2617_v11 = vsub.f32 %v2553_v30, %v2585_v16  ;;  %v7694_v20 = vmul.f32 0.0078125, %v2387_v61  ;;  %3182 = vmatprep.mubr.bf16.mxu1 %v6155_v42  ;;  %3375 = vmatprep.mubr.bf16.mxu0 %v6155_v42 }
 0x66b   :  { %v2389_v50 = vpop.xlane.xlu1 %2388  ;;  %v2779_v53 = vmul.f32 %v7523_v63, %v2741_v35  ;;  %v2816_v37 = vadd.f32 %v7534_v47, %v2778_v34 }
 0x66c   :  { %5774 = vrsqrt.f32 %v2680_v57  ;;  %v2681_v14 = vadd.f32 1e-05, %v2617_v11  ;;  %v7701_v55 = vmul.f32 0.0078125, %v2389_v50  ;;  %v2586_v2 = vmul.f32 %v7694_v20, %v7694_v20 }
 0x66d   :  { %v2515_v13 = vpop.xlane.xlu0 %2514  ;;  %v2817_v56 = vadd.f32 %v7534_v47, %v2779_v53 }
 0x66e   :  { %v5771_v21 = vpop.eup %5770  ;;  %5776 = vrsqrt.f32 %v2681_v14  ;;  %v2554_v17 = vmul.f32 0.0078125, %v2515_v13  ;;  %v2587_v28 = vmul.f32 %v7701_v55, %v7701_v55  ;;  %v2648_v13 = vsub.f32 %v7447_v15, %v7676_v33 }
 0x66f   :  { %v2517_v51 = vpop.xlane.xlu1 %2516  ;;  %v2839_v5 = vpack.c.bf16 %v2817_v56, %v2816_v37  ;;  %v2742_v16 = vmul.f32 %v5771_v21, %v2646_v46 }
 0x670   :  { %v5773_v25 = vpop.eup %5772  ;;  %v2618_v30 = vsub.f32 %v2554_v17, %v2586_v2  ;;  %v2555_v61 = vmul.f32 0.0078125, %v2517_v51 }
 0x671   :  { %v2391_v35 = vpop.xlane.xlu0 %2390  ;;  %3183 = vmatmul.mubr.bf16.gmra.mrb[132].mxu1 %v2839_v5  ;;  %3376 = vmatmul.mubr.bf16.gmra.mrb[132].mxu0 %v2839_v5  ;;  %v2743_v34 = vmul.f32 %v5773_v25, %v2647_v54  ;;  %v2780_v57 = vmul.f32 %v7523_v63, %v2742_v16  ;;  %v2649_v5 = vsub.f32 %v7449_v22, %v7683_v45 }
 0x672   :  { %v2682_v11 = vadd.f32 1e-05, %v2618_v30  ;;  %v2619_v50 = vsub.f32 %v2555_v61, %v2587_v28  ;;  %v7712_v53 = vmul.f32 0.0078125, %v2391_v35  ;;  %3192 = vmatprep.mubr.bf16.mxu1 %v6155_v42  ;;  %3385 = vmatprep.mubr.bf16.mxu0 %v6155_v42 }
 0x673   :  { %v2393_v36 = vpop.xlane.xlu1 %2392  ;;  %v2781_v14 = vmul.f32 %v7523_v63, %v2743_v34  ;;  %v2818_v21 = vadd.f32 %v7534_v47, %v2780_v57 }
 0x674   :  { %5778 = vrsqrt.f32 %v2682_v11  ;;  %v2683_v46 = vadd.f32 1e-05, %v2619_v50  ;;  %v7719_v37 = vmul.f32 0.0078125, %v2393_v36  ;;  %v2588_v54 = vmul.f32 %v7712_v53, %v7712_v53 }
 0x675   :  { %v2519_v56 = vpop.xlane.xlu0 %2518  ;;  %v2819_v2 = vadd.f32 %v7534_v47, %v2781_v14 }
 0x676   :  { %v5775_v17 = vpop.eup %5774  ;;  %5780 = vrsqrt.f32 %v2683_v46  ;;  %v2556_v51 = vmul.f32 0.0078125, %v2519_v56  ;;  %v2589_v30 = vmul.f32 %v7719_v37, %v7719_v37  ;;  %v2650_v56 = vsub.f32 %v7459_v0, %v7694_v20 }
 0x677   :  { %v2521_v16 = vpop.xlane.xlu1 %2520  ;;  %v2840_v25 = vpack.c.bf16 %v2819_v2, %v2818_v21  ;;  %v2744_v28 = vmul.f32 %v5775_v17, %v2648_v13 }
 0x678   :  { %v5777_v33 = vpop.eup %5776  ;;  %v2620_v61 = vsub.f32 %v2556_v51, %v2588_v54  ;;  %v2557_v35 = vmul.f32 0.0078125, %v2521_v16 }
 0x679   :  { %v2395_v34 = vpop.xlane.xlu0 %2394  ;;  %3193 = vmatmul.mubr.bf16.gmra.mrb[136].mxu1 %v2840_v25  ;;  %3386 = vmatmul.mubr.bf16.gmra.mrb[136].mxu0 %v2840_v25  ;;  %v2745_v57 = vmul.f32 %v5777_v33, %v2649_v5  ;;  %v2782_v11 = vmul.f32 %v7523_v63, %v2744_v28  ;;  %v2651_v25 = vsub.f32 %v7461_v1, %v7701_v55 }
 0x67a   :  { %v2684_v50 = vadd.f32 1e-05, %v2620_v61  ;;  %v2621_v36 = vsub.f32 %v2557_v35, %v2589_v30  ;;  %v7730_v14 = vmul.f32 0.0078125, %v2395_v34  ;;  %3202 = vmatprep.mubr.bf16.mxu1 %v6155_v42  ;;  %3395 = vmatprep.mubr.bf16.mxu0 %v6155_v42 }
 0x67b   :  { %v2397_v45 = vpop.xlane.xlu1 %2396  ;;  %v2783_v46 = vmul.f32 %v7523_v63, %v2745_v57  ;;  %v2820_v17 = vadd.f32 %v7534_v47, %v2782_v11 }
 0x67c   :  { %5782 = vrsqrt.f32 %v2684_v50  ;;  %v2685_v13 = vadd.f32 1e-05, %v2621_v36  ;;  %v7737_v21 = vmul.f32 0.0078125, %v2397_v45  ;;  %v2590_v5 = vmul.f32 %v7730_v14, %v7730_v14 }
 0x67d   :  { %v2523_v2 = vpop.xlane.xlu0 %2522  ;;  %v2821_v54 = vadd.f32 %v7534_v47, %v2783_v46 }
 0x67e   :  { %v5779_v51 = vpop.eup %5778  ;;  %5784 = vrsqrt.f32 %v2685_v13  ;;  %v2558_v16 = vmul.f32 0.0078125, %v2523_v2  ;;  %v2591_v61 = vmul.f32 %v7737_v21, %v7737_v21  ;;  %v2652_v2 = vsub.f32 %v7471_v32, %v7712_v53 }
 0x67f   :  { %v2525_v28 = vpop.xlane.xlu1 %2524  ;;  %v2841_v33 = vpack.c.bf16 %v2821_v54, %v2820_v17  ;;  %v2746_v30 = vmul.f32 %v5779_v51, %v2650_v56 }
 0x680   :  { %v5781_v20 = vpop.eup %5780  ;;  %v2622_v35 = vsub.f32 %v2558_v16, %v2590_v5  ;;  %v2559_v34 = vmul.f32 0.0078125, %v2525_v28 }
 0x681   :  { %v2399_v57 = vpop.xlane.xlu0 %2398  ;;  %3203 = vmatmul.mubr.bf16.gmra.mrb[140].mxu1 %v2841_v33  ;;  %3396 = vmatmul.mubr.bf16.gmra.mrb[140].mxu0 %v2841_v33  ;;  %v2747_v11 = vmul.f32 %v5781_v20, %v2651_v25  ;;  %v2784_v50 = vmul.f32 %v7523_v63, %v2746_v30  ;;  %v2653_v33 = vsub.f32 %v7473_v48, %v7719_v37 }
 0x682   :  { %v2686_v36 = vadd.f32 1e-05, %v2622_v35  ;;  %v2623_v45 = vsub.f32 %v2559_v34, %v2591_v61  ;;  %v7748_v46 = vmul.f32 0.0078125, %v2399_v57  ;;  %3212 = vmatprep.mubr.bf16.mxu1 %v6155_v42  ;;  %3405 = vmatprep.mubr.bf16.mxu0 %v6155_v42 }
 0x683   :  { %v2401_v55 = vpop.xlane.xlu1 %2400  ;;  %v2785_v13 = vmul.f32 %v7523_v63, %v2747_v11  ;;  %v2822_v51 = vadd.f32 %v7534_v47, %v2784_v50 }
 0x684   :  { %5786 = vrsqrt.f32 %v2686_v36  ;;  %v2687_v56 = vadd.f32 1e-05, %v2623_v45  ;;  %v7755_v17 = vmul.f32 0.0078125, %v2401_v55  ;;  %v2592_v25 = vmul.f32 %v7748_v46, %v7748_v46 }
 0x685   :  { %v2527_v54 = vpop.xlane.xlu0 %2526  ;;  %v2823_v5 = vadd.f32 %v7534_v47, %v2785_v13  ;;  %v2654_v13 = vsub.f32 %v7483_v4, %v7730_v14 }
 0x686   :  { %v5783_v16 = vpop.eup %5782  ;;  %5788 = vrsqrt.f32 %v2687_v56  ;;  %v2560_v28 = vmul.f32 0.0078125, %v2527_v54  ;;  %v2593_v35 = vmul.f32 %v7755_v17, %v7755_v17 }
 0x687   :  { %v2529_v30 = vpop.xlane.xlu1 %2528  ;;  %v2842_v20 = vpack.c.bf16 %v2823_v5, %v2822_v51  ;;  %v2748_v61 = vmul.f32 %v5783_v16, %v2652_v2  ;;  %v5554_v51 = vld [vmem:[#allocation13 + $0x60] sm:$0xff]   ;;  %v2655_v16 = vsub.f32 %v7485_v23, %v7737_v21 }
 0x688   :  { %v5785_v53 = vpop.eup %5784  ;;  %v2624_v34 = vsub.f32 %v2560_v28, %v2592_v25  ;;  %v2561_v57 = vmul.f32 0.0078125, %v2529_v30  ;;  %v5556_v5 = vld [vmem:[#allocation13 + $0xe0] sm:$0xff]   ;;  %4977 = vmatprep.subr.bf16.mxu1 %v5554_v51  ;;  %v5565_v51 = vld [vmem:[#allocation13 + $0xb0] sm:$0xff]  }
 0x689   :  { %3213 = vmatmul.mubr.bf16.gmra.mrb[144].mxu1 %v2842_v20  ;;  %3406 = vmatmul.mubr.bf16.gmra.mrb[144].mxu0 %v2842_v20  ;;  %v2749_v11 = vmul.f32 %v5785_v53, %v2653_v33  ;;  %v2786_v50 = vmul.f32 %v7523_v63, %v2748_v61  ;;  %v5555_v33 = vld [vmem:[#allocation13 + $0x20] sm:$0xff]   ;;  %v5558_v53 = vld [vmem:[#allocation13 + $0x68] sm:$0xff]  }
 0x68a   :  { %v2688_v36 = vadd.f32 1e-05, %v2624_v34  ;;  %v2625_v45 = vsub.f32 %v2561_v57, %v2593_v35  ;;  %3222 = vmatprep.mubr.bf16.mxu1 %v6155_v42  ;;  %3415 = vmatprep.mubr.bf16.mxu0 %v6155_v42  ;;  %v5557_v30 = vld [vmem:[#allocation13 + $0xa0] sm:$0xff]   ;;  %v5560_v35 = vld [vmem:[#allocation13 + $0xe8] sm:$0xff]  }
 0x68b   :  { %v2787_v37 = vmul.f32 %v7523_v63, %v2749_v11  ;;  %v2824_v56 = vadd.f32 %v7534_v47, %v2786_v50  ;;  %5089 = vmatprep.subr.bf16.mxu0 %v5556_v5  ;;  %4978 = vmatpush3.bf16.msra.mxu1 %v5555_v33  ;;  %v5559_v34 = vld [vmem:[#allocation13 + $0x28] sm:$0xff]   ;;  %v2656_v11 = vsub.f32 %v7495_v26, %v7748_v46  ;;  %v5568_v33 = vld [vmem:[#allocation13 + $0x38] sm:$0xff]  }
 0x68c   :  { %5790 = vrsqrt.f32 %v2688_v36  ;;  %v2689_v55 = vadd.f32 1e-05, %v2625_v45  ;;  %5090 = vmatpush3.bf16.msra.mxu0 %v5557_v30  ;;  %v5561_v57 = vld [vmem:[#allocation13 + $0xa8] sm:$0xff]   ;;  %4979 = vmatprep.subr.bf16.mxu1 %v5558_v53  ;;  %v5569_v30 = vld [vmem:[#allocation13 + $0xb8] sm:$0xff]  }
 0x68d   :  { %v2825_v2 = vadd.f32 %v7534_v47, %v2787_v37  ;;  %5091 = vmatprep.subr.bf16.mxu0 %v5560_v35  ;;  %v5562_v37 = vld [vmem:[#allocation13 + $0x70] sm:$0xff]   ;;  %v9020_v35 = vsub.s32 2, %v6796_v8 }
 0x68e   :  { %v5787_v54 = vpop.eup %5786  ;;  %5792 = vrsqrt.f32 %v2689_v55  ;;  %v5563_v55 = vld [vmem:[#allocation13 + $0xf0] sm:$0xff]  }
 0x68f   :  { %v2843_v25 = vpack.c.bf16 %v2825_v2, %v2824_v56  ;;  %v2750_v28 = vmul.f32 %v5787_v54, %v2654_v13  ;;  %v2657_v13 = vsub.f32 %v7497_v18, %v7755_v17  ;;  %4980 = vmatpush3.bf16.msra.mxu1 %v5559_v34  ;;  %v5564_v54 = vld [vmem:[#allocation13 + $0x30] sm:$0xff]   ;;  %v5567_v17 = vld [vmem:[#allocation13 + $0xf8] sm:$0xff]  }
 0x690   :  { %v5789_v20 = vpop.eup %5788  ;;  %5092 = vmatpush3.bf16.msra.mxu0 %v5561_v57  ;;  %4981 = vmatprep.subr.bf16.mxu1 %v5562_v37  ;;  %v9021_v57 = vsub.s32 1, %v6796_v8 }
 0x691   :  { %3223 = vmatmul.mubr.bf16.gmra.mrb[148].mxu1 %v2843_v25  ;;  %3416 = vmatmul.mubr.bf16.gmra.mrb[148].mxu0 %v2843_v25  ;;  %v2751_v14 = vmul.f32 %v5789_v20, %v2655_v16  ;;  %v2788_v61 = vmul.f32 %v7523_v63, %v2750_v28  ;;  %v5566_v25 = vld [vmem:[#allocation13 + $0x78] sm:$0xff]  }
 0x692   :  { %3232 = vmatprep.mubr.bf16.mxu1 %v6155_v42  ;;  %3425 = vmatprep.mubr.bf16.mxu0 %v6155_v42 }
 0x693   :  { %v2789_v21 = vmul.f32 %v7523_v63, %v2751_v14  ;;  %v2826_v50 = vadd.f32 %v7534_v47, %v2788_v61  ;;  %5093 = vmatprep.subr.bf16.mxu0 %v5563_v55  ;;  %4982 = vmatpush3.bf16.msra.mxu1 %v5564_v54 }
 0x694   :  { %5094 = vmatpush3.bf16.msra.mxu0 %v5565_v51  ;;  %4983 = vmatprep.subr.bf16.mxu1 %v5566_v25 }
 0x695   :  { %v2827_v36 = vadd.f32 %v7534_v47, %v2789_v21  ;;  %5095 = vmatprep.subr.bf16.mxu0 %v5567_v17 }
 0x696   :  { %v5791_v45 = vpop.eup %5790 }
 0x697   :  { %v2844_v56 = vpack.c.bf16 %v2827_v36, %v2826_v50  ;;  %v2752_v2 = vmul.f32 %v5791_v45, %v2656_v11  ;;  %4984 = vmatpush3.bf16.msra.mxu1 %v5568_v33 }
 0x698   :  { %v5793_v5 = vpop.eup %5792  ;;  %5096 = vmatpush3.bf16.msra.mxu0 %v5569_v30 }
 0x699   :  { %3233 = vmatmul.mubr.bf16.gmra.mrb[152].mxu1 %v2844_v56  ;;  %3426 = vmatmul.mubr.bf16.gmra.mrb[152].mxu0 %v2844_v56  ;;  %v2753_v46 = vmul.f32 %v5793_v5, %v2657_v13  ;;  %v2790_v16 = vmul.f32 %v7523_v63, %v2752_v2 }
 0x69a   :  { %3242 = vmatprep.mubr.bf16.mxu1 %v6155_v42  ;;  %3435 = vmatprep.mubr.bf16.mxu0 %v6155_v42  ;;  %v2878_v42 = vld [vmem:[%s8921_s10] sm:$0xf] }
 0x69b   :  { %v2791_v28 = vmul.f32 %v7523_v63, %v2753_v46  ;;  %v2828_v20 = vadd.f32 %v7534_v47, %v2790_v16  ;;  %v2894_v63 = vsub.s32 3, %v6796_v8  ;;  %v7797_v53 = vrot.slane %v2878_v42, %v720_v39 }
 0x69c   :  { %v7801_v21 = vrot.slane %v2878_v42, %v9020_v35  ;;  %v7805_v11 = vrot.slane %v2878_v42, %v9021_v57 }
 0x69d   :  { %v2829_v14 = vadd.f32 %v7534_v47, %v2791_v28  ;;  %v7807_v50 = vrot.slane %v2878_v42, %v2894_v63 }
 0x69f   :  { %v2845_v61 = vpack.c.bf16 %v2829_v14, %v2828_v20 }
 0x6a1   :  { %3243 = vmatmul.mubr.bf16.gmra.mrb[156].mxu1 %v2845_v61  ;;  %3436 = vmatmul.mubr.bf16.gmra.mrb[156].mxu0 %v2845_v61 }
 0x6fc   :  { %v3094_v47 = vpop.f32.mrb[96].mxu1  ;;  %v3287_v34 = vpop.f32.mrb[96].mxu0 }
 0x6fd   :  { %v3096_v36 = vpop.f32.mrb[97].mxu1  ;;  %v3289_v45 = vpop.f32.mrb[97].mxu0  ;;  %v3095_v13 = vadd.f32 %v3094_v47, %v7797_v53  ;;  %v3288_v39 = vadd.f32 %v3287_v34, %v7801_v21 }
 0x6fe   :  { %v3098_v37 = vpop.f32.mrb[98].mxu1  ;;  %v3291_v55 = vpop.f32.mrb[98].mxu0  ;;  %v3097_v8 = vadd.f32 %v3096_v36, %v7805_v11  ;;  %v3290_v5 = vadd.f32 %v3289_v45, %v7807_v50 }
 0x6ff   :  { %v3099_v56 = vadd.f32 %v3098_v37, %v7797_v53  ;;  %v3292_v2 = vadd.f32 %v3291_v55, %v7801_v21  ;;  %v3100_v54 = vpop.f32.mrb[99].mxu1  ;;  %v3293_v51 = vpop.f32.mrb[99].mxu0 }
 0x700   :  { %v3101_v46 = vadd.f32 %v3100_v54, %v7805_v11  ;;  %v3294_v16 = vadd.f32 %v3293_v51, %v7807_v50 }
 0x701   :  { %v7817_v25 = vpack.c.bf16 %v3099_v56, %v3095_v13  ;;  %v7819_v17 = vpack.c.bf16 %v3292_v2, %v3288_v39 }
 0x702   :  { %v7821_v28 = vpack.c.bf16 %v3101_v46, %v3097_v8  ;;  %v7823_v33 = vpack.c.bf16 %v3294_v16, %v3290_v5 }
 0x703   :  { %v3574_v30 = vmul.bf16 %v7817_v25, %v7817_v25  ;;  %v3576_v20 = vmul.bf16 %v7819_v17, %v7819_v17 }
 0x704   :  { %v3575_v14 = vmul.bf16 %v7821_v28, %v7821_v28  ;;  %v3577_v61 = vmul.bf16 %v7823_v33, %v7823_v33  ;;  %v3104_v42 = vpop.f32.mrb[100].mxu1  ;;  %v3297_v63 = vpop.f32.mrb[100].mxu0 }
 0x705   :  { %v3638_v35 = vmul.bf16 %v3574_v30, %v7817_v25  ;;  %v3640_v47 = vmul.bf16 %v3576_v20, %v7819_v17  ;;  %v3105_v34 = vadd.f32 %v3104_v42, %v7797_v53  ;;  %v3298_v57 = vadd.f32 %v3297_v63, %v7801_v21  ;;  %v3106_v36 = vpop.f32.mrb[101].mxu1  ;;  %v3299_v45 = vpop.f32.mrb[101].mxu0 }
 0x706   :  { %v3639_v37 = vmul.bf16 %v3575_v14, %v7821_v28  ;;  %v3641_v55 = vmul.bf16 %v3577_v61, %v7823_v33  ;;  %v3107_v13 = vadd.f32 %v3106_v36, %v7805_v11  ;;  %v3300_v39 = vadd.f32 %v3299_v45, %v7807_v50  ;;  %v3108_v56 = vpop.f32.mrb[102].mxu1  ;;  %v3301_v2 = vpop.f32.mrb[102].mxu0 }
 0x707   :  { %v3702_v54 = vmul.bf16 1027030327, %v3638_v35  ;;  %v3704_v51 = vmul.bf16 1027030327, %v3640_v47  ;;  %v3109_v8 = vadd.f32 %v3108_v56, %v7797_v53  ;;  %v3302_v5 = vadd.f32 %v3301_v2, %v7801_v21  ;;  %v3110_v46 = vpop.f32.mrb[103].mxu1  ;;  %v3303_v16 = vpop.f32.mrb[103].mxu0 }
 0x708   :  { %v3703_v30 = vmul.bf16 1027030327, %v3639_v37  ;;  %v3705_v20 = vmul.bf16 1027030327, %v3641_v55  ;;  %v3111_v14 = vadd.f32 %v3110_v46, %v7805_v11  ;;  %v3304_v61 = vadd.f32 %v3303_v16, %v7807_v50 }
 0x709   :  { %v3766_v42 = vadd.bf16 %v3702_v54, %v7817_v25  ;;  %v3768_v63 = vadd.bf16 %v3704_v51, %v7819_v17  ;;  %v7847_v36 = vpack.c.bf16 %v3109_v8, %v3105_v34  ;;  %v7849_v35 = vpack.c.bf16 %v3302_v5, %v3298_v57 }
 0x70a   :  { %v7851_v47 = vpack.c.bf16 %v3111_v14, %v3107_v13  ;;  %v7853_v45 = vpack.c.bf16 %v3304_v61, %v3300_v39  ;;  %v3767_v56 = vadd.bf16 %v3703_v30, %v7821_v28  ;;  %v3769_v37 = vadd.bf16 %v3705_v20, %v7823_v33 }
 0x70b   :  { %v3830_v55 = vmul.bf16 1061961548, %v3766_v42  ;;  %v3832_v2 = vmul.bf16 1061961548, %v3768_v63  ;;  %v3578_v46 = vmul.bf16 %v7847_v36, %v7847_v36  ;;  %v3580_v51 = vmul.bf16 %v7849_v35, %v7849_v35 }
 0x70c   :  { %v3579_v54 = vmul.bf16 %v7851_v47, %v7851_v47  ;;  %v3581_v34 = vmul.bf16 %v7853_v45, %v7853_v45  ;;  %v3114_v57 = vpop.f32.mrb[104].mxu1  ;;  %v3307_v13 = vpop.f32.mrb[104].mxu0  ;;  %v3831_v14 = vmul.bf16 1061961548, %v3767_v56  ;;  %v3833_v61 = vmul.bf16 1061961548, %v3769_v37 }
 0x70d   :  { %v3116_v8 = vpop.f32.mrb[105].mxu1  ;;  %v3309_v5 = vpop.f32.mrb[105].mxu0  ;;  %5794 = vtanh.bf16 %v3830_v55  ;;  %v7868_v42 = vmul.bf16 %v3578_v46, %v7847_v36  ;;  %v3115_v39 = vadd.f32 %v3114_v57, %v7797_v53  ;;  %v3308_v4 = vadd.f32 %v3307_v13, %v7801_v21 }
 0x70e   :  { %v3643_v16 = vmul.bf16 %v3579_v54, %v7851_v47  ;;  %v3118_v30 = vpop.f32.mrb[106].mxu1  ;;  %v3311_v20 = vpop.f32.mrb[106].mxu0  ;;  %5796 = vtanh.bf16 %v3832_v2  ;;  %v3645_v63 = vmul.bf16 %v3581_v34, %v7853_v45  ;;  %v3117_v56 = vadd.f32 %v3116_v8, %v7805_v11 }
 0x70f   :  { %v3120_v18 = vpop.f32.mrb[107].mxu1  ;;  %v3313_v26 = vpop.f32.mrb[107].mxu0  ;;  %v3119_v55 = vadd.f32 %v3118_v30, %v7797_v53  ;;  %v3312_v54 = vadd.f32 %v3311_v20, %v7801_v21  ;;  %v3310_v37 = vadd.f32 %v3309_v5, %v7807_v50  ;;  %5798 = vtanh.bf16 %v3831_v14 }
 0x710   :  { %v3707_v23 = vmul.bf16 1027030327, %v3643_v16  ;;  %v3121_v2 = vadd.f32 %v3120_v18, %v7805_v11  ;;  %v3314_v46 = vadd.f32 %v3313_v26, %v7807_v50  ;;  %5800 = vtanh.bf16 %v3833_v61 }
 0x711   :  { %v7879_v34 = vpack.c.bf16 %v3119_v55, %v3115_v39  ;;  %v7881_v57 = vpack.c.bf16 %v3312_v54, %v3308_v4  ;;  %v7897_v14 = vmul.bf16 %v3580_v51, %v7849_v35  ;;  %v3709_v55 = vmul.bf16 1027030327, %v3645_v63 }
 0x712   :  { %v3771_v16 = vadd.bf16 %v3707_v23, %v7851_v47  ;;  %v7885_v30 = vpack.c.bf16 %v3121_v2, %v3117_v56  ;;  %v7887_v20 = vpack.c.bf16 %v3314_v46, %v3310_v37 }
 0x713   :  { %v3582_v8 = vmul.bf16 %v7879_v34, %v7879_v34  ;;  %v3584_v26 = vmul.bf16 %v7881_v57, %v7881_v57 }
 0x714   :  { %v3124_v18 = vpop.f32.mrb[108].mxu1  ;;  %v3317_v39 = vpop.f32.mrb[108].mxu0  ;;  %v3583_v56 = vmul.bf16 %v7885_v30, %v7885_v30  ;;  %v3835_v4 = vmul.bf16 1061961548, %v3771_v16 }
 0x715   :  { %v3126_v54 = vpop.f32.mrb[109].mxu1  ;;  %v3319_v61 = vpop.f32.mrb[109].mxu0  ;;  %v3125_v37 = vadd.f32 %v3124_v18, %v7797_v53  ;;  %v3318_v2 = vadd.f32 %v3317_v39, %v7801_v21  ;;  %v7904_v5 = vmul.bf16 %v3582_v8, %v7879_v34  ;;  %v7907_v23 = vmul.bf16 %v3584_v26, %v7881_v57 }
 0x716   :  { %v3128_v46 = vpop.f32.mrb[110].mxu1  ;;  %v3321_v13 = vpop.f32.mrb[110].mxu0  ;;  %v3127_v1 = vadd.f32 %v3126_v54, %v7805_v11  ;;  %v3320_v18 = vadd.f32 %v3319_v61, %v7807_v50  ;;  %v3585_v26 = vmul.bf16 %v7887_v20, %v7887_v20  ;;  %5802 = vtanh.bf16 %v3835_v4 }
 0x717   :  { %v3129_v51 = vadd.f32 %v3128_v46, %v7797_v53  ;;  %v3322_v63 = vadd.f32 %v3321_v13, %v7801_v21  ;;  %v3130_v48 = vpop.f32.mrb[111].mxu1  ;;  %v3323_v32 = vpop.f32.mrb[111].mxu0 }
 0x718   :  { %v3131_v39 = vadd.f32 %v3130_v48, %v7805_v11  ;;  %v3324_v16 = vadd.f32 %v3323_v32, %v7807_v50  ;;  %v5795_v0 = vpop.eup %5794  ;;  %v3773_v48 = vadd.bf16 %v3709_v55, %v7853_v45  ;;  %v7938_v55 = vmul.bf16 %v3585_v26, %v7887_v20 }
 0x719   :  { %v7918_v22 = vpack.c.bf16 %v3129_v51, %v3125_v37  ;;  %v7920_v46 = vpack.c.bf16 %v3322_v63, %v3318_v2  ;;  %v5797_v13 = vpop.eup %5796  ;;  %v3958_v61 = vadd.bf16 1065369472, %v5795_v0 }
 0x71a   :  { %v7922_v15 = vpack.c.bf16 %v3131_v39, %v3127_v1  ;;  %v7924_v54 = vpack.c.bf16 %v3324_v16, %v3320_v18  ;;  %v7935_v1 = vmul.bf16 %v3583_v56, %v7885_v30  ;;  %v5799_v39 = vpop.eup %5798  ;;  %v3960_v37 = vadd.bf16 1065369472, %v5797_v13 }
 0x71b   :  { %v3586_v32 = vmul.bf16 %v7918_v22, %v7918_v22  ;;  %v3588_v4 = vmul.bf16 %v7920_v46, %v7920_v46  ;;  %v5801_v6 = vpop.eup %5800  ;;  %v3837_v3 = vmul.bf16 1061961548, %v3773_v48  ;;  %v3959_v52 = vadd.bf16 1065369472, %v5799_v39 }
 0x71c   :  { %v3134_v63 = vpop.f32.mrb[112].mxu1  ;;  %v3327_v18 = vpop.f32.mrb[112].mxu0  ;;  %v3587_v56 = vmul.bf16 %v7922_v15, %v7922_v15  ;;  %v3589_v51 = vmul.bf16 %v7924_v54, %v7924_v54 }
 0x71d   :  { %v3136_v16 = vpop.f32.mrb[113].mxu1  ;;  %v3329_v8 = vpop.f32.mrb[113].mxu0  ;;  %v7943_v2 = vmul.bf16 %v3586_v32, %v7918_v22  ;;  %v3135_v9 = vadd.f32 %v3134_v63, %v7797_v53  ;;  %v3328_v40 = vadd.f32 %v3327_v18, %v7801_v21  ;;  %v3961_v63 = vadd.bf16 1065369472, %v5801_v6 }
 0x71e   :  { %v3138_v49 = vpop.f32.mrb[114].mxu1  ;;  %v3331_v26 = vpop.f32.mrb[114].mxu0  ;;  %v3137_v31 = vadd.f32 %v3136_v16, %v7805_v11  ;;  %v3330_v60 = vadd.f32 %v3329_v8, %v7807_v50  ;;  %5804 = vtanh.bf16 %v3837_v3  ;;  %v9023_v16 = vmul.bf16 1027030327, %v7868_v42 }
 0x71f   :  { %v3139_v0 = vadd.f32 %v3138_v49, %v7797_v53  ;;  %v3332_v13 = vadd.f32 %v3331_v26, %v7801_v21  ;;  %v3140_v44 = vpop.f32.mrb[115].mxu1  ;;  %v3333_v32 = vpop.f32.mrb[115].mxu0  ;;  %v9022_v49 = vmul.bf16 1056980736, %v7821_v28  ;;  %v9025_v6 = vmul.bf16 1056980736, %v7817_v25 }
 0x720   :  { %v3141_v24 = vadd.f32 %v3140_v44, %v7805_v11  ;;  %v3334_v18 = vadd.f32 %v3333_v32, %v7807_v50  ;;  %v3770_v8 = vadd.bf16 %v9023_v16, %v7847_v36 }
 0x721   :  { %v7956_v29 = vpack.c.bf16 %v3139_v0, %v3135_v9  ;;  %v7958_v48 = vpack.c.bf16 %v3332_v13, %v3328_v40  ;;  %v4023_v12 = vmul.bf16 %v3959_v52, %v9022_v49  ;;  %v9024_v9 = vmul.bf16 1056980736, %v7823_v33 }
 0x722   :  { %v7963_v26 = vpack.c.bf16 %v3141_v24, %v3137_v31  ;;  %v7972_v39 = vpack.c.bf16 %v3334_v18, %v3330_v60  ;;  %v4022_v0 = vmul.bf16 %v3958_v61, %v9025_v6  ;;  %v3711_v52 = vmul.bf16 1027030327, %v7935_v1 }
 0x723   :  { %v3590_v44 = vmul.bf16 %v7956_v29, %v7956_v29  ;;  %v4025_v40 = vmul.bf16 %v3961_v63, %v9024_v9  ;;  %v3713_v24 = vmul.bf16 1027030327, %v7938_v55  ;;  %4381 = vmatprep.mubr.bf16.mxu1 %v4023_v12  ;;  %v9026_v31 = vmul.bf16 1056980736, %v7819_v17  ;;  %v5803_v12 = vpop.eup %5802 }
 0x724   :  { %v3144_v28 = vpop.f32.mrb[116].mxu1  ;;  %v3337_v42 = vpop.f32.mrb[116].mxu0  ;;  %v7981_v13 = vmul.bf16 %v3588_v4, %v7920_v46  ;;  %v7984_v33 = vmul.bf16 %v3587_v56, %v7922_v15  ;;  %v7987_v60 = vmul.bf16 %v3589_v51, %v7924_v54  ;;  %4382 = vmatmul.mubr.bf16.vlgmr.msra.gmra.mrb[160].mxu1 %v4022_v0  ;;  %v3834_v1 = vmul.bf16 1061961548, %v3770_v8 }
 0x725   :  { %v4024_v3 = vmul.bf16 %v3960_v37, %v9026_v31  ;;  %4542 = vmatprep.mubr.bf16.mxu0 %v4025_v40  ;;  %v3146_v25 = vpop.f32.mrb[117].mxu1  ;;  %v3339_v61 = vpop.f32.mrb[117].mxu0  ;;  %v3592_v37 = vmul.bf16 %v7958_v48, %v7958_v48  ;;  %v3591_v55 = vmul.bf16 %v7963_v26, %v7963_v26  ;;  %v9027_v51 = vmul.bf16 1027030327, %v7897_v14 }
 0x726   :  { %v3148_v4 = vpop.f32.mrb[118].mxu1  ;;  %v3341_v56 = vpop.f32.mrb[118].mxu0  ;;  %v7998_v63 = vmul.bf16 %v3590_v44, %v7956_v29  ;;  %v3593_v18 = vmul.bf16 %v7972_v39, %v7972_v39  ;;  %v3145_v49 = vadd.f32 %v3144_v28, %v7797_v53  ;;  %v3338_v16 = vadd.f32 %v3337_v42, %v7801_v21 }
 0x727   :  { %4543 = vmatmul.mubr.bf16.vlgmr.msra.gmra.mrb[160].mxu0 %v4024_v3  ;;  %v3772_v32 = vadd.bf16 %v9027_v51, %v7849_v35  ;;  %v3150_v8 = vpop.f32.mrb[119].mxu1  ;;  %v3343_v9 = vpop.f32.mrb[119].mxu0  ;;  %v3147_v40 = vadd.f32 %v3146_v25, %v7805_v11  ;;  %v3149_v6 = vadd.f32 %v3148_v4, %v7797_v53  ;;  %v3342_v0 = vadd.f32 %v3341_v56, %v7801_v21 }
 0x728   :  { %v3963_v14 = vadd.bf16 1065369472, %v5803_v12  ;;  %v3340_v31 = vadd.f32 %v3339_v61, %v7807_v50  ;;  %v3151_v44 = vadd.f32 %v3150_v8, %v7805_v11  ;;  %v3344_v3 = vadd.f32 %v3343_v9, %v7807_v50 }
 0x729   :  { %5806 = vtanh.bf16 %v3834_v1  ;;  %v8010_v51 = vpack.c.bf16 %v3149_v6, %v3145_v49  ;;  %v8012_v28 = vpack.c.bf16 %v3342_v0, %v3338_v16  ;;  %v9028_v42 = vmul.bf16 1056980736, %v7851_v47  ;;  %v5805_v9 = vpop.eup %5804 }
 0x72a   :  { %v3836_v25 = vmul.bf16 1061961548, %v3772_v32  ;;  %v8018_v12 = vpack.c.bf16 %v3151_v44, %v3147_v40  ;;  %v8020_v61 = vpack.c.bf16 %v3344_v3, %v3340_v31  ;;  %v8025_v47 = vmul.bf16 %v3592_v37, %v7958_v48 }
 0x72b   :  { %v4027_v17 = vmul.bf16 %v3963_v14, %v9028_v42  ;;  %v8028_v32 = vmul.bf16 %v3591_v55, %v7963_v26  ;;  %v3775_v14 = vadd.bf16 %v3711_v52, %v7885_v30  ;;  %v8034_v31 = vmul.bf16 %v3593_v18, %v7972_v39 }
 0x72c   :  { %5808 = vtanh.bf16 %v3836_v25  ;;  %v3154_v49 = vpop.f32.mrb[120].mxu1  ;;  %v3347_v16 = vpop.f32.mrb[120].mxu0  ;;  %v3965_v44 = vadd.bf16 1065369472, %v5805_v9  ;;  %v3777_v37 = vadd.bf16 %v3713_v24, %v7887_v20  ;;  %v3594_v55 = vmul.bf16 %v8010_v51, %v8010_v51 }
 0x72d   :  { %4389 = vmatprep.mubr.bf16.mxu1 %v4027_v17  ;;  %v3156_v6 = vpop.f32.mrb[121].mxu1  ;;  %v3349_v40 = vpop.f32.mrb[121].mxu0  ;;  %v3596_v25 = vmul.bf16 %v8012_v28, %v8012_v28  ;;  %v3155_v4 = vadd.f32 %v3154_v49, %v7797_v53  ;;  %v9029_v18 = vmul.bf16 1056980736, %v7853_v45  ;;  %v3595_v9 = vmul.bf16 %v8018_v12, %v8018_v12 }
 0x72e   :  { %v3158_v3 = vpop.f32.mrb[122].mxu1  ;;  %v3351_v42 = vpop.f32.mrb[122].mxu0  ;;  %v3348_v24 = vadd.f32 %v3347_v16, %v7801_v21  ;;  %v3157_v1 = vadd.f32 %v3156_v6, %v7805_v11  ;;  %v3350_v10 = vadd.f32 %v3349_v40, %v7807_v50  ;;  %v3839_v49 = vmul.bf16 1061961548, %v3775_v14 }
 0x72f   :  { %v3159_v52 = vadd.f32 %v3158_v3, %v7797_v53  ;;  %v3160_v0 = vpop.f32.mrb[123].mxu1  ;;  %v3353_v17 = vpop.f32.mrb[123].mxu0  ;;  %v4029_v8 = vmul.bf16 %v3965_v44, %v9029_v18  ;;  %v3352_v56 = vadd.f32 %v3351_v42, %v7801_v21  ;;  %v3841_v19 = vmul.bf16 1061961548, %v3777_v37 }
 0x730   :  { %v3161_v45 = vadd.f32 %v3160_v0, %v7805_v11  ;;  %v3354_v44 = vadd.f32 %v3353_v17, %v7807_v50  ;;  %v8058_v18 = vmul.bf16 %v3594_v55, %v8010_v51  ;;  %v3597_v16 = vmul.bf16 %v8020_v61, %v8020_v61 }
 0x731   :  { %v8051_v7 = vpack.c.bf16 %v3159_v52, %v3155_v4  ;;  %4550 = vmatprep.mubr.bf16.mxu0 %v4029_v8  ;;  %v8053_v3 = vpack.c.bf16 %v3352_v56, %v3348_v24  ;;  %5810 = vtanh.bf16 %v3839_v49  ;;  %v9031_v4 = vmul.bf16 1027030327, %v7904_v5 }
 0x732   :  { %v8066_v56 = vmul.bf16 %v3596_v25, %v8012_v28  ;;  %5812 = vtanh.bf16 %v3841_v19  ;;  %v8068_v8 = vpack.c.bf16 %v3161_v45, %v3157_v1  ;;  %v8070_v0 = vpack.c.bf16 %v3354_v44, %v3350_v10 }
 0x733   :  { %9030 = vst [vmem:[#allocation52_spill] sm:$0xff] %v8053_v3  ;;  %v3774_v6 = vadd.bf16 %v9031_v4, %v7879_v34  ;;  %v3598_v55 = vmul.bf16 %v8051_v7, %v8051_v7  ;;  %v9032_v19 = vmul.bf16 1027030327, %v7907_v23  ;;  %v9033_v44 = vmul.bf16 1056980736, %v7847_v36 }
 0x734   :  { %v5807_v40 = vpop.eup %5806  ;;  %v3164_v14 = vpop.f32.mrb[124].mxu1  ;;  %v8086_v24 = vmul.bf16 %v3595_v9, %v8018_v12  ;;  %v8089_v23 = vmul.bf16 %v3597_v16, %v8020_v61  ;;  %v9034_v9 = vmul.bf16 1056980736, %v7849_v35  ;;  %v3601_v16 = vmul.bf16 %v8070_v0, %v8070_v0 }
 0x735   :  { %v3357_v17 = vpop.f32.mrb[124].mxu0  ;;  %v3962_v37 = vadd.bf16 1065369472, %v5807_v40  ;;  %v3838_v52 = vmul.bf16 1061961548, %v3774_v6  ;;  %v3776_v1 = vadd.bf16 %v9032_v19, %v7881_v57  ;;  %v3166_v25 = vpop.f32.mrb[125].mxu1  ;;  %v8092_v36 = vmul.bf16 %v3598_v55, %v8051_v7 }
 0x736   :  { %v3359_v10 = vpop.f32.mrb[125].mxu0  ;;  %v3521_v40 = vmul.bf16 1056980736, %v7887_v20  ;;  %v3168_v6 = vpop.f32.mrb[126].mxu1  ;;  %v3600_v20 = vmul.bf16 %v8053_v3, %v8053_v3  ;;  %v3358_v55 = vadd.f32 %v3357_v17, %v7801_v21  ;;  %v9035_v45 = vmul.bf16 1027030327, %v7984_v33 }
 0x737   :  { %v5809_v49 = vpop.eup %5808  ;;  %v4026_v4 = vmul.bf16 %v3962_v37, %v9033_v44  ;;  %5814 = vtanh.bf16 %v3838_v52  ;;  %v3361_v42 = vpop.f32.mrb[126].mxu0  ;;  %v3599_v37 = vmul.bf16 %v8068_v8, %v8068_v8  ;;  %v3840_v52 = vmul.bf16 1061961548, %v3776_v1 }
 0x738   :  { %v3964_v19 = vadd.bf16 1065369472, %v5809_v49  ;;  %v3170_v43 = vpop.f32.mrb[127].mxu1  ;;  %v3363_v62 = vpop.f32.mrb[127].mxu0  ;;  %v3165_v49 = vadd.f32 %v3164_v14, %v7797_v53  ;;  %v3362_v5 = vadd.f32 %v3361_v42, %v7801_v21  ;;  %v3779_v58 = vadd.bf16 %v9035_v45, %v7922_v15 }
 0x739   :  { %4390 = vmatmul.mubr.bf16.gmra.mrb[164].mxu1 %v4026_v4  ;;  %v3169_v4 = vadd.f32 %v3168_v6, %v7797_v53  ;;  %5816 = vtanh.bf16 %v3840_v52  ;;  %v3167_v35 = vadd.f32 %v3166_v25, %v7805_v11  ;;  %v3171_v6 = vadd.f32 %v3170_v43, %v7805_v11 }
 0x73a   :  { %v4028_v44 = vmul.bf16 %v3964_v19, %v9034_v9  ;;  %v9037_v19 = vmul.bf16 1027030327, %v7987_v60  ;;  %v3360_v17 = vadd.f32 %v3359_v10, %v7807_v50  ;;  %v8117_v42 = vpack.c.bf16 %v3362_v5, %v3358_v55 }
 0x73b   :  { %v8110_v1 = vpack.c.bf16 %v3169_v4, %v3165_v49  ;;  %v3843_v59 = vmul.bf16 1061961548, %v3779_v58  ;;  %v3364_v33 = vadd.f32 %v3363_v62, %v7807_v50  ;;  %v8121_v49 = vmul.bf16 %v3600_v20, %v8053_v3 }
 0x73c   :  { %4551 = vmatmul.mubr.bf16.gmra.mrb[164].mxu0 %v4028_v44  ;;  %v3781_v14 = vadd.bf16 %v9037_v19, %v7924_v54  ;;  %v3174_v52 = vpop.f32.mrb[128].mxu1  ;;  %v3367_v9 = vpop.f32.mrb[128].mxu0  ;;  %9038 = vst [vmem:[#allocation54_spill] sm:$0xff] %v8117_v42  ;;  %v8123_v60 = vpack.c.bf16 %v3171_v6, %v3167_v35  ;;  %v9040_v43 = vmul.bf16 1027030327, %v7943_v2  ;;  %v8129_v58 = vmul.bf16 %v3599_v37, %v8068_v8 }
 0x73d   :  { %9036 = vst [vmem:[#allocation53_spill] sm:$0xff] %v8110_v1  ;;  %v3176_v45 = vpop.f32.mrb[129].mxu1  ;;  %v3369_v44 = vpop.f32.mrb[129].mxu0  ;;  %9039 = vst [vmem:[#allocation55_spill] sm:$0xff] %v8121_v49  ;;  %5818 = vtanh.bf16 %v3843_v59  ;;  %v8131_v62 = vpack.c.bf16 %v3364_v33, %v3360_v17  ;;  %v8135_v6 = vmul.bf16 %v3601_v16, %v8070_v0  ;;  %v3602_v37 = vmul.bf16 %v8110_v1, %v8110_v1 }
 0x73e   :  { %v5811_v25 = vpop.eup %5810  ;;  %v3845_v4 = vmul.bf16 1061961548, %v3781_v14  ;;  %v3778_v19 = vadd.bf16 %v9040_v43, %v7918_v22  ;;  %v3178_v38 = vpop.f32.mrb[130].mxu1  ;;  %v9041_v43 = vmul.bf16 1056980736, %v7885_v30 }
 0x73f   :  { %v3371_v10 = vpop.f32.mrb[130].mxu0  ;;  %v5813_v5 = vpop.eup %5812  ;;  %v3967_v55 = vadd.bf16 1065369472, %v5811_v25  ;;  %v3518_v14 = vmul.bf16 1056980736, %v7879_v34 }
 0x740   :  { %v3180_v27 = vpop.f32.mrb[131].mxu1  ;;  %v3373_v20 = vpop.f32.mrb[131].mxu0  ;;  %v3969_v35 = vadd.bf16 1065369472, %v5813_v5  ;;  %5820 = vtanh.bf16 %v3845_v4  ;;  %v3842_v59 = vmul.bf16 1061961548, %v3778_v19  ;;  %v3604_v19 = vmul.bf16 %v8117_v42, %v8117_v42 }
 0x741   :  { %v4031_v25 = vmul.bf16 %v3967_v55, %v9041_v43  ;;  %v3520_v5 = vmul.bf16 1056980736, %v7881_v57  ;;  %v3523_v55 = vmul.bf16 1056980736, %v7922_v15  ;;  %v9042_v34 = vmul.bf16 1027030327, %v7981_v13 }
 0x742   :  { %v5815_v17 = vpop.eup %5814  ;;  %v4033_v41 = vmul.bf16 %v3969_v35, %v3521_v40  ;;  %5822 = vtanh.bf16 %v3842_v59  ;;  %v3368_v59 = vadd.f32 %v3367_v9, %v7801_v21  ;;  %v3177_v13 = vadd.f32 %v3176_v45, %v7805_v11 }
 0x743   :  { %4397 = vmatprep.mubr.bf16.mxu1 %v4031_v25  ;;  %v3966_v2 = vadd.bf16 1065369472, %v5815_v17  ;;  %v3780_v40 = vadd.bf16 %v9042_v34, %v7920_v46  ;;  %v8159_v25 = vmul.bf16 %v3602_v37, %v8110_v1  ;;  %v3179_v34 = vadd.f32 %v3178_v38, %v7797_v53 }
 0x744   :  { %4558 = vmatprep.mubr.bf16.mxu0 %v4033_v41  ;;  %v8154_v57 = vpop.f32.mrb[132].mxu1  ;;  %v8156_v35 = vpop.f32.mrb[132].mxu0  ;;  %v3175_v41 = vadd.f32 %v3174_v52, %v7797_v53  ;;  %v3372_v30 = vadd.f32 %v3371_v10, %v7801_v21  ;;  %v3370_v9 = vadd.f32 %v3369_v44, %v7807_v50  ;;  %v9044_v37 = vmul.bf16 1027030327, %v8028_v32 }
 0x745   :  { %v4030_v43 = vmul.bf16 %v3966_v2, %v3518_v14  ;;  %9043 = vst [vmem:[#allocation56_spill] sm:$0xff] %v8159_v25  ;;  %v8163_v17 = vpop.f32.mrb[133].mxu1  ;;  %v8165_v16 = vpop.f32.mrb[133].mxu0  ;;  %v3844_v33 = vmul.bf16 1061961548, %v3780_v40  ;;  %v3374_v32 = vadd.f32 %v3373_v20, %v7807_v50 }
 0x746   :  { %v5817_v15 = vpop.eup %5816  ;;  %v8170_v14 = vpop.f32.mrb[134].mxu1  ;;  %v3783_v4 = vadd.bf16 %v9044_v37, %v7963_v26  ;;  %v9045_v40 = vmul.bf16 1027030327, %v8034_v31  ;;  %v8185_v10 = vpack.c.bf16 %v3179_v34, %v3175_v41  ;;  %v8187_v49 = vpack.c.bf16 %v3372_v30, %v3368_v59 }
 0x747   :  { %v8172_v2 = vpop.f32.mrb[134].mxu0  ;;  %4398 = vmatmul.mubr.bf16.gmra.mrb[168].mxu1 %v4030_v43  ;;  %v3968_v52 = vadd.bf16 1065369472, %v5817_v15  ;;  %v8181_v1 = vpop.f32.mrb[135].mxu1  ;;  %5824 = vtanh.bf16 %v3844_v33  ;;  %v3181_v43 = vadd.f32 %v3180_v27, %v7805_v11  ;;  %v8192_v31 = vmul.bf16 %v3604_v19, %v8117_v42 }
 0x748   :  { %v3785_v45 = vadd.bf16 %v9045_v40, %v7972_v39  ;;  %v8183_v38 = vpop.f32.mrb[135].mxu0  ;;  %9046 = vst [vmem:[#allocation57_spill] sm:$0xff] %v8185_v10  ;;  %9047 = vst [vmem:[#allocation58_spill] sm:$0xff] %v8187_v49  ;;  %v3847_v15 = vmul.bf16 1061961548, %v3783_v4  ;;  %v5819_v37 = vpop.eup %5818  ;;  %v3603_v40 = vmul.bf16 %v8123_v60, %v8123_v60  ;;  %v3605_v33 = vmul.bf16 %v8131_v62, %v8131_v62 }
 0x749   :  { %v4032_v44 = vmul.bf16 %v3968_v52, %v3520_v5  ;;  %9048 = vst [vmem:[#allocation59_spill] sm:$0xff] %v8192_v31  ;;  %v8198_v41 = vpack.c.bf16 %v3181_v43, %v3177_v13  ;;  %v3971_v27 = vadd.bf16 1065369472, %v5819_v37  ;;  %v8200_v5 = vpack.c.bf16 %v3374_v32, %v3370_v9 }
 0x74a   :  { %v3849_v3 = vmul.bf16 1061961548, %v3785_v45  ;;  %5826 = vtanh.bf16 %v3847_v15  ;;  %v9050_v20 = vmul.bf16 1027030327, %v7998_v63  ;;  %v3525_v19 = vmul.bf16 1056980736, %v7924_v54 }
 0x74b   :  { %9049 = vst [vmem:[#allocation60_spill] sm:$0xff] %v8198_v41  ;;  %v5821_v30 = vpop.eup %5820  ;;  %4559 = vmatmul.mubr.bf16.gmra.mrb[168].mxu0 %v4032_v44  ;;  %v4035_v13 = vmul.bf16 %v3971_v27, %v3523_v55  ;;  %v3522_v45 = vmul.bf16 1056980736, %v7918_v22  ;;  %v8217_v54 = vmul.bf16 %v3603_v40, %v8123_v60  ;;  %v8222_v55 = vmul.bf16 %v3605_v33, %v8131_v62 }
 0x74c   :  { %v3782_v4 = vadd.bf16 %v9050_v20, %v7956_v29  ;;  %v3973_v59 = vadd.bf16 1065369472, %v5821_v30  ;;  %5828 = vtanh.bf16 %v3849_v3  ;;  %v8206_v34 = vpop.f32.mrb[136].mxu1  ;;  %v8208_v52 = vpop.f32.mrb[136].mxu0  ;;  %v3524_v3 = vmul.bf16 1056980736, %v7920_v46 }
 0x74d   :  { %v8211_v44 = vpop.f32.mrb[137].mxu1  ;;  %v8213_v9 = vpop.f32.mrb[137].mxu0  ;;  %4405 = vmatprep.mubr.bf16.mxu1 %v4035_v13  ;;  %v3606_v20 = vmul.bf16 %v8185_v10, %v8185_v10  ;;  %v3608_v40 = vmul.bf16 %v8187_v49, %v8187_v49  ;;  %v3527_v46 = vmul.bf16 1056980736, %v7963_v26  ;;  %v3187_v26 = vadd.f32 %v8163_v17, %v7805_v11 }
 0x74e   :  { %v3846_v43 = vmul.bf16 1061961548, %v3782_v4  ;;  %v5823_v15 = vpop.eup %5822  ;;  %v4037_v32 = vmul.bf16 %v3973_v59, %v3525_v19  ;;  %v8224_v30 = vpop.f32.mrb[138].mxu1  ;;  %v9051_v4 = vmul.bf16 1027030327, %v8025_v47  ;;  %v3189_v47 = vadd.f32 %v8170_v14, %v7797_v53 }
 0x74f   :  { %v3970_v22 = vadd.bf16 1065369472, %v5823_v15  ;;  %v8226_v27 = vpop.f32.mrb[138].mxu0  ;;  %v8236_v19 = vpop.f32.mrb[139].mxu1  ;;  %v3185_v15 = vadd.f32 %v8154_v57, %v7797_v53  ;;  %v9052_v57 = vmul.bf16 1027030327, %v8086_v24  ;;  %v3191_v17 = vadd.f32 %v8181_v1, %v7805_v11 }
 0x750   :  { %5830 = vtanh.bf16 %v3846_v43  ;;  %4566 = vmatprep.mubr.bf16.mxu0 %v4037_v32  ;;  %v3784_v33 = vadd.bf16 %v9051_v4, %v7958_v48  ;;  %v8238_v59 = vpop.f32.mrb[139].mxu0  ;;  %v3607_v43 = vmul.bf16 %v8198_v41, %v8198_v41  ;;  %v3378_v32 = vadd.f32 %v8156_v35, %v7801_v21 }
 0x751   :  { %v4034_v13 = vmul.bf16 %v3970_v22, %v3522_v45  ;;  %v3382_v4 = vadd.f32 %v8172_v2, %v7801_v21  ;;  %v3380_v22 = vadd.f32 %v8165_v16, %v7807_v50  ;;  %v3787_v63 = vadd.bf16 %v9052_v57, %v8018_v12 }
 0x752   :  { %v3848_v37 = vmul.bf16 1061961548, %v3784_v33  ;;  %v5825_v45 = vpop.eup %5824  ;;  %v9053_v35 = vmul.bf16 1027030327, %v8089_v23  ;;  %v8262_v31 = vpack.c.bf16 %v3189_v47, %v3185_v15  ;;  %v8270_v57 = vpack.c.bf16 %v3191_v17, %v3187_v26 }
 0x753   :  { %4406 = vmatmul.mubr.bf16.gmra.mrb[172].mxu1 %v4034_v13  ;;  %v3972_v14 = vadd.bf16 1065369472, %v5825_v45  ;;  %v8264_v2 = vpack.c.bf16 %v3382_v4, %v3378_v32  ;;  %v3851_v42 = vmul.bf16 1061961548, %v3787_v63  ;;  %v3384_v23 = vadd.f32 %v8183_v38, %v7807_v50 }
 0x754   :  { %v3789_v33 = vadd.bf16 %v9053_v35, %v8020_v61  ;;  %5832 = vtanh.bf16 %v3848_v37  ;;  %9054 = vst [vmem:[#allocation61_spill] sm:$0xff] %v8262_v31  ;;  %v8266_v13 = vpop.f32.mrb[140].mxu1  ;;  %v8268_v16 = vpop.f32.mrb[140].mxu0  ;;  %v8279_v32 = vmul.bf16 %v3606_v20, %v8185_v10  ;;  %v8282_v47 = vmul.bf16 %v3608_v40, %v8187_v49 }
 0x755   :  { %9055 = vst [vmem:[#allocation62_spill] sm:$0xff] %v8264_v2  ;;  %v8274_v35 = vpop.f32.mrb[141].mxu1  ;;  %v8276_v1 = vpop.f32.mrb[141].mxu0  ;;  %v4036_v15 = vmul.bf16 %v3972_v14, %v3524_v3  ;;  %v3609_v63 = vmul.bf16 %v8200_v5, %v8200_v5  ;;  %5834 = vtanh.bf16 %v3851_v42  ;;  %v8293_v3 = vpack.c.bf16 %v3384_v23, %v3380_v22 }
 0x756   :  { %v3853_v24 = vmul.bf16 1061961548, %v3789_v33  ;;  %v5827_v37 = vpop.eup %5826  ;;  %9056 = vst [vmem:[#allocation63_spill] sm:$0xff] %v8279_v32  ;;  %9057 = vst [vmem:[#allocation64_spill] sm:$0xff] %v8282_v47  ;;  %v8286_v26 = vpop.f32.mrb[142].mxu1  ;;  %v8291_v33 = vmul.bf16 %v3607_v43, %v8198_v41 }
 0x757   :  { %v8288_v4 = vpop.f32.mrb[142].mxu0  ;;  %v5829_v38 = vpop.eup %5828  ;;  %v3975_v45 = vadd.bf16 1065369472, %v5827_v37  ;;  %4567 = vmatmul.mubr.bf16.gmra.mrb[172].mxu0 %v4036_v15  ;;  %v3529_v14 = vmul.bf16 1056980736, %v7972_v39 }
 0x758   :  { %v8295_v20 = vpop.f32.mrb[143].mxu1  ;;  %v8297_v17 = vpop.f32.mrb[143].mxu0  ;;  %v3977_v49 = vadd.bf16 1065369472, %v5829_v38  ;;  %5836 = vtanh.bf16 %v3853_v24  ;;  %v3526_v43 = vmul.bf16 1056980736, %v7956_v29  ;;  %v8311_v24 = vmul.bf16 %v3609_v63, %v8200_v5 }
 0x759   :  { %v4039_v37 = vmul.bf16 %v3975_v45, %v3527_v46  ;;  %v9058_v42 = vmul.bf16 1027030327, %v8058_v18  ;;  %v3528_v15 = vmul.bf16 1056980736, %v7958_v48  ;;  %v3610_v18 = vmul.bf16 %v8262_v31, %v8262_v31 }
 0x75a   :  { %v4041_v40 = vmul.bf16 %v3977_v49, %v3529_v14  ;;  %v3612_v38 = vmul.bf16 %v8264_v2, %v8264_v2  ;;  %v3531_v45 = vmul.bf16 1056980736, %v8018_v12  ;;  %v9059_v48 = vmul.bf16 1027030327, %v8066_v56 }
 0x75b   :  { %v3786_v22 = vadd.bf16 %v9058_v42, %v8010_v51  ;;  %v5831_v23 = vpop.eup %5830  ;;  %4413 = vmatprep.mubr.bf16.mxu1 %v4039_v37  ;;  %v3388_v42 = vadd.f32 %v8208_v52, %v7801_v21  ;;  %v3197_v56 = vadd.f32 %v8211_v44, %v7805_v11  ;;  %v3390_v52 = vadd.f32 %v8213_v9, %v7807_v50 }
 0x75c   :  { %v3974_v46 = vadd.bf16 1065369472, %v5831_v23  ;;  %4574 = vmatprep.mubr.bf16.mxu0 %v4041_v40  ;;  %v3788_v49 = vadd.bf16 %v9059_v48, %v8012_v28  ;;  %v8321_v14 = vpop.f32.mrb[144].mxu1  ;;  %v8323_v37 = vpop.f32.mrb[144].mxu0  ;;  %v3195_v40 = vadd.f32 %v8206_v34, %v7797_v53  ;;  %v3199_v48 = vadd.f32 %v8224_v30, %v7797_v53 }
 0x75d   :  { %v3850_v29 = vmul.bf16 1061961548, %v3786_v22  ;;  %v8329_v22 = vpop.f32.mrb[145].mxu1  ;;  %v8331_v23 = vpop.f32.mrb[145].mxu0  ;;  %v9061_v44 = vmul.bf16 1027030327, %v8135_v6  ;;  %v3394_v6 = vadd.f32 %v8238_v59, %v7807_v50 }
 0x75e   :  { %v4038_v63 = vmul.bf16 %v3974_v46, %v3526_v43  ;;  %v3852_v12 = vmul.bf16 1061961548, %v3788_v49  ;;  %v3392_v43 = vadd.f32 %v8226_v27, %v7801_v21  ;;  %v8339_v46 = vpop.f32.mrb[146].mxu1  ;;  %v8341_v34 = vpop.f32.mrb[146].mxu0  ;;  %v9060_v49 = vmul.bf16 1027030327, %v8129_v58 }
 0x75f   :  { %5838 = vtanh.bf16 %v3850_v29  ;;  %v5833_v29 = vpop.eup %5832  ;;  %v3793_v30 = vadd.bf16 %v9061_v44, %v8070_v0  ;;  %v3201_v27 = vadd.f32 %v8236_v19, %v7805_v11  ;;  %v8353_v41 = vpop.f32.mrb[147].mxu1  ;;  %v8366_v19 = vmul.bf16 %v3610_v18, %v8262_v31 }
 0x760   :  { %4414 = vmatmul.mubr.bf16.gmra.mrb[176].mxu1 %v4038_v63  ;;  %v3791_v25 = vadd.bf16 %v9060_v49, %v8068_v8  ;;  %v8355_v39 = vpop.f32.mrb[147].mxu0  ;;  %v3976_v10 = vadd.bf16 1065369472, %v5833_v29  ;;  %5840 = vtanh.bf16 %v3852_v12  ;;  %v8357_v63 = vpack.c.bf16 %v3199_v48, %v3195_v40  ;;  %v5835_v44 = vpop.eup %5834 }
 0x761   :  { %9062 = vst [vmem:[#allocation65_spill] sm:$0xff] %v8355_v39  ;;  %v8359_v9 = vpack.c.bf16 %v3392_v43, %v3388_v42  ;;  %v3857_v58 = vmul.bf16 1061961548, %v3793_v30  ;;  %v8361_v49 = vpack.c.bf16 %v3201_v27, %v3197_v56  ;;  %9065 = vst [vmem:[#allocation68_spill] sm:$0xff] %v8366_v19  ;;  %v8369_v39 = vmul.bf16 %v3612_v38, %v8264_v2 }
 0x762   :  { %9063 = vst [vmem:[#allocation66_spill] sm:$0xff] %v8357_v63  ;;  %v3855_v47 = vmul.bf16 1061961548, %v3791_v25  ;;  %v4040_v32 = vmul.bf16 %v3976_v10, %v3528_v15  ;;  %v3611_v40 = vmul.bf16 %v8270_v57, %v8270_v57  ;;  %v3979_v12 = vadd.bf16 1065369472, %v5835_v44  ;;  %v9068_v44 = vld [vmem:[#allocation52_spill] sm:$0xff] }
 0x763   :  { %9064 = vst [vmem:[#allocation67_spill] sm:$0xff] %v8359_v9  ;;  %9066 = vst [vmem:[#allocation69_spill] sm:$0xff] %v8369_v39  ;;  %v5837_v42 = vpop.eup %5836  ;;  %v3613_v25 = vmul.bf16 %v8293_v3, %v8293_v3  ;;  %v8375_v56 = vpack.c.bf16 %v3394_v6, %v3390_v52  ;;  %v3533_v10 = vmul.bf16 1056980736, %v8020_v61  ;;  %v3614_v15 = vmul.bf16 %v8357_v63, %v8357_v63 }
 0x764   :  { %5842 = vtanh.bf16 %v3855_v47  ;;  %4575 = vmatmul.mubr.bf16.gmra.mrb[176].mxu0 %v4040_v32  ;;  %v3981_v59 = vadd.bf16 1065369472, %v5837_v42  ;;  %v8380_v18 = vpop.f32.mrb[148].mxu1  ;;  %v8382_v38 = vpop.f32.mrb[148].mxu0  ;;  %v4043_v43 = vmul.bf16 %v3979_v12, %v3531_v45  ;;  %v3530_v29 = vmul.bf16 1056980736, %v8010_v51 }
 0x765   :  { %5844 = vtanh.bf16 %v3857_v58  ;;  %v9067_v47 = vmul.bf16 1027030327, %v8092_v36  ;;  %v8389_v52 = vpop.f32.mrb[149].mxu1  ;;  %v8391_v61 = vpop.f32.mrb[149].mxu0  ;;  %v8396_v6 = vmul.bf16 %v3611_v40, %v8270_v57  ;;  %v8399_v45 = vmul.bf16 %v3613_v25, %v8293_v3  ;;  %v9069_v42 = vld [vmem:[#allocation55_spill] sm:$0xff] }
 0x766   :  { %v4045_v58 = vmul.bf16 %v3981_v59, %v3533_v10  ;;  %4421 = vmatprep.mubr.bf16.mxu1 %v4043_v43  ;;  %v3532_v51 = vmul.bf16 1056980736, %v8012_v28  ;;  %v9070_v12 = vmul.bf16 1027030327, %v9069_v42  ;;  %v8405_v48 = vpop.f32.mrb[150].mxu1  ;;  %v8407_v30 = vpop.f32.mrb[150].mxu0  ;;  %v8410_v40 = vmul.bf16 %v3614_v15, %v8357_v63 }
 0x767   :  { %v3790_v32 = vadd.bf16 %v9067_v47, %v8051_v7  ;;  %v3616_v25 = vmul.bf16 %v8359_v9, %v8359_v9  ;;  %v3535_v10 = vmul.bf16 1056980736, %v8068_v8  ;;  %v3615_v28 = vmul.bf16 %v8361_v49, %v8361_v49  ;;  %v8417_v59 = vpop.f32.mrb[151].mxu1  ;;  %v8419_v43 = vpop.f32.mrb[151].mxu0 }
 0x768   :  { %v3792_v47 = vadd.bf16 %v9070_v12, %v9068_v44  ;;  %4582 = vmatprep.mubr.bf16.mxu0 %v4045_v58  ;;  %v3205_v58 = vadd.f32 %v8266_v13, %v7797_v53  ;;  %v3398_v15 = vadd.f32 %v8268_v16, %v7801_v21  ;;  %v3209_v12 = vadd.f32 %v8286_v26, %v7797_v53 }
 0x769   :  { %v3854_v36 = vmul.bf16 1061961548, %v3790_v32  ;;  %v3402_v8 = vadd.f32 %v8288_v4, %v7801_v21  ;;  %v9071_v63 = vmul.bf16 1027030327, %v8217_v54  ;;  %v9072_v13 = vmul.bf16 1027030327, %v8222_v55 }
 0x76a   :  { %v5839_v27 = vpop.eup %5838  ;;  %v3856_v42 = vmul.bf16 1061961548, %v3792_v47  ;;  %v8437_v19 = vpack.c.bf16 %v3209_v12, %v3205_v58  ;;  %v3404_v55 = vadd.f32 %v8297_v17, %v7807_v50  ;;  %v8456_v58 = vmul.bf16 %v3616_v25, %v8359_v9  ;;  %v9077_v9 = vld [vmem:[#allocation56_spill] sm:$0xff] }
 0x76b   :  { %v3978_v32 = vadd.bf16 1065369472, %v5839_v27  ;;  %5846 = vtanh.bf16 %v3854_v36  ;;  %v3795_v39 = vadd.bf16 %v9071_v63, %v8123_v60  ;;  %v5841_v2 = vpop.eup %5840  ;;  %v3207_v36 = vadd.f32 %v8274_v35, %v7805_v11 }
 0x76c   :  { %5848 = vtanh.bf16 %v3856_v42  ;;  %v3797_v16 = vadd.bf16 %v9072_v13, %v8131_v62  ;;  %v3980_v47 = vadd.bf16 1065369472, %v5841_v2  ;;  %9073 = vst [vmem:[#allocation52_spill] sm:$0xff] %v8437_v19  ;;  %v8439_v26 = vpack.c.bf16 %v3402_v8, %v3398_v15  ;;  %v8441_v31 = vpop.f32.mrb[152].mxu1  ;;  %v8443_v54 = vpop.f32.mrb[152].mxu0 }
 0x76d   :  { %v4042_v27 = vmul.bf16 %v3978_v32, %v3530_v29  ;;  %v3859_v4 = vmul.bf16 1061961548, %v3795_v39  ;;  %v3400_v63 = vadd.f32 %v8276_v1, %v7807_v50  ;;  %v3211_v35 = vadd.f32 %v8295_v20, %v7805_v11  ;;  %v8451_v2 = vpop.f32.mrb[153].mxu1  ;;  %v8453_v32 = vpop.f32.mrb[153].mxu0 }
 0x76e   :  { %v3861_v29 = vmul.bf16 1061961548, %v3797_v16  ;;  %9074 = vst [vmem:[#allocation55_spill] sm:$0xff] %v8451_v2  ;;  %9075 = vst [vmem:[#allocation70_spill] sm:$0xff] %v8453_v32  ;;  %v4044_v42 = vmul.bf16 %v3980_v47, %v3532_v51  ;;  %v3617_v15 = vmul.bf16 %v8375_v56, %v8375_v56  ;;  %v8460_v1 = vpop.f32.mrb[154].mxu1  ;;  %v8462_v12 = vpop.f32.mrb[154].mxu0 }
 0x76f   :  { %4422 = vmatmul.mubr.bf16.gmra.mrb[180].mxu1 %v4042_v27  ;;  %v5843_v39 = vpop.eup %5842  ;;  %5850 = vtanh.bf16 %v3859_v4  ;;  %v8464_v17 = vpack.c.bf16 %v3211_v35, %v3207_v36  ;;  %v8466_v27 = vpack.c.bf16 %v3404_v55, %v3400_v63  ;;  %v8468_v13 = vpop.f32.mrb[155].mxu1  ;;  %v3537_v16 = vmul.bf16 1056980736, %v8070_v0  ;;  %v9076_v4 = vld [vmem:[#allocation53_spill] sm:$0xff] }
 0x770   :  { %v5845_v20 = vpop.eup %5844  ;;  %v3983_v8 = vadd.bf16 1065369472, %v5843_v39  ;;  %5852 = vtanh.bf16 %v3861_v29  ;;  %v8470_v51 = vpop.f32.mrb[155].mxu0  ;;  %4583 = vmatmul.mubr.bf16.gmra.mrb[180].mxu0 %v4044_v42  ;;  %v9078_v32 = vmul.bf16 1027030327, %v9077_v9  ;;  %v3618_v35 = vmul.bf16 %v8437_v19, %v8437_v19 }
 0x771   :  { %v3985_v47 = vadd.bf16 1065369472, %v5845_v20  ;;  %v3534_v63 = vmul.bf16 1056980736, %v8051_v7  ;;  %v8483_v42 = vmul.bf16 %v3615_v28, %v8361_v49  ;;  %v8487_v9 = vmul.bf16 %v3617_v15, %v8375_v56  ;;  %v9080_v7 = vld [vmem:[#allocation59_spill] sm:$0xff] }
 0x772   :  { %v3794_v2 = vadd.bf16 %v9078_v32, %v9076_v4  ;;  %v4047_v36 = vmul.bf16 %v3983_v8, %v3535_v10  ;;  %v3536_v10 = vmul.bf16 1056980736, %v9068_v44  ;;  %v9079_v32 = vld [vmem:[#allocation54_spill] sm:$0xff]  ;;  %v9081_v8 = vmul.bf16 1027030327, %v9080_v7 }
 0x773   :  { %v4049_v39 = vmul.bf16 %v3985_v47, %v3537_v16  ;;  %v3620_v16 = vmul.bf16 %v8439_v26, %v8439_v26  ;;  %v3539_v28 = vmul.bf16 1056980736, %v8123_v60  ;;  %v8502_v44 = vmul.bf16 %v3618_v35, %v8437_v19 }
 0x774   :  { %v3858_v0 = vmul.bf16 1061961548, %v3794_v2  ;;  %4429 = vmatprep.mubr.bf16.mxu1 %v4047_v36  ;;  %v3796_v29 = vadd.bf16 %v9081_v8, %v9079_v32  ;;  %v3541_v2 = vmul.bf16 1056980736, %v8131_v62  ;;  %v8497_v47 = vpop.f32.mrb[156].mxu1  ;;  %v8499_v15 = vpop.f32.mrb[156].mxu0  ;;  %v3215_v7 = vadd.f32 %v8321_v14, %v7797_v53 }
 0x775   :  { %4590 = vmatprep.mubr.bf16.mxu0 %v4049_v39  ;;  %9082 = vst [vmem:[#allocation53_spill] sm:$0xff] %v8497_v47  ;;  %9083 = vst [vmem:[#allocation56_spill] sm:$0xff] %v8499_v15  ;;  %v3219_v39 = vadd.f32 %v8339_v46, %v7797_v53  ;;  %v3408_v60 = vadd.f32 %v8323_v37, %v7801_v21  ;;  %v3412_v62 = vadd.f32 %v8341_v34, %v7801_v21  ;;  %v8515_v35 = vpop.f32.mrb[157].mxu1  ;;  %v8517_v19 = vpop.f32.mrb[157].mxu0 }
 0x776   :  { %v5847_v25 = vpop.eup %5846  ;;  %5854 = vtanh.bf16 %v3858_v0  ;;  %v3860_v20 = vmul.bf16 1061961548, %v3796_v29  ;;  %v9084_v0 = vld [vmem:[#allocation60_spill] sm:$0xff]  ;;  %9086 = vst [vmem:[#allocation54_spill] sm:$0xff] %v8515_v35  ;;  %9087 = vst [vmem:[#allocation59_spill] sm:$0xff] %v8517_v19  ;;  %v3217_v46 = vadd.f32 %v8329_v22, %v7805_v11  ;;  %v8523_v47 = vpop.f32.mrb[158].mxu1 }
 0x777   :  { %v3982_v36 = vadd.bf16 1065369472, %v5847_v25  ;;  %v5849_v8 = vpop.eup %5848  ;;  %v9085_v25 = vmul.bf16 1027030327, %v8291_v33  ;;  %v8521_v29 = vpack.c.bf16 %v3219_v39, %v3215_v7  ;;  %v8525_v37 = vpop.f32.mrb[158].mxu0  ;;  %v8527_v34 = vpack.c.bf16 %v3412_v62, %v3408_v60  ;;  %v9089_v39 = vld [vmem:[#allocation65_spill] sm:$0xff] }
 0x778   :  { %v3984_v15 = vadd.bf16 1065369472, %v5849_v8  ;;  %5856 = vtanh.bf16 %v3860_v20  ;;  %v8532_v19 = vpop.f32.mrb[159].mxu1  ;;  %v3410_v7 = vadd.f32 %v8331_v23, %v7807_v50  ;;  %v3221_v20 = vadd.f32 %v8353_v41, %v7805_v11 }
 0x779   :  { %v3799_v55 = vadd.bf16 %v9085_v25, %v9084_v0  ;;  %v4046_v14 = vmul.bf16 %v3982_v36, %v3534_v63  ;;  %v9088_v25 = vmul.bf16 1027030327, %v8311_v24  ;;  %v8534_v63 = vpop.f32.mrb[159].mxu0  ;;  %v8543_v24 = vmul.bf16 %v3620_v16, %v8439_v26 }
 0x77a   :  { %v5851_v36 = vpop.eup %5850  ;;  %v4048_v22 = vmul.bf16 %v3984_v15, %v3536_v10  ;;  %v3619_v10 = vmul.bf16 %v8464_v17, %v8464_v17  ;;  %v8547_v15 = vpack.c.bf16 %v3221_v20, %v3217_v46  ;;  %v9091_v20 = vld [vmem:[#allocation63_spill] sm:$0xff] }
 0x77b   :  { %v3863_v33 = vmul.bf16 1061961548, %v3799_v55  ;;  %v3801_v35 = vadd.bf16 %v9088_v25, %v8200_v5  ;;  %4430 = vmatmul.mubr.bf16.gmra.mrb[184].mxu1 %v4046_v14  ;;  %v3414_v55 = vadd.f32 %v9089_v39, %v7807_v50  ;;  %v5853_v8 = vpop.eup %5852  ;;  %v3987_v60 = vadd.bf16 1065369472, %v5851_v36 }
 0x77c   :  { %4591 = vmatmul.mubr.bf16.gmra.mrb[184].mxu0 %v4048_v22  ;;  %v3989_v25 = vadd.bf16 1065369472, %v5853_v8  ;;  %v3621_v39 = vmul.bf16 %v8466_v27, %v8466_v27  ;;  %v3622_v36 = vmul.bf16 %v8521_v29, %v8521_v29  ;;  %v3540_v22 = vmul.bf16 1056980736, %v9079_v32  ;;  %v9093_v8 = vld [vmem:[#allocation58_spill] sm:$0xff] }
 0x77d   :  { %5858 = vtanh.bf16 %v3863_v33  ;;  %v3865_v62 = vmul.bf16 1061961548, %v3801_v35  ;;  %v8549_v23 = vpack.c.bf16 %v3414_v55, %v3410_v7  ;;  %v4051_v14 = vmul.bf16 %v3987_v60, %v3539_v28  ;;  %v9090_v7 = vld [vmem:[#allocation57_spill] sm:$0xff]  ;;  %v9094_v60 = vld [vmem:[#allocation64_spill] sm:$0xff] }
 0x77e   :  { %v4053_v33 = vmul.bf16 %v3989_v25, %v3541_v2  ;;  %v3538_v35 = vmul.bf16 1056980736, %v9076_v4  ;;  %v9092_v28 = vmul.bf16 1027030327, %v9091_v20  ;;  %v8568_v4 = vmul.bf16 %v3619_v10, %v8464_v17 }
 0x77f   :  { %5860 = vtanh.bf16 %v3865_v62  ;;  %4437 = vmatprep.mubr.bf16.mxu1 %v4051_v14  ;;  %v9095_v62 = vmul.bf16 1027030327, %v9094_v60  ;;  %v3543_v25 = vmul.bf16 1056980736, %v9084_v0  ;;  %v3545_v14 = vmul.bf16 1056980736, %v8200_v5 }
 0x780   :  { %v3798_v55 = vadd.bf16 %v9092_v28, %v9090_v7  ;;  %4598 = vmatprep.mubr.bf16.mxu0 %v4053_v33  ;;  %v8573_v32 = vmul.bf16 %v3621_v39, %v8466_v27  ;;  %v8576_v60 = vmul.bf16 %v3622_v36, %v8521_v29  ;;  %v3225_v10 = vadd.f32 %v8380_v18, %v7797_v53 }
 0x781   :  { %v3800_v41 = vadd.bf16 %v9095_v62, %v9093_v8  ;;  %v5855_v16 = vpop.eup %5854  ;;  %v3624_v62 = vmul.bf16 %v8527_v34, %v8527_v34  ;;  %v3229_v0 = vadd.f32 %v8405_v48, %v7797_v53  ;;  %v3418_v5 = vadd.f32 %v8382_v38, %v7801_v21 }
 0x782   :  { %v3986_v20 = vadd.bf16 1065369472, %v5855_v16  ;;  %v3862_v28 = vmul.bf16 1061961548, %v3798_v55  ;;  %v3623_v16 = vmul.bf16 %v8547_v15, %v8547_v15  ;;  %v9096_v18 = vmul.bf16 1027030327, %v8396_v6 }
 0x783   :  { %v3864_v46 = vmul.bf16 1061961548, %v3800_v41  ;;  %v3422_v41 = vadd.f32 %v8407_v30, %v7801_v21  ;;  %v5857_v39 = vpop.eup %5856  ;;  %v8590_v36 = vpack.c.bf16 %v3229_v0, %v3225_v10  ;;  %v9097_v38 = vmul.bf16 1027030327, %v8399_v45 }
 0x784   :  { %v4050_v33 = vmul.bf16 %v3986_v20, %v3538_v35  ;;  %5862 = vtanh.bf16 %v3862_v28  ;;  %v3803_v55 = vadd.bf16 %v9096_v18, %v8270_v57  ;;  %v3988_v48 = vadd.bf16 1065369472, %v5857_v39 }
 0x785   :  { %5864 = vtanh.bf16 %v3864_v46  ;;  %v8595_v35 = vpack.c.bf16 %v3422_v41, %v3418_v5  ;;  %v3805_v20 = vadd.bf16 %v9097_v38, %v8293_v3  ;;  %v3231_v30 = vadd.f32 %v8417_v59, %v7805_v11  ;;  %v9098_v38 = vld [vmem:[#allocation61_spill] sm:$0xff] }
 0x786   :  { %4438 = vmatmul.mubr.bf16.gmra.mrb[188].mxu1 %v4050_v33  ;;  %v3227_v46 = vadd.f32 %v8389_v52, %v7805_v11  ;;  %v3420_v10 = vadd.f32 %v8391_v61, %v7807_v50  ;;  %v3867_v6 = vmul.bf16 1061961548, %v3803_v55  ;;  %v3424_v0 = vadd.f32 %v8419_v43, %v7807_v50 }
 0x787   :  { %v4052_v33 = vmul.bf16 %v3988_v48, %v3540_v22  ;;  %v8609_v5 = vmul.bf16 %v3624_v62, %v8527_v34  ;;  %v3869_v41 = vmul.bf16 1061961548, %v3805_v20  ;;  %v3625_v59 = vmul.bf16 %v8549_v23, %v8549_v23  ;;  %v9099_v20 = vld [vmem:[#allocation68_spill] sm:$0xff] }
 0x788   :  { %v5859_v28 = vpop.eup %5858  ;;  %5866 = vtanh.bf16 %v3867_v6  ;;  %v8613_v18 = vpack.c.bf16 %v3231_v30, %v3227_v46  ;;  %v8615_v52 = vpack.c.bf16 %v3424_v0, %v3420_v10  ;;  %v8618_v43 = vmul.bf16 %v3623_v16, %v8547_v15  ;;  %v9101_v16 = vld [vmem:[#allocation62_spill] sm:$0xff]  ;;  %v9102_v6 = vld [vmem:[#allocation69_spill] sm:$0xff] }
 0x789   :  { %v3991_v45 = vadd.bf16 1065369472, %v5859_v28  ;;  %4599 = vmatmul.mubr.bf16.gmra.mrb[188].mxu0 %v4052_v33  ;;  %5868 = vtanh.bf16 %v3869_v41  ;;  %v3747_v22 = vmul.bf16 1027030327, %v8568_v4  ;;  %v3749_v62 = vmul.bf16 1027030327, %v8573_v32 }
 0x78a   :  { %v5861_v39 = vpop.eup %5860  ;;  %v3626_v48 = vmul.bf16 %v8590_v36, %v8590_v36  ;;  %v9100_v30 = vmul.bf16 1027030327, %v9099_v20  ;;  %v3542_v10 = vmul.bf16 1056980736, %v9090_v7  ;;  %v9103_v0 = vmul.bf16 1027030327, %v9102_v6 }
 0x78b   :  { %v4055_v61 = vmul.bf16 %v3991_v45, %v3543_v25  ;;  %v3993_v55 = vadd.bf16 1065369472, %v5861_v39  ;;  %v8634_v41 = vmul.bf16 %v3625_v59, %v8549_v23  ;;  %v3544_v39 = vmul.bf16 1056980736, %v9093_v8 }
 0x78c   :  { %v3802_v28 = vadd.bf16 %v9100_v30, %v9098_v38  ;;  %v3804_v33 = vadd.bf16 %v9103_v0, %v9101_v16  ;;  %v3751_v20 = vmul.bf16 1027030327, %v8618_v43  ;;  %v3547_v7 = vmul.bf16 1056980736, %v8270_v57 }
 0x78d   :  { %4445 = vmatprep.mubr.bf16.mxu1 %v4055_v61  ;;  %v4057_v25 = vmul.bf16 %v3993_v55, %v3545_v14  ;;  %v3628_v14 = vmul.bf16 %v8595_v35, %v8595_v35  ;;  %v8642_v30 = vmul.bf16 %v3626_v48, %v8590_v36  ;;  %v3235_v59 = vadd.f32 %v8441_v31, %v7797_v53  ;;  %v9104_v48 = vld [vmem:[#allocation55_spill] sm:$0xff] }
 0x78e   :  { %v3866_v2 = vmul.bf16 1061961548, %v3802_v28  ;;  %v3868_v61 = vmul.bf16 1061961548, %v3804_v33  ;;  %v3239_v8 = vadd.f32 %v8460_v1, %v7797_v53  ;;  %v3428_v6 = vadd.f32 %v8443_v54, %v7801_v21 }
 0x78f   :  { %4606 = vmatprep.mubr.bf16.mxu0 %v4057_v25  ;;  %v5863_v55 = vpop.eup %5862  ;;  %v3432_v57 = vadd.f32 %v8462_v12, %v7801_v21  ;;  %v3237_v33 = vadd.f32 %v9104_v48, %v7805_v11  ;;  %v9105_v31 = vmul.bf16 1027030327, %v8483_v42  ;;  %v3241_v12 = vadd.f32 %v8468_v13, %v7805_v11 }
 0x790   :  { %5870 = vtanh.bf16 %v3866_v2  ;;  %v5865_v28 = vpop.eup %5864  ;;  %v3990_v25 = vadd.bf16 1065369472, %v5863_v55  ;;  %v8654_v2 = vpack.c.bf16 %v3239_v8, %v3235_v59  ;;  %v3434_v8 = vadd.f32 %v8470_v51, %v7807_v50 }
 0x791   :  { %5872 = vtanh.bf16 %v3868_v61  ;;  %v3992_v0 = vadd.bf16 1065369472, %v5865_v28  ;;  %v3807_v45 = vadd.bf16 %v9105_v31, %v8361_v49  ;;  %v8659_v46 = vpack.c.bf16 %v3432_v57, %v3428_v6  ;;  %v9107_v28 = vld [vmem:[#allocation70_spill] sm:$0xff] }
 0x792   :  { %v4054_v1 = vmul.bf16 %v3990_v25, %v3542_v10  ;;  %v9106_v61 = vmul.bf16 1027030327, %v8487_v9  ;;  %v3430_v48 = vadd.f32 %v9107_v28, %v7807_v50  ;;  %v8671_v10 = vmul.bf16 %v3628_v14, %v8595_v35  ;;  %v9114_v31 = vld [vmem:[#allocation54_spill] sm:$0xff] }
 0x793   :  { %v4056_v55 = vmul.bf16 %v3992_v0, %v3544_v39  ;;  %v3871_v59 = vmul.bf16 1061961548, %v3807_v45  ;;  %v5867_v42 = vpop.eup %5866  ;;  %v3627_v9 = vmul.bf16 %v8613_v18, %v8613_v18  ;;  %v8675_v6 = vpack.c.bf16 %v3241_v12, %v3237_v33 }
 0x794   :  { %v3809_v54 = vadd.bf16 %v9106_v61, %v8375_v56  ;;  %4446 = vmatmul.mubr.bf16.gmra.mrb[192].mxu1 %v4054_v1  ;;  %v5869_v13 = vpop.eup %5868  ;;  %v3995_v39 = vadd.bf16 1065369472, %v5867_v42  ;;  %v3629_v45 = vmul.bf16 %v8615_v52, %v8615_v52  ;;  %v8679_v57 = vpack.c.bf16 %v3434_v8, %v3430_v48  ;;  %v9108_v61 = vld [vmem:[#allocation66_spill] sm:$0xff] }
 0x795   :  { %4607 = vmatmul.mubr.bf16.gmra.mrb[192].mxu0 %v4056_v55  ;;  %5874 = vtanh.bf16 %v3871_v59  ;;  %v3753_v51 = vmul.bf16 1027030327, %v8634_v41  ;;  %v3549_v14 = vmul.bf16 1056980736, %v8293_v3  ;;  %v3997_v0 = vadd.bf16 1065369472, %v5869_v13 }
 0x796   :  { %v3873_v25 = vmul.bf16 1061961548, %v3809_v54  ;;  %v4059_v1 = vmul.bf16 %v3995_v39, %v3547_v7  ;;  %v3546_v33 = vmul.bf16 1056980736, %v9098_v38  ;;  %v9109_v54 = vmul.bf16 1027030327, %v8410_v40 }
 0x797   :  { %v4061_v28 = vmul.bf16 %v3997_v0, %v3549_v14  ;;  %v8690_v48 = vmul.bf16 %v3627_v9, %v8613_v18  ;;  %v3548_v59 = vmul.bf16 1056980736, %v9101_v16  ;;  %v8694_v3 = vmul.bf16 %v3629_v45, %v8615_v52  ;;  %v9110_v38 = vld [vmem:[#allocation67_spill] sm:$0xff] }
 0x798   :  { %5876 = vtanh.bf16 %v3873_v25  ;;  %v3806_v12 = vadd.bf16 %v9109_v54, %v9108_v61  ;;  %4453 = vmatprep.mubr.bf16.mxu1 %v4059_v1  ;;  %v3551_v7 = vmul.bf16 1056980736, %v8361_v49  ;;  %v9111_v42 = vmul.bf16 1027030327, %v8456_v58  ;;  %v9112_v58 = vld [vmem:[#allocation53_spill] sm:$0xff]  ;;  %v9113_v54 = vld [vmem:[#allocation56_spill] sm:$0xff] }
 0x799   :  { %4614 = vmatprep.mubr.bf16.mxu0 %v4061_v28  ;;  %v3630_v13 = vmul.bf16 %v8654_v2, %v8654_v2  ;;  %v3632_v9 = vmul.bf16 %v8659_v46, %v8659_v46  ;;  %v3631_v16 = vmul.bf16 %v8675_v6, %v8675_v6  ;;  %v3633_v39 = vmul.bf16 %v8679_v57, %v8679_v57 }
 0x79a   :  { %v3870_v8 = vmul.bf16 1061961548, %v3806_v12  ;;  %v3808_v40 = vadd.bf16 %v9111_v42, %v9110_v38  ;;  %v3245_v0 = vadd.f32 %v9112_v58, %v7797_v53  ;;  %v3438_v12 = vadd.f32 %v9113_v54, %v7801_v21 }
 0x79b   :  { %v5871_v25 = vpop.eup %5870  ;;  %v3249_v28 = vadd.f32 %v8523_v47, %v7797_v53  ;;  %v3442_v42 = vadd.f32 %v8525_v37, %v7801_v21  ;;  %v3813_v53 = vadd.bf16 %v3749_v62, %v8466_v27  ;;  %v9115_v21 = vld [vmem:[#allocation59_spill] sm:$0xff]  ;;  %v3444_v4 = vadd.f32 %v8534_v63, %v7807_v50  ;;  %v9116_v62 = vld [vmem:[#allocation52_spill] sm:$0xff] }
 0x79c   :  { %v5873_v49 = vpop.eup %5872  ;;  %v3994_v45 = vadd.bf16 1065369472, %v5871_v25  ;;  %5878 = vtanh.bf16 %v3870_v8  ;;  %v3872_v14 = vmul.bf16 1061961548, %v3808_v40  ;;  %v3247_v25 = vadd.f32 %v9114_v31, %v7805_v11 }
 0x79d   :  { %v3996_v1 = vadd.bf16 1065369472, %v5873_v49  ;;  %v3811_v8 = vadd.bf16 %v3747_v22, %v8464_v17  ;;  %v8721_v49 = vpack.c.bf16 %v3249_v28, %v3245_v0  ;;  %v8723_v58 = vpack.c.bf16 %v3442_v42, %v3438_v12 }
 0x79e   :  { %v4058_v55 = vmul.bf16 %v3994_v45, %v3546_v33  ;;  %5880 = vtanh.bf16 %v3872_v14  ;;  %v3440_v47 = vadd.f32 %v9115_v21, %v7807_v50  ;;  %v3251_v31 = vadd.f32 %v8532_v19, %v7805_v11 }
 0x79f   :  { %v4060_v40 = vmul.bf16 %v3996_v1, %v3548_v59  ;;  %v3875_v37 = vmul.bf16 1061961548, %v3811_v8  ;;  %v8735_v33 = vmul.bf16 %v3630_v13, %v8654_v2  ;;  %v8738_v59 = vmul.bf16 %v3631_v16, %v8675_v6 }
 0x7a0   :  { %4454 = vmatmul.mubr.bf16.gmra.mrb[196].mxu1 %v4058_v55  ;;  %v5875_v22 = vpop.eup %5874  ;;  %v3877_v32 = vmul.bf16 1061961548, %v3813_v53  ;;  %v9117_v55 = vmul.bf16 1027030327, %v8502_v44  ;;  %v8743_v11 = vpack.c.bf16 %v3251_v31, %v3247_v25  ;;  %v8745_v19 = vpack.c.bf16 %v3444_v4, %v3440_v47 }
 0x7a1   :  { %4615 = vmatmul.mubr.bf16.gmra.mrb[196].mxu0 %v4060_v40  ;;  %v3999_v0 = vadd.bf16 1065369472, %v5875_v22  ;;  %5882 = vtanh.bf16 %v3875_v37  ;;  %v3553_v50 = vmul.bf16 1056980736, %v8375_v56  ;;  %v8749_v13 = vmul.bf16 %v3633_v39, %v8679_v57 }
 0x7a2   :  { %v3810_v45 = vadd.bf16 %v9117_v55, %v9116_v62  ;;  %5884 = vtanh.bf16 %v3877_v32  ;;  %v3755_v16 = vmul.bf16 1027030327, %v8690_v48  ;;  %v3757_v1 = vmul.bf16 1027030327, %v8694_v3 }
 0x7a3   :  { %v5877_v14 = vpop.eup %5876  ;;  %v4063_v44 = vmul.bf16 %v3999_v0, %v3551_v7  ;;  %v3758_v12 = vmul.bf16 1027030327, %v8735_v33  ;;  %v8755_v28 = vmul.bf16 %v3632_v9, %v8659_v46  ;;  %v3550_v25 = vmul.bf16 1056980736, %v9108_v61 }
 0x7a4   :  { %v4001_v63 = vadd.bf16 1065369472, %v5877_v14  ;;  %v3874_v54 = vmul.bf16 1061961548, %v3810_v45  ;;  %v3759_v56 = vmul.bf16 1027030327, %v8738_v59  ;;  %v3815_v61 = vadd.bf16 %v3751_v20, %v8547_v15 }
 0x7a5   :  { %4461 = vmatprep.mubr.bf16.mxu1 %v4063_v44  ;;  %v3552_v39 = vmul.bf16 1056980736, %v9110_v38  ;;  %v9118_v48 = vmul.bf16 1027030327, %v8543_v24  ;;  %v3761_v8 = vmul.bf16 1027030327, %v8749_v13  ;;  %v3817_v40 = vadd.bf16 %v3753_v51, %v8549_v23 }
 0x7a6   :  { %v4065_v42 = vmul.bf16 %v4001_v63, %v3553_v50  ;;  %5886 = vtanh.bf16 %v3874_v54  ;;  %v3555_v9 = vmul.bf16 1056980736, %v8464_v17  ;;  %v3557_v53 = vmul.bf16 1056980736, %v8466_v27 }
 0x7a7   :  { %v3812_v3 = vadd.bf16 %v9118_v48, %v8439_v26  ;;  %v5879_v7 = vpop.eup %5878  ;;  %v3635_v24 = vmul.bf16 %v8743_v11, %v8743_v11  ;;  %v9119_v21 = vmul.bf16 1027030327, %v8576_v60  ;;  %v3879_v31 = vmul.bf16 1061961548, %v3815_v61 }
 0x7a8   :  { %4622 = vmatprep.mubr.bf16.mxu0 %v4065_v42  ;;  %v3998_v38 = vadd.bf16 1065369472, %v5879_v7  ;;  %v3881_v4 = vmul.bf16 1061961548, %v3817_v40  ;;  %v9120_v43 = vmul.bf16 1027030327, %v8609_v5  ;;  %v3637_v27 = vmul.bf16 %v8745_v19, %v8745_v19 }
 0x7a9   :  { %v3814_v47 = vadd.bf16 %v9119_v21, %v8521_v29  ;;  %v5881_v37 = vpop.eup %5880  ;;  %v3876_v17 = vmul.bf16 1061961548, %v3812_v3  ;;  %v3634_v59 = vmul.bf16 %v8721_v49, %v8721_v49  ;;  %v3554_v60 = vmul.bf16 1056980736, %v9116_v62 }
 0x7aa   :  { %v3816_v20 = vadd.bf16 %v9120_v43, %v8527_v34  ;;  %v4062_v41 = vmul.bf16 %v3998_v38, %v3550_v25  ;;  %v4000_v51 = vadd.bf16 1065369472, %v5881_v37  ;;  %v3636_v45 = vmul.bf16 %v8723_v58, %v8723_v58 }
 0x7ab   :  { %v3878_v22 = vmul.bf16 1061961548, %v3814_v47  ;;  %5888 = vtanh.bf16 %v3876_v17  ;;  %v3819_v5 = vadd.bf16 %v3755_v16, %v8613_v18  ;;  %v3699_v0 = vmul.bf16 %v3635_v24, %v8743_v11 }
 0x7ac   :  { %v3880_v32 = vmul.bf16 1061961548, %v3816_v20  ;;  %4462 = vmatmul.mubr.bf16.gmra.mrb[200].mxu1 %v4062_v41  ;;  %v4064_v55 = vmul.bf16 %v4000_v51, %v3552_v39  ;;  %5890 = vtanh.bf16 %v3879_v31  ;;  %v5883_v14 = vpop.eup %5882  ;;  %v3821_v50 = vadd.bf16 %v3757_v1, %v8615_v52 }
 0x7ad   :  { %5892 = vtanh.bf16 %v3881_v4  ;;  %v9121_v63 = vmul.bf16 1027030327, %v8642_v30  ;;  %v5885_v13 = vpop.eup %5884  ;;  %v4003_v44 = vadd.bf16 1065369472, %v5883_v14  ;;  %v3701_v54 = vmul.bf16 %v3637_v27, %v8745_v19 }
 0x7ae   :  { %4623 = vmatmul.mubr.bf16.gmra.mrb[200].mxu0 %v4064_v55  ;;  %5894 = vtanh.bf16 %v3878_v22  ;;  %v3883_v42 = vmul.bf16 1061961548, %v3819_v5  ;;  %v4005_v25 = vadd.bf16 1065369472, %v5885_v13  ;;  %v3885_v16 = vmul.bf16 1061961548, %v3821_v50 }
 0x7af   :  { %v3818_v62 = vadd.bf16 %v9121_v63, %v8590_v36  ;;  %5896 = vtanh.bf16 %v3880_v32  ;;  %v3698_v48 = vmul.bf16 %v3634_v59, %v8721_v49  ;;  %v4067_v3 = vmul.bf16 %v4003_v44, %v3555_v9 }
 0x7b0   :  { %5898 = vtanh.bf16 %v3883_v42  ;;  %v9122_v1 = vmul.bf16 1027030327, %v8671_v10  ;;  %v4069_v61 = vmul.bf16 %v4005_v25, %v3557_v53  ;;  %v3763_v40 = vmul.bf16 1027030327, %v3699_v0 }
 0x7b1   :  { %v3882_v39 = vmul.bf16 1061961548, %v3818_v62  ;;  %v5887_v7 = vpop.eup %5886  ;;  %5900 = vtanh.bf16 %v3885_v16  ;;  %v3823_v38 = vadd.bf16 %v3759_v56, %v8675_v6  ;;  %4469 = vmatprep.mubr.bf16.mxu1 %v4067_v3  ;;  %v3765_v24 = vmul.bf16 1027030327, %v3701_v54 }
 0x7b2   :  { %v3820_v30 = vadd.bf16 %v9122_v1, %v8595_v35  ;;  %v4002_v21 = vadd.bf16 1065369472, %v5887_v7  ;;  %v3825_v47 = vadd.bf16 %v3761_v8, %v8679_v57  ;;  %v3760_v37 = vmul.bf16 1027030327, %v8755_v28  ;;  %4630 = vmatprep.mubr.bf16.mxu0 %v4069_v61 }
 0x7b3   :  { %5902 = vtanh.bf16 %v3882_v39  ;;  %v3887_v17 = vmul.bf16 1061961548, %v3823_v38  ;;  %v3822_v10 = vadd.bf16 %v3758_v12, %v8654_v2  ;;  %v3700_v4 = vmul.bf16 %v3636_v45, %v8723_v58 }
 0x7b4   :  { %v3884_v9 = vmul.bf16 1061961548, %v3820_v30  ;;  %v4066_v53 = vmul.bf16 %v4002_v21, %v3554_v60  ;;  %v3889_v31 = vmul.bf16 1061961548, %v3825_v47  ;;  %v3827_v43 = vadd.bf16 %v3763_v40, %v8743_v11 }
 0x7b5   :  { %5904 = vtanh.bf16 %v3887_v17  ;;  %v3886_v56 = vmul.bf16 1061961548, %v3822_v10  ;;  %v3762_v41 = vmul.bf16 1027030327, %v3698_v48  ;;  %v3556_v28 = vmul.bf16 1056980736, %v8439_v26 }
 0x7b6   :  { %v5889_v20 = vpop.eup %5888  ;;  %4470 = vmatmul.mubr.bf16.gmra.mrb[204].mxu1 %v4066_v53  ;;  %5906 = vtanh.bf16 %v3889_v31  ;;  %v3829_v8 = vadd.bf16 %v3765_v24, %v8745_v19  ;;  %v3824_v33 = vadd.bf16 %v3760_v37, %v8659_v46  ;;  %v3891_v12 = vmul.bf16 1061961548, %v3827_v43 }
 0x7b7   :  { %v5891_v51 = vpop.eup %5890  ;;  %v4004_v27 = vadd.bf16 1065369472, %v5889_v20  ;;  %5908 = vtanh.bf16 %v3884_v9  ;;  %v3559_v59 = vmul.bf16 1056980736, %v8547_v15  ;;  %v3561_v32 = vmul.bf16 1056980736, %v8549_v23 }
 0x7b8   :  { %v5893_v22 = vpop.eup %5892  ;;  %v4007_v60 = vadd.bf16 1065369472, %v5891_v51  ;;  %5910 = vtanh.bf16 %v3886_v56  ;;  %v3558_v26 = vmul.bf16 1056980736, %v8521_v29  ;;  %v3893_v63 = vmul.bf16 1061961548, %v3829_v8 }
 0x7b9   :  { %v5895_v55 = vpop.eup %5894  ;;  %v4068_v45 = vmul.bf16 %v4004_v27, %v3556_v28  ;;  %v4009_v5 = vadd.bf16 1065369472, %v5893_v22  ;;  %5912 = vtanh.bf16 %v3891_v12  ;;  %v3826_v62 = vadd.bf16 %v3762_v41, %v8721_v49 }
 0x7ba   :  { %v5897_v14 = vpop.eup %5896  ;;  %v4071_v0 = vmul.bf16 %v4007_v60, %v3559_v59  ;;  %v4006_v50 = vadd.bf16 1065369472, %v5895_v55  ;;  %v3764_v44 = vmul.bf16 1027030327, %v3700_v4  ;;  %v3888_v54 = vmul.bf16 1061961548, %v3824_v33 }
 0x7bb   :  { %v5899_v13 = vpop.eup %5898  ;;  %4631 = vmatmul.mubr.bf16.gmra.mrb[204].mxu0 %v4068_v45  ;;  %v4073_v15 = vmul.bf16 %v4009_v5, %v3561_v32  ;;  %v3563_v25 = vmul.bf16 1056980736, %v8613_v18  ;;  %v4008_v29 = vadd.bf16 1065369472, %v5897_v14  ;;  %v3565_v1 = vmul.bf16 1056980736, %v8615_v52 }
 0x7bc   :  { %v5901_v42 = vpop.eup %5900  ;;  %4477 = vmatprep.mubr.bf16.mxu1 %v4071_v0  ;;  %v4070_v23 = vmul.bf16 %v4006_v50, %v3558_v26  ;;  %v4011_v16 = vadd.bf16 1065369472, %v5899_v13  ;;  %5914 = vtanh.bf16 %v3893_v63  ;;  %v3890_v30 = vmul.bf16 1061961548, %v3826_v62 }
 0x7bd   :  { %4638 = vmatprep.mubr.bf16.mxu0 %v4073_v15  ;;  %v4013_v48 = vadd.bf16 1065369472, %v5901_v42  ;;  %v3560_v7 = vmul.bf16 1056980736, %v8527_v34  ;;  %5916 = vtanh.bf16 %v3888_v54  ;;  %v3828_v61 = vadd.bf16 %v3764_v44, %v8723_v58 }
 0x7be   :  { %v5903_v39 = vpop.eup %5902  ;;  %4478 = vmatmul.mubr.bf16.gmra.mrb[208].mxu1 %v4070_v23  ;;  %v4075_v3 = vmul.bf16 %v4011_v16, %v3563_v25  ;;  %v3567_v47 = vmul.bf16 1056980736, %v8675_v6  ;;  %v3562_v17 = vmul.bf16 1056980736, %v8590_v36  ;;  %5918 = vtanh.bf16 %v3890_v30  ;;  %v9124_v30 = vld [vmem:[#allocation21_spill] sm:$0xff] }
 0x7bf   :  { %v4077_v38 = vmul.bf16 %v4013_v48, %v3565_v1  ;;  %v4010_v18 = vadd.bf16 1065369472, %v5903_v39  ;;  %v4072_v21 = vmul.bf16 %v4008_v29, %v3560_v7  ;;  %v3892_v34 = vmul.bf16 1061961548, %v3828_v61  ;;  %v9123_v48 = vld [vmem:[#allocation20_spill] sm:$0xff] }
 0x7c0   :  { %v5905_v40 = vpop.eup %5904  ;;  %4485 = vmatprep.mubr.bf16.mxu1 %v4075_v3  ;;  %v3569_v43 = vmul.bf16 1056980736, %v8679_v57  ;;  %v3564_v20 = vmul.bf16 1056980736, %v8595_v35  ;;  %v3571_v51 = vmul.bf16 1056980736, %v8743_v11 }
 0x7c1   :  { %v5907_v24 = vpop.eup %5906  ;;  %v4015_v37 = vadd.bf16 1065369472, %v5905_v40  ;;  %v4074_v31 = vmul.bf16 %v4010_v18, %v3562_v17  ;;  %5920 = vtanh.bf16 %v3892_v34  ;;  %v3566_v33 = vmul.bf16 1056980736, %v8654_v2 }
 0x7c2   :  { %v5909_v9 = vpop.eup %5908  ;;  %v4017_v4 = vadd.bf16 1065369472, %v5907_v24  ;;  %v3573_v35 = vmul.bf16 1056980736, %v8745_v19  ;;  %v3568_v32 = vmul.bf16 1056980736, %v8659_v46 }
 0x7c3   :  { %v5911_v52 = vpop.eup %5910  ;;  %4639 = vmatmul.mubr.bf16.gmra.mrb[208].mxu0 %v4072_v21  ;;  %v4079_v10 = vmul.bf16 %v4015_v37, %v3567_v47  ;;  %v4012_v56 = vadd.bf16 1065369472, %v5909_v9  ;;  %v3570_v26 = vmul.bf16 1056980736, %v8721_v49  ;;  %v3572_v0 = vmul.bf16 1056980736, %v8723_v58 }
 0x7c4   :  { %v5913_v53 = vpop.eup %5912  ;;  %4646 = vmatprep.mubr.bf16.mxu0 %v4077_v38  ;;  %v4081_v41 = vmul.bf16 %v4017_v4, %v3569_v43  ;;  %v4014_v36 = vadd.bf16 1065369472, %v5911_v52  ;;  %v8830_v46 = vld [vmem:[%s8923_s12] ss:$0 sm:$0xff]  ;;  %v9125_v4 = vld [vmem:[#allocation22_spill] sm:$0xff]  ;;  %s6156_s12 = smov [#allocation14]  }
 0x7c5   :  { %v4019_v6 = vadd.bf16 1065369472, %v5913_v53  ;;  %v4076_v8 = vmul.bf16 %v4012_v56, %v3564_v20  ;;  %v9126_v20 = vld [vmem:[#allocation23_spill] sm:$0xff]  ;;  %s4740_s29 = sshll.u32 %s6156_s12, 4  ;;  %s4741_s29 = int_to_ptr.vmem [resolvable:$true] %s4740_s29 }
 0x7c6   :  { %4486 = vmatmul.mubr.bf16.gmra.mrb[212].mxu1 %v4074_v31  ;;  %v4078_v22 = vmul.bf16 %v4014_v36, %v3566_v33  ;;  %s6108_s15 = scalar_lea.vmem %s4741_s29, 4096  ;;  %p6113_p1 = scmp.lt.s32.totalorder %s4741_s29, %s4741_s29 }
 0x7c7   :  { %4493 = vmatprep.mubr.bf16.mxu1 %v4079_v10  ;;  %v5915_v28 = vpop.eup %5914  ;;  %v4083_v12 = vmul.bf16 %v4019_v6, %v3571_v51  ;;  %p6109_p0 = scmp.ne.s32.totalorder %s4741_s29, %s6108_s15  ;;  %p6114_p2 = scmp.lt.s32.totalorder %s6108_s15, %s6108_s15 }
 0x7c8   :  { %v5917_v27 = vpop.eup %5916  ;;  %v4021_v59 = vadd.bf16 1065369472, %v5915_v28 }
 0x7c9   :  { %v5919_v57 = vpop.eup %5918  ;;  %v4016_v60 = vadd.bf16 1065369472, %v5917_v27  ;;  %p6115_p3 = por %p6114_p2, %p6113_p1 }
 0x7ca   :  { %v4085_v55 = vmul.bf16 %v4021_v59, %v3573_v35  ;;  %v4018_v45 = vadd.bf16 1065369472, %v5919_v57 }
 0x7cb   :  { %4647 = vmatmul.mubr.bf16.gmra.mrb[212].mxu0 %v4076_v8  ;;  %v4080_v5 = vmul.bf16 %v4016_v60, %v3568_v32  ;;  %p6116_p4 = pnand %p6115_p3, %p6109_p0 }
 0x7cc   :  { %4654 = vmatprep.mubr.bf16.mxu0 %v4081_v41  ;;  %v5921_v11 = vpop.eup %5920  ;;  %v4082_v2 = vmul.bf16 %v4018_v45, %v3570_v26  ;;  %v9127_v45 = vld [vmem:[#allocation24_spill] sm:$0xff]  ;;  %v9128_v26 = vld [vmem:[#allocation25_spill] sm:$0xff] }
 0x7cd   :  { %v4020_v14 = vadd.bf16 1065369472, %v5921_v11 }
 0x7ce   :  { %4494 = vmatmul.mubr.bf16.gmra.mrb[216].mxu1 %v4078_v22 }
 0x7cf   :  { %4501 = vmatprep.mubr.bf16.mxu1 %v4083_v12  ;;  %v4084_v50 = vmul.bf16 %v4020_v14, %v3572_v0 }
 0x7d3   :  { %4655 = vmatmul.mubr.bf16.gmra.mrb[216].mxu0 %v4080_v5 }
 0x7d4   :  { %4662 = vmatprep.mubr.bf16.mxu0 %v4085_v55 }
 0x7d6   :  { %4502 = vmatmul.mubr.bf16.gmra.mrb[220].mxu1 %v4082_v2 }
 0x7db   :  { %4663 = vmatmul.mubr.bf16.gmra.mrb[220].mxu0 %v4084_v50 }
 0x7f7   :  { %v4985_v63 = vpop.f32.mrb[160].mxu1 }
 0x7f8   :  { %v4986_v62 = vpop.f32.mrb[161].mxu1 }
 0x7f9   :  { %v4987_v13 = vadd.f32 %v4986_v62, %v4985_v63  ;;  %v4988_v49 = vpop.f32.mrb[162].mxu1 }
 0x7fa   :  { %v5097_v19 = vpop.f32.mrb[160].mxu0  ;;  %v4989_v42 = vpop.f32.mrb[163].mxu1 }
 0x7fb   :  { %v5098_v44 = vpop.f32.mrb[161].mxu0  ;;  %v4384_v23 = vadd.f32 %v4987_v13, %v8830_v46  ;;  %v4990_v25 = vadd.f32 %v4989_v42, %v4988_v49 }
 0x7fc   :  { %v5099_v15 = vadd.f32 %v5098_v44, %v5097_v19  ;;  %v5100_v54 = vpop.f32.mrb[162].mxu0 }
 0x7fd   :  { %v5101_v58 = vpop.f32.mrb[163].mxu0  ;;  %v4387_v29 = vadd.f32 %v4990_v25, %v8830_v46 }
 0x7fe   :  { %v5102_v16 = vadd.f32 %v5101_v58, %v5100_v54  ;;  %v4545_v39 = vadd.f32 %v5099_v15, %v4384_v23 }
 0x800   :  { %v4671_v3 = vadd.f32 %v4545_v39, %v9123_v48  ;;  %v4548_v1 = vadd.f32 %v5102_v16, %v4387_v29  ;;  %v9129_v16 = vld [vmem:[#allocation26_spill] sm:$0xff] }
 0x802   :  { %4703 = vst [vmem:[#allocation14] sm:$0xff] %v4671_v3  ;;  %v4672_v7 = vadd.f32 %v4548_v1, %v9124_v30  ;;  %v9130_v3 = vld [vmem:[#allocation27_spill] sm:$0xff] }
 0x804   :  { %4704 = vst [vmem:[#allocation14 + $0x8] sm:$0xff] %v4672_v7 }
 0x80c   :  { %v4991_v61 = vpop.f32.mrb[164].mxu1 }
 0x80d   :  { %v4992_v40 = vpop.f32.mrb[165].mxu1 }
 0x80e   :  { %v4993_v38 = vadd.f32 %v4992_v40, %v4991_v61  ;;  %v4994_v18 = vpop.f32.mrb[166].mxu1 }
 0x80f   :  { %v5103_v24 = vpop.f32.mrb[164].mxu0  ;;  %v4995_v21 = vpop.f32.mrb[167].mxu1 }
 0x810   :  { %v4392_v47 = vadd.f32 %v4993_v38, %v8830_v46  ;;  %v5104_v37 = vpop.f32.mrb[165].mxu0  ;;  %v4996_v9 = vadd.f32 %v4995_v21, %v4994_v18 }
 0x811   :  { %v5105_v17 = vadd.f32 %v5104_v37, %v5103_v24  ;;  %v5106_v52 = vpop.f32.mrb[166].mxu0 }
 0x812   :  { %v4395_v10 = vadd.f32 %v4996_v9, %v8830_v46  ;;  %v5107_v34 = vpop.f32.mrb[167].mxu0 }
 0x813   :  { %v4553_v53 = vadd.f32 %v5105_v17, %v4392_v47  ;;  %v5108_v31 = vadd.f32 %v5107_v34, %v5106_v52  ;;  %v9131_v34 = vld [vmem:[#allocation28_spill] sm:$0xff] }
 0x815   :  { %v4673_v56 = vadd.f32 %v4553_v53, %v9125_v4  ;;  %v4556_v43 = vadd.f32 %v5108_v31, %v4395_v10  ;;  %v9132_v4 = vld [vmem:[#allocation29_spill] sm:$0xff] }
 0x817   :  { %4705 = vst [vmem:[#allocation14 + $0x10] sm:$0xff] %v4673_v56  ;;  %v4674_v6 = vadd.f32 %v4556_v43, %v9126_v20 }
 0x819   :  { %4706 = vst [vmem:[#allocation14 + $0x18] sm:$0xff] %v4674_v6 }
 0x81a   :  { %v4997_v41 = vpop.f32.mrb[168].mxu1 }
 0x81b   :  { %v4998_v36 = vpop.f32.mrb[169].mxu1 }
 0x81c   :  { %v4999_v28 = vadd.f32 %v4998_v36, %v4997_v41  ;;  %v5000_v8 = vpop.f32.mrb[170].mxu1 }
 0x81d   :  { %v5001_v51 = vpop.f32.mrb[171].mxu1 }
 0x81e   :  { %v5109_v27 = vpop.f32.mrb[168].mxu0  ;;  %v4400_v33 = vadd.f32 %v4999_v28, %v8830_v46  ;;  %v5002_v12 = vadd.f32 %v5001_v51, %v5000_v8 }
 0x81f   :  { %v5110_v22 = vpop.f32.mrb[169].mxu0 }
 0x820   :  { %v5111_v59 = vadd.f32 %v5110_v22, %v5109_v27  ;;  %v5112_v57 = vpop.f32.mrb[170].mxu0  ;;  %v4403_v60 = vadd.f32 %v5002_v12, %v8830_v46 }
 0x821   :  { %v5113_v35 = vpop.f32.mrb[171].mxu0 }
 0x822   :  { %v4561_v32 = vadd.f32 %v5111_v59, %v4400_v33  ;;  %v5114_v55 = vadd.f32 %v5113_v35, %v5112_v57  ;;  %v9133_v35 = vld [vmem:[#allocation30_spill] sm:$0xff] }
 0x824   :  { %v4675_v5 = vadd.f32 %v4561_v32, %v9127_v45  ;;  %v4564_v11 = vadd.f32 %v5114_v55, %v4403_v60  ;;  %v9134_v45 = vld [vmem:[#allocation31_spill] sm:$0xff] }
 0x826   :  { %4707 = vst [vmem:[#allocation14 + $0x20] sm:$0xff] %v4675_v5  ;;  %v4676_v2 = vadd.f32 %v4564_v11, %v9128_v26  ;;  %v5003_v14 = vpop.f32.mrb[172].mxu1 }
 0x827   :  { %v5004_v0 = vpop.f32.mrb[173].mxu1 }
 0x828   :  { %4708 = vst [vmem:[#allocation14 + $0x28] sm:$0xff] %v4676_v2  ;;  %v5005_v50 = vadd.f32 %v5004_v0, %v5003_v14  ;;  %v5006_v63 = vpop.f32.mrb[174].mxu1 }
 0x829   :  { %v5007_v19 = vpop.f32.mrb[175].mxu1 }
 0x82a   :  { %v5008_v62 = vadd.f32 %v5007_v19, %v5006_v63  ;;  %v5115_v13 = vpop.f32.mrb[172].mxu0  ;;  %v4408_v44 = vadd.f32 %v5005_v50, %v8830_v46 }
 0x82b   :  { %v5116_v49 = vpop.f32.mrb[173].mxu0 }
 0x82c   :  { %v5117_v15 = vadd.f32 %v5116_v49, %v5115_v13  ;;  %v5118_v54 = vpop.f32.mrb[174].mxu0  ;;  %v4411_v42 = vadd.f32 %v5008_v62, %v8830_v46 }
 0x82d   :  { %v5119_v23 = vpop.f32.mrb[175].mxu0 }
 0x82e   :  { %v4569_v25 = vadd.f32 %v5117_v15, %v4408_v44  ;;  %v5120_v58 = vadd.f32 %v5119_v23, %v5118_v54  ;;  %v9135_v23 = vld [vmem:[#allocation32_spill] sm:$0xff] }
 0x830   :  { %v4677_v39 = vadd.f32 %v4569_v25, %v9129_v16  ;;  %v4572_v29 = vadd.f32 %v5120_v58, %v4411_v42  ;;  %v9136_v16 = vld [vmem:[#allocation33_spill] sm:$0xff] }
 0x832   :  { %4709 = vst [vmem:[#allocation14 + $0x30] sm:$0xff] %v4677_v39  ;;  %v4678_v1 = vadd.f32 %v4572_v29, %v9130_v3 }
 0x833   :  { %v5009_v48 = vpop.f32.mrb[176].mxu1 }
 0x834   :  { %v5010_v30 = vpop.f32.mrb[177].mxu1  ;;  %4710 = vst [vmem:[#allocation14 + $0x38] sm:$0xff] %v4678_v1 }
 0x835   :  { %v5011_v7 = vadd.f32 %v5010_v30, %v5009_v48  ;;  %v5012_v61 = vpop.f32.mrb[178].mxu1 }
 0x836   :  { %v5013_v40 = vpop.f32.mrb[179].mxu1 }
 0x837   :  { %v5014_v38 = vadd.f32 %v5013_v40, %v5012_v61  ;;  %v5121_v18 = vpop.f32.mrb[176].mxu0  ;;  %v4416_v24 = vadd.f32 %v5011_v7, %v8830_v46 }
 0x838   :  { %v5122_v21 = vpop.f32.mrb[177].mxu0 }
 0x839   :  { %v5123_v47 = vadd.f32 %v5122_v21, %v5121_v18  ;;  %v5124_v37 = vpop.f32.mrb[178].mxu0  ;;  %v4419_v9 = vadd.f32 %v5014_v38, %v8830_v46 }
 0x83a   :  { %v5125_v17 = vpop.f32.mrb[179].mxu0 }
 0x83b   :  { %v4577_v52 = vadd.f32 %v5123_v47, %v4416_v24  ;;  %v5126_v10 = vadd.f32 %v5125_v17, %v5124_v37  ;;  %v9137_v17 = vld [vmem:[#allocation34_spill] sm:$0xff] }
 0x83d   :  { %v4679_v53 = vadd.f32 %v4577_v52, %v9131_v34  ;;  %v4580_v31 = vadd.f32 %v5126_v10, %v4419_v9  ;;  %v9138_v34 = vld [vmem:[#allocation35_spill] sm:$0xff] }
 0x83f   :  { %4711 = vst [vmem:[#allocation14 + $0x40] sm:$0xff] %v4679_v53  ;;  %v4680_v56 = vadd.f32 %v4580_v31, %v9132_v4 }
 0x841   :  { %4712 = vst [vmem:[#allocation14 + $0x48] sm:$0xff] %v4680_v56 }
 0x842   :  { %v5015_v43 = vpop.f32.mrb[180].mxu1 }
 0x843   :  { %v5016_v20 = vpop.f32.mrb[181].mxu1  ;;  %v5127_v36 = vpop.f32.mrb[180].mxu0 }
 0x844   :  { %v5017_v6 = vadd.f32 %v5016_v20, %v5015_v43  ;;  %v5018_v41 = vpop.f32.mrb[182].mxu1  ;;  %v5128_v51 = vpop.f32.mrb[181].mxu0 }
 0x845   :  { %v5019_v28 = vpop.f32.mrb[183].mxu1  ;;  %v5129_v33 = vadd.f32 %v5128_v51, %v5127_v36  ;;  %v5130_v12 = vpop.f32.mrb[182].mxu0 }
 0x846   :  { %v4424_v8 = vadd.f32 %v5017_v6, %v8830_v46  ;;  %v5020_v27 = vadd.f32 %v5019_v28, %v5018_v41  ;;  %v5131_v59 = vpop.f32.mrb[183].mxu0 }
 0x847   :  { %v5132_v60 = vadd.f32 %v5131_v59, %v5130_v12  ;;  %v9139_v59 = vld [vmem:[#allocation36_spill] sm:$0xff] }
 0x848   :  { %v4427_v22 = vadd.f32 %v5020_v27, %v8830_v46  ;;  %v4585_v57 = vadd.f32 %v5129_v33, %v4424_v8 }
 0x84a   :  { %v4681_v32 = vadd.f32 %v4585_v57, %v9133_v35  ;;  %v4588_v55 = vadd.f32 %v5132_v60, %v4427_v22  ;;  %v9140_v35 = vld [vmem:[#allocation37_spill] sm:$0xff] }
 0x84c   :  { %4713 = vst [vmem:[#allocation14 + $0x50] sm:$0xff] %v4681_v32  ;;  %v4682_v5 = vadd.f32 %v4588_v55, %v9134_v45 }
 0x84e   :  { %v5021_v11 = vpop.f32.mrb[184].mxu1  ;;  %4714 = vst [vmem:[#allocation14 + $0x58] sm:$0xff] %v4682_v5 }
 0x84f   :  { %v5022_v26 = vpop.f32.mrb[185].mxu1  ;;  %v5133_v2 = vpop.f32.mrb[184].mxu0 }
 0x850   :  { %v5023_v14 = vadd.f32 %v5022_v26, %v5021_v11  ;;  %v5024_v0 = vpop.f32.mrb[186].mxu1  ;;  %v5134_v50 = vpop.f32.mrb[185].mxu0 }
 0x851   :  { %v5025_v63 = vpop.f32.mrb[187].mxu1  ;;  %v5135_v62 = vadd.f32 %v5134_v50, %v5133_v2  ;;  %v5136_v13 = vpop.f32.mrb[186].mxu0 }
 0x852   :  { %v4432_v19 = vadd.f32 %v5023_v14, %v8830_v46  ;;  %v5026_v44 = vadd.f32 %v5025_v63, %v5024_v0  ;;  %v5137_v49 = vpop.f32.mrb[187].mxu0 }
 0x853   :  { %v5138_v42 = vadd.f32 %v5137_v49, %v5136_v13 }
 0x854   :  { %v4593_v15 = vadd.f32 %v5135_v62, %v4432_v19  ;;  %v4435_v54 = vadd.f32 %v5026_v44, %v8830_v46 }
 0x856   :  { %v4683_v25 = vadd.f32 %v4593_v15, %v9135_v23  ;;  %v4596_v58 = vadd.f32 %v5138_v42, %v4435_v54  ;;  %v9141_v15 = vld [vmem:[#allocation38_spill] sm:$0xff]  ;;  %v9142_v23 = vld [vmem:[#allocation39_spill] sm:$0xff] }
 0x858   :  { %4715 = vst [vmem:[#allocation14 + $0x60] sm:$0xff] %v4683_v25  ;;  %v4684_v39 = vadd.f32 %v4596_v58, %v9136_v16 }
 0x859   :  { %v5027_v29 = vpop.f32.mrb[188].mxu1 }
 0x85a   :  { %4716 = vst [vmem:[#allocation14 + $0x68] sm:$0xff] %v4684_v39  ;;  %v5028_v48 = vpop.f32.mrb[189].mxu1 }
 0x85b   :  { %v5029_v3 = vadd.f32 %v5028_v48, %v5027_v29  ;;  %v5030_v1 = vpop.f32.mrb[190].mxu1 }
 0x85c   :  { %v5031_v30 = vpop.f32.mrb[191].mxu1  ;;  %v5139_v7 = vpop.f32.mrb[188].mxu0 }
 0x85d   :  { %v4440_v61 = vadd.f32 %v5029_v3, %v8830_v46  ;;  %v5032_v40 = vadd.f32 %v5031_v30, %v5030_v1  ;;  %v5140_v38 = vpop.f32.mrb[189].mxu0 }
 0x85e   :  { %v5141_v18 = vadd.f32 %v5140_v38, %v5139_v7  ;;  %v5142_v24 = vpop.f32.mrb[190].mxu0 }
 0x85f   :  { %v4443_v21 = vadd.f32 %v5032_v40, %v8830_v46  ;;  %v5143_v47 = vpop.f32.mrb[191].mxu0 }
 0x860   :  { %v4601_v37 = vadd.f32 %v5141_v18, %v4440_v61  ;;  %v5144_v9 = vadd.f32 %v5143_v47, %v5142_v24  ;;  %v9143_v47 = vld [vmem:[#allocation40_spill] sm:$0xff] }
 0x862   :  { %v4685_v52 = vadd.f32 %v4601_v37, %v9137_v17  ;;  %v4604_v10 = vadd.f32 %v5144_v9, %v4443_v21  ;;  %v9144_v17 = vld [vmem:[#allocation41_spill] sm:$0xff] }
 0x864   :  { %4717 = vst [vmem:[#allocation14 + $0x70] sm:$0xff] %v4685_v52  ;;  %v4686_v53 = vadd.f32 %v4604_v10, %v9138_v34 }
 0x866   :  { %4718 = vst [vmem:[#allocation14 + $0x78] sm:$0xff] %v4686_v53 }
 0x867   :  { %v5033_v31 = vpop.f32.mrb[192].mxu1 }
 0x868   :  { %v5145_v4 = vpop.f32.mrb[192].mxu0  ;;  %v5034_v56 = vpop.f32.mrb[193].mxu1 }
 0x869   :  { %v5035_v43 = vadd.f32 %v5034_v56, %v5033_v31  ;;  %v5146_v20 = vpop.f32.mrb[193].mxu0  ;;  %v5036_v6 = vpop.f32.mrb[194].mxu1 }
 0x86a   :  { %v5147_v41 = vadd.f32 %v5146_v20, %v5145_v4  ;;  %v5148_v36 = vpop.f32.mrb[194].mxu0  ;;  %v5037_v28 = vpop.f32.mrb[195].mxu1 }
 0x86b   :  { %v4448_v8 = vadd.f32 %v5035_v43, %v8830_v46  ;;  %v5038_v51 = vadd.f32 %v5037_v28, %v5036_v6  ;;  %v5149_v27 = vpop.f32.mrb[195].mxu0 }
 0x86c   :  { %v5150_v33 = vadd.f32 %v5149_v27, %v5148_v36 }
 0x86d   :  { %v4609_v12 = vadd.f32 %v5147_v41, %v4448_v8  ;;  %v4451_v22 = vadd.f32 %v5038_v51, %v8830_v46 }
 0x86f   :  { %v4687_v57 = vadd.f32 %v4609_v12, %v9139_v59  ;;  %v4612_v60 = vadd.f32 %v5150_v33, %v4451_v22 }
 0x871   :  { %4719 = vst [vmem:[#allocation14 + $0x80] sm:$0xff] %v4687_v57  ;;  %v4688_v32 = vadd.f32 %v4612_v60, %v9140_v35  ;;  %v9145_v57 = vld [vmem:[#allocation42_spill] sm:$0xff] }
 0x873   :  { %v5039_v55 = vpop.f32.mrb[196].mxu1  ;;  %4720 = vst [vmem:[#allocation14 + $0x88] sm:$0xff] %v4688_v32 }
 0x874   :  { %v5151_v45 = vpop.f32.mrb[196].mxu0  ;;  %v5040_v5 = vpop.f32.mrb[197].mxu1 }
 0x875   :  { %v5041_v11 = vadd.f32 %v5040_v5, %v5039_v55  ;;  %v5152_v26 = vpop.f32.mrb[197].mxu0  ;;  %v5042_v2 = vpop.f32.mrb[198].mxu1 }
 0x876   :  { %v5153_v14 = vadd.f32 %v5152_v26, %v5151_v45  ;;  %v5154_v0 = vpop.f32.mrb[198].mxu0  ;;  %v5043_v50 = vpop.f32.mrb[199].mxu1  ;;  %v9146_v45 = vld [vmem:[#allocation43_spill] sm:$0xff] }
 0x877   :  { %v4456_v63 = vadd.f32 %v5041_v11, %v8830_v46  ;;  %v5044_v19 = vadd.f32 %v5043_v50, %v5042_v2  ;;  %v5155_v62 = vpop.f32.mrb[199].mxu0 }
 0x878   :  { %v5156_v13 = vadd.f32 %v5155_v62, %v5154_v0 }
 0x879   :  { %v4617_v44 = vadd.f32 %v5153_v14, %v4456_v63  ;;  %v4459_v49 = vadd.f32 %v5044_v19, %v8830_v46 }
 0x87b   :  { %v4689_v54 = vadd.f32 %v4617_v44, %v9141_v15  ;;  %v4620_v42 = vadd.f32 %v5156_v13, %v4459_v49 }
 0x87d   :  { %4721 = vst [vmem:[#allocation14 + $0x90] sm:$0xff] %v4689_v54  ;;  %v4690_v25 = vadd.f32 %v4620_v42, %v9142_v23  ;;  %v9147_v54 = vld [vmem:[#allocation44_spill] sm:$0xff] }
 0x87f   :  { %4722 = vst [vmem:[#allocation14 + $0x98] sm:$0xff] %v4690_v25  ;;  %v5045_v58 = vpop.f32.mrb[200].mxu1 }
 0x880   :  { %v5046_v16 = vpop.f32.mrb[201].mxu1 }
 0x881   :  { %v5157_v39 = vpop.f32.mrb[200].mxu0  ;;  %v5047_v29 = vadd.f32 %v5046_v16, %v5045_v58  ;;  %v5048_v48 = vpop.f32.mrb[202].mxu1  ;;  %v9148_v16 = vld [vmem:[#allocation45_spill] sm:$0xff] }
 0x882   :  { %v5158_v3 = vpop.f32.mrb[201].mxu0  ;;  %v5049_v1 = vpop.f32.mrb[203].mxu1 }
 0x883   :  { %v4464_v30 = vadd.f32 %v5047_v29, %v8830_v46  ;;  %v5159_v7 = vadd.f32 %v5158_v3, %v5157_v39  ;;  %v5160_v61 = vpop.f32.mrb[202].mxu0  ;;  %v5050_v40 = vadd.f32 %v5049_v1, %v5048_v48 }
 0x884   :  { %v5161_v38 = vpop.f32.mrb[203].mxu0 }
 0x885   :  { %v4625_v18 = vadd.f32 %v5159_v7, %v4464_v30  ;;  %v4467_v24 = vadd.f32 %v5050_v40, %v8830_v46  ;;  %v5162_v21 = vadd.f32 %v5161_v38, %v5160_v61 }
 0x887   :  { %v4691_v37 = vadd.f32 %v4625_v18, %v9143_v47  ;;  %v4628_v9 = vadd.f32 %v5162_v21, %v4467_v24 }
 0x889   :  { %4723 = vst [vmem:[#allocation14 + $0xa0] sm:$0xff] %v4691_v37  ;;  %v4692_v52 = vadd.f32 %v4628_v9, %v9144_v17  ;;  %v5051_v10 = vpop.f32.mrb[204].mxu1  ;;  %v9149_v37 = vld [vmem:[#allocation46_spill] sm:$0xff] }
 0x88a   :  { %v5052_v34 = vpop.f32.mrb[205].mxu1 }
 0x88b   :  { %4724 = vst [vmem:[#allocation14 + $0xa8] sm:$0xff] %v4692_v52  ;;  %v5053_v53 = vadd.f32 %v5052_v34, %v5051_v10  ;;  %v5054_v31 = vpop.f32.mrb[206].mxu1  ;;  %v9150_v34 = vld [vmem:[#allocation47_spill] sm:$0xff] }
 0x88c   :  { %v5055_v4 = vpop.f32.mrb[207].mxu1 }
 0x88d   :  { %v5056_v56 = vadd.f32 %v5055_v4, %v5054_v31  ;;  %v4472_v20 = vadd.f32 %v5053_v53, %v8830_v46 }
 0x88e   :  { %v5163_v43 = vpop.f32.mrb[204].mxu0 }
 0x88f   :  { %v5164_v6 = vpop.f32.mrb[205].mxu0  ;;  %v4475_v28 = vadd.f32 %v5056_v56, %v8830_v46 }
 0x890   :  { %v5165_v41 = vadd.f32 %v5164_v6, %v5163_v43  ;;  %v5166_v36 = vpop.f32.mrb[206].mxu0 }
 0x891   :  { %v5167_v8 = vpop.f32.mrb[207].mxu0  ;;  %v5057_v51 = vpop.f32.mrb[208].mxu1 }
 0x892   :  { %v4633_v27 = vadd.f32 %v5165_v41, %v4472_v20  ;;  %v5168_v33 = vadd.f32 %v5167_v8, %v5166_v36  ;;  %v5058_v12 = vpop.f32.mrb[209].mxu1 }
 0x893   :  { %v5059_v22 = vadd.f32 %v5058_v12, %v5057_v51  ;;  %v5060_v59 = vpop.f32.mrb[210].mxu1  ;;  %v9151_v12 = vld [vmem:[#allocation48_spill] sm:$0xff] }
 0x894   :  { %v4693_v60 = vadd.f32 %v4633_v27, %v9145_v57  ;;  %v4636_v35 = vadd.f32 %v5168_v33, %v4475_v28  ;;  %v5061_v32 = vpop.f32.mrb[211].mxu1 }
 0x895   :  { %v5062_v55 = vadd.f32 %v5061_v32, %v5060_v59  ;;  %v4480_v26 = vadd.f32 %v5059_v22, %v8830_v46 }
 0x896   :  { %4725 = vst [vmem:[#allocation14 + $0xb0] sm:$0xff] %v4693_v60  ;;  %v4694_v5 = vadd.f32 %v4636_v35, %v9146_v45  ;;  %v5169_v11 = vpop.f32.mrb[208].mxu0  ;;  %v9152_v35 = vld [vmem:[#allocation49_spill] sm:$0xff] }
 0x897   :  { %v5170_v2 = vpop.f32.mrb[209].mxu0  ;;  %v4483_v50 = vadd.f32 %v5062_v55, %v8830_v46 }
 0x898   :  { %4726 = vst [vmem:[#allocation14 + $0xb8] sm:$0xff] %v4694_v5  ;;  %v5171_v14 = vadd.f32 %v5170_v2, %v5169_v11  ;;  %v5172_v0 = vpop.f32.mrb[210].mxu0 }
 0x899   :  { %v5173_v63 = vpop.f32.mrb[211].mxu0  ;;  %v5063_v19 = vpop.f32.mrb[212].mxu1 }
 0x89a   :  { %v4641_v62 = vadd.f32 %v5171_v14, %v4480_v26  ;;  %v5174_v13 = vadd.f32 %v5173_v63, %v5172_v0  ;;  %v5064_v44 = vpop.f32.mrb[213].mxu1  ;;  %v9153_v63 = vld [vmem:[#allocation50_spill] sm:$0xff] }
 0x89b   :  { %v5065_v49 = vadd.f32 %v5064_v44, %v5063_v19  ;;  %v5066_v15 = vpop.f32.mrb[214].mxu1 }
 0x89c   :  { %v4695_v42 = vadd.f32 %v4641_v62, %v9147_v54  ;;  %v4644_v23 = vadd.f32 %v5174_v13, %v4483_v50  ;;  %v5067_v25 = vpop.f32.mrb[215].mxu1  ;;  %v9154_v13 = vld [vmem:[#allocation51_spill] sm:$0xff] }
 0x89d   :  { %v5068_v58 = vadd.f32 %v5067_v25, %v5066_v15  ;;  %v4488_v48 = vadd.f32 %v5065_v49, %v8830_v46 }
 0x89e   :  { %4727 = vst [vmem:[#allocation14 + $0xc0] sm:$0xff] %v4695_v42  ;;  %v4696_v39 = vadd.f32 %v4644_v23, %v9148_v16  ;;  %v5175_v29 = vpop.f32.mrb[212].mxu0 }
 0x89f   :  { %v5176_v3 = vpop.f32.mrb[213].mxu0  ;;  %v4491_v7 = vadd.f32 %v5068_v58, %v8830_v46 }
 0x8a0   :  { %4728 = vst [vmem:[#allocation14 + $0xc8] sm:$0xff] %v4696_v39  ;;  %v5177_v1 = vadd.f32 %v5176_v3, %v5175_v29  ;;  %v5178_v30 = vpop.f32.mrb[214].mxu0 }
 0x8a1   :  { %v5179_v61 = vpop.f32.mrb[215].mxu0  ;;  %v5069_v40 = vpop.f32.mrb[216].mxu1 }
 0x8a2   :  { %v4649_v38 = vadd.f32 %v5177_v1, %v4488_v48  ;;  %v5180_v18 = vadd.f32 %v5179_v61, %v5178_v30  ;;  %v5070_v24 = vpop.f32.mrb[217].mxu1 }
 0x8a3   :  { %v5071_v21 = vadd.f32 %v5070_v24, %v5069_v40  ;;  %v5072_v47 = vpop.f32.mrb[218].mxu1 }
 0x8a4   :  { %v4697_v9 = vadd.f32 %v4649_v38, %v9149_v37  ;;  %v4652_v17 = vadd.f32 %v5180_v18, %v4491_v7  ;;  %v5073_v52 = vpop.f32.mrb[219].mxu1 }
 0x8a5   :  { %v5074_v10 = vadd.f32 %v5073_v52, %v5072_v47  ;;  %v4496_v4 = vadd.f32 %v5071_v21, %v8830_v46 }
 0x8a6   :  { %4729 = vst [vmem:[#allocation14 + $0xd0] sm:$0xff] %v4697_v9  ;;  %v4698_v53 = vadd.f32 %v4652_v17, %v9150_v34  ;;  %v5181_v31 = vpop.f32.mrb[216].mxu0 }
 0x8a7   :  { %v5182_v56 = vpop.f32.mrb[217].mxu0  ;;  %v4499_v6 = vadd.f32 %v5074_v10, %v8830_v46 }
 0x8a8   :  { %4730 = vst [vmem:[#allocation14 + $0xd8] sm:$0xff] %v4698_v53  ;;  %v5183_v43 = vadd.f32 %v5182_v56, %v5181_v31  ;;  %v5184_v20 = vpop.f32.mrb[218].mxu0 }
 0x8a9   :  { %v5185_v41 = vpop.f32.mrb[219].mxu0  ;;  %v5075_v36 = vpop.f32.mrb[220].mxu1 }
 0x8aa   :  { %v4657_v28 = vadd.f32 %v5183_v43, %v4496_v4  ;;  %v5186_v8 = vadd.f32 %v5185_v41, %v5184_v20  ;;  %v5076_v51 = vpop.f32.mrb[221].mxu1 }
 0x8ab   :  { %v5077_v27 = vadd.f32 %v5076_v51, %v5075_v36  ;;  %v5078_v33 = vpop.f32.mrb[222].mxu1 }
 0x8ac   :  { %v4699_v22 = vadd.f32 %v4657_v28, %v9151_v12  ;;  %v4660_v59 = vadd.f32 %v5186_v8, %v4499_v6  ;;  %v5079_v57 = vpop.f32.mrb[223].mxu1 }
 0x8ad   :  { %v5080_v60 = vadd.f32 %v5079_v57, %v5078_v33  ;;  %v4504_v45 = vadd.f32 %v5077_v27, %v8830_v46 }
 0x8ae   :  { %4731 = vst [vmem:[#allocation14 + $0xe0] sm:$0xff] %v4699_v22  ;;  %v4700_v32 = vadd.f32 %v4660_v59, %v9152_v35  ;;  %v5187_v55 = vpop.f32.mrb[220].mxu0 }
 0x8af   :  { %v5188_v5 = vpop.f32.mrb[221].mxu0  ;;  %v4507_v2 = vadd.f32 %v5080_v60, %v8830_v46 }
 0x8b0   :  { %4732 = vst [vmem:[#allocation14 + $0xe8] sm:$0xff] %v4700_v32  ;;  %v5189_v11 = vadd.f32 %v5188_v5, %v5187_v55  ;;  %v5190_v26 = vpop.f32.mrb[222].mxu0 }
 0x8b1   :  { %v5191_v14 = vpop.f32.mrb[223].mxu0 }
 0x8b2   :  { %v4665_v0 = vadd.f32 %v5189_v11, %v4504_v45  ;;  %v5192_v50 = vadd.f32 %v5191_v14, %v5190_v26 }
 0x8b4   :  { %v4701_v19 = vadd.f32 %v4665_v0, %v9153_v63  ;;  %v4668_v62 = vadd.f32 %v5192_v50, %v4507_v2 }
 0x8b6   :  { %4733 = vst [vmem:[#allocation14 + $0xf0] sm:$0xff] %v4701_v19  ;;  %v4702_v44 = vadd.f32 %v4668_v62, %v9154_v13 }
 0x8b8   :  { %4734 = vst [vmem:[#allocation14 + $0xf8] sm:$0xff] %v4702_v44 }
 0x8b9   :  { %6119 = shalt.err (!%p6116_p4)
}
 0x8ba   :  { %s6120_s17 = scalar_lea.hbm %s8924_s13, 4096 }
 0x8bb   :  { %p6121_p5 = scmp.ne.s32.totalorder %s8924_s13, %s6120_s17  ;;  %p6124_p6 = scmp.lt.u32.totalorder %s6120_s17, %s8924_s13 }
 0x8bd   :  { %p6126_p7 = pnand %p6124_p6, %p6121_p5 }
 0x8bf   :  { %6129 = shalt.err (!%p6126_p7)
}
 0x8c0   :  { %4746 = dma.vmem_to_hbm [thread:$0]  %s4741_s29, 4096, %s8924_s13, [#allocation4], %s6148_s9, %s6148_s9, %s6149_s19  }
 0x8c1   :  { %6138 = dma.done.wait [#allocation4], 4096  }
 0x8c2   :  { %6139 = vsyncadd [#allocation4], 4294963200 }
 0x8c3   :  { %4750 = vsyncpa [#allocation3], 1 }
 0x8c4   :  { %4751 = vsyncpa [#allocation6], 1 }
 0x8c5   :  { %4752 = vsyncpa [#allocation9], 1 }
 0x8c6   :  { %4753 = vsyncpa [#allocation12], 1 }
 0x8c7   :  { %4754 = vsyncpa [#allocation4], 1 }

</bundles_post_ra>
